<compile_context>
chip_gen: v7x
topology: tpu7x:2x2x1
jax: 0.10.0
libtpu: 0.0.40
codegen_flags: <defaults>
</compile_context>

<pallas_src>
import functools

import jax
import jax.numpy as jnp
from jax.experimental import pallas as pl
from jax.experimental.pallas import tpu as pltpu


# ---------------------------------------------------------------------------
# Fused GEMM + bias + ReLU kernels
# ---------------------------------------------------------------------------
def _gemm_single_k_kernel(x_ref, w_ref, b_ref, o_ref):
    # Whole contraction in one MXU pass: no scratch accumulator, no pl.when
    # phases; bias + ReLU epilogue overlaps the MXU drain.
    y = jnp.dot(x_ref[...], w_ref[...], preferred_element_type=jnp.float32)
    o_ref[...] = jnp.maximum(y + b_ref[...], 0.0).astype(o_ref.dtype)


def _gemm_multi_k_kernel(x_ref, w_ref, b_ref, o_ref, acc_ref):
    @pl.when(pl.program_id(2) == 0)
    def _():
        acc_ref[...] = jnp.zeros_like(acc_ref)

    acc_ref[...] += jnp.dot(x_ref[...], w_ref[...],
                            preferred_element_type=jnp.float32)

    @pl.when(pl.program_id(2) == pl.num_programs(2) - 1)
    def _():
        o_ref[...] = jnp.maximum(acc_ref[...] + b_ref[...],
                                 0.0).astype(o_ref.dtype)


def gemm_bias_relu(x, w, b, *, out_dtype, tm=256, tk=None):
    """relu(x @ w + b).

    x: (M, K) bf16, w: (K, N) bf16 (K already padded consistently with x),
    b: (1, N) f32.  Only M is padded here (to the effective tile), and the
    padded rows are sliced off.  tk=None -> single K step (conv GEMMs);
    tk=int -> K-split accumulator kernel (fc1).
    """
    M, K = x.shape
    Kw, N = w.shape
    assert K == Kw and b.shape == (1, N)

    # Lane-dense output tile when possible; otherwise use the full (small) N.
    tn = 128 if N % 128 == 0 else N
    grid_n = N // tn

    # Never pad M past the next bf16 sublane tile (16); cap by requested tm.
    m_ceil16 = ((M + 15) // 16) * 16
    tm_eff = min(tm, m_ceil16)
    Mp = pl.cdiv(M, tm_eff) * tm_eff
    xp = x if Mp == M else jnp.pad(x, ((0, Mp - M), (0, 0)))
    grid_m = Mp // tm_eff

    if tk is None or tk >= K:
        out = pl.pallas_call(
            _gemm_single_k_kernel,
            out_shape=jax.ShapeDtypeStruct((Mp, N), out_dtype),
            grid_spec=pltpu.PrefetchScalarGridSpec(
                num_scalar_prefetch=0,
                grid=(grid_m, grid_n),
                in_specs=[
                    pl.BlockSpec((tm_eff, K), lambda i, j: (i, 0)),
                    pl.BlockSpec((K, tn), lambda i, j: (0, j)),
                    pl.BlockSpec((1, tn), lambda i, j: (0, j)),
                ],
                out_specs=pl.BlockSpec((tm_eff, tn), lambda i, j: (i, j)),
            ),
            compiler_params=pltpu.CompilerParams(
                dimension_semantics=("parallel", "parallel")),
        )(xp, w, b)
    else:
        assert K % tk == 0
        out = pl.pallas_call(
            _gemm_multi_k_kernel,
            out_shape=jax.ShapeDtypeStruct((Mp, N), out_dtype),
            grid_spec=pltpu.PrefetchScalarGridSpec(
                num_scalar_prefetch=0,
                grid=(grid_m, grid_n, K // tk),
                in_specs=[
                    pl.BlockSpec((tm_eff, tk), lambda i, j, k: (i, k)),
                    pl.BlockSpec((tk, tn), lambda i, j, k: (k, j)),
                    pl.BlockSpec((1, tn), lambda i, j, k: (0, j)),
                ],
                out_specs=pl.BlockSpec((tm_eff, tn), lambda i, j, k: (i, j)),
                scratch_shapes=[pltpu.VMEM((tm_eff, tn), jnp.float32)],
            ),
            compiler_params=pltpu.CompilerParams(
                dimension_semantics=("parallel", "parallel", "arbitrary")),
        )(xp, w, b)

    return out[:M] if Mp != M else out


# ---------------------------------------------------------------------------
# Conv as im2col + fused Pallas GEMM (valid padding, stride 1)
# ---------------------------------------------------------------------------
def _im2col(x, kh, kw, k_pad):
    N, H, W, C = x.shape
    Ho, Wo = H - kh + 1, W - kw + 1
    cols = [x[:, i:i + Ho, j:j + Wo, :] for i in range(kh) for j in range(kw)]
    if k_pad:
        # Fold the K padding into the concat instead of a separate jnp.pad.
        cols.append(jnp.zeros((N, Ho, Wo, k_pad), x.dtype))
    p = jnp.concatenate(cols, axis=-1)                  # (N, Ho, Wo, Kp)
    return p.reshape(N * Ho * Wo, kh * kw * C + k_pad), (N, Ho, Wo)


def conv2d_relu(x, w2, b, kh, kw, *, tm=256):
    """x: (N,H,W,C) bf16; w2: (Kp, Cout) bf16 pre-padded im2col weight."""
    Kp, cout = w2.shape
    k_pad = Kp - kh * kw * x.shape[-1]
    cols, (n, ho, wo) = _im2col(x, kh, kw, k_pad)
    y = gemm_bias_relu(cols, w2, b, out_dtype=jnp.bfloat16, tm=tm)
    return y.reshape(n, ho, wo, cout)


def maxpool2x2(x):
    # Plain XLA reduce: cheaper than a standalone Pallas launch + 4 strided
    # slices for ~330 KB of data.  Assumes even H/W (18x18 here).
    n, h, w, c = x.shape
    return x.reshape(n, h // 2, 2, w // 2, 2, c).max(axis=(2, 4))


# ---------------------------------------------------------------------------
# Model: conv1(3->32,k7) conv2(32->64,k3) conv3(64->128,k3) pool(2)
#        conv4(128->256,k2) flatten dropout fc1(16384->128)  [fc2 unused]
# ---------------------------------------------------------------------------
def _round_up16(k):
    return ((k + 15) // 16) * 16


def init_params(key):
    ks = jax.random.split(key, 6)

    def conv_params(k, kh, kw, cin, cout):
        w = (jax.random.normal(k, (kh, kw, cin, cout), jnp.float32)
             / jnp.sqrt(kh * kw * cin))
        K = kh * kw * cin
        w2 = w.reshape(K, cout)
        w2 = jnp.pad(w2, ((0, _round_up16(K) - K), (0, 0)))   # pad K once, at init
        return w2.astype(jnp.bfloat16), jnp.zeros((1, cout), jnp.float32)

    w1, b1 = conv_params(ks[0], 7, 7, 3, 32)
    w2, b2 = conv_params(ks[1], 3, 3, 32, 64)
    w3, b3 = conv_params(ks[2], 3, 3, 64, 128)
    w4, b4 = conv_params(ks[3], 2, 2, 128, 256)

    # fc1: PyTorch flattens NCHW (feature index = c*H*W + h*W + w).  We keep
    # activations in NHWC and permute the weight ROWS once at init instead of
    # transposing the activation at runtime.
    C, H, W, F = 256, 8, 8, 128
    wfc1_torch = (jax.random.normal(ks[4], (C * H * W, F), jnp.float32)
                  / jnp.sqrt(C * H * W))                # rows in (c,h,w) order
    wfc1 = (wfc1_torch.reshape(C, H, W, F)
            .transpose(1, 2, 0, 3)                      # -> (h,w,c) row order
            .reshape(H * W * C, F)
            .astype(jnp.bfloat16))
    bfc1 = jnp.zeros((1, F), jnp.float32)

    # fc2 is declared in __init__ but never used in forward(); kept for parity.
    wfc2 = jax.random.normal(ks[5], (128, 10), jnp.float32) / jnp.sqrt(128)
    bfc2 = jnp.zeros((10,), jnp.float32)

    return {"w1": w1, "b1": b1, "w2": w2, "b2": b2,
            "w3": w3, "b3": b3, "w4": w4, "b4": b4,
            "wfc1": wfc1, "bfc1": bfc1, "wfc2": wfc2, "bfc2": bfc2}


def model_forward(params, x_nchw):
    # PyTorch NCHW input -> NHWC, bf16 for the MXU (f32 accumulate in-kernel).
    x = jnp.transpose(x_nchw, (0, 2, 3, 1)).astype(jnp.bfloat16)     # (N,28,28,3)
    x = conv2d_relu(x, params["w1"], params["b1"], 7, 7)             # (N,22,22,32)
    x = conv2d_relu(x, params["w2"], params["b2"], 3, 3)             # (N,20,20,64)
    x = conv2d_relu(x, params["w3"], params["b3"], 3, 3)             # (N,18,18,128)
    x = maxpool2x2(x)                                                # (N,9,9,128)
    x = conv2d_relu(x, params["w4"], params["b4"], 2, 2)             # (N,8,8,256)
    x = x.reshape(x.shape[0], -1)                                    # NHWC flatten
    # TODO(synk): nn.Dropout(0.5) treated as eval-mode identity (inference).
    x = gemm_bias_relu(x, params["wfc1"], params["bfc1"],
                       out_dtype=jnp.float32, tm=16, tk=4096)        # (N,128)
    return x


if __name__ == "__main__":
    key = jax.random.PRNGKey(0)
    pkey, xkey = jax.random.split(key)
    params = init_params(pkey)
    # Spatial size 28x28 is forced by fc1's 256*8*8 input features.
    x = jax.random.normal(xkey, (2, 3, 28, 28), jnp.float32)

    fwd = jax.jit(functools.partial(model_forward, params))
    out = jax.block_until_ready(fwd(x))
    assert out.shape == (2, 128) and out.dtype == jnp.float32
    assert bool(jnp.all(out >= 0.0))  # final ReLU
    print("KERNEL_OK")
</pallas_src>

<mosaic_0001>
module attributes {stable_mosaic.version = 11 : i64} {
  func.func @_gemm_single_k_kernel(%arg0: i32, %arg1: i32, %arg2: memref<256x160xbf16, #tpu.memory_space<vmem>>, %arg3: memref<160x32xbf16, #tpu.memory_space<vmem>>, %arg4: memref<1x32xf32, #tpu.memory_space<vmem>>, %arg5: memref<256x32xbf16, #tpu.memory_space<vmem>>) attributes {dimension_semantics = [#tpu.dimension_semantics<parallel>, #tpu.dimension_semantics<parallel>], iteration_bounds = array<i64: 4, 1>, scalar_prefetch = 0 : i64, scratch_operands = 0 : i64, tpu.core_type = #tpu.core_type<tc>, window_params = [{transform_indices = @transform_0, window_bounds = array<i64: 256, 160>}, {transform_indices = @transform_1, window_bounds = array<i64: 160, 32>}, {transform_indices = @transform_2, window_bounds = array<i64: 1, 32>}, {transform_indices = @transform_3, window_bounds = array<i64: 256, 32>}]} {
    %c0 = arith.constant 0 : index
    %c0_0 = arith.constant 0 : index
    %0 = vector.load %arg2[%c0, %c0_0] : memref<256x160xbf16, #tpu.memory_space<vmem>>, vector<256x160xbf16>
    %c0_1 = arith.constant 0 : index
    %c0_2 = arith.constant 0 : index
    %1 = vector.load %arg3[%c0_1, %c0_2] : memref<160x32xbf16, #tpu.memory_space<vmem>>, vector<160x32xbf16>
    %cst = arith.constant dense<0.000000e+00> : vector<256x32xf32>
    %2 = tpu.matmul %0, %1, %cst {dimension_numbers = #tpu.dot_dimension_numbers<[1], [0], [0], [1], [0, 0, 1, 1], [], []>} : vector<256x160xbf16>, vector<160x32xbf16>, vector<256x32xf32> -> vector<256x32xf32>
    %c0_3 = arith.constant 0 : index
    %c0_4 = arith.constant 0 : index
    %3 = vector.load %arg4[%c0_3, %c0_4] : memref<1x32xf32, #tpu.memory_space<vmem>>, vector<1x32xf32>
    %4 = vector.broadcast %3 : vector<1x32xf32> to vector<256x32xf32>
    %5 = arith.addf %2, %4 : vector<256x32xf32>
    %cst_5 = arith.constant 0.000000e+00 : f32
    %6 = vector.broadcast %cst_5 : f32 to vector<256x32xf32>
    %7 = arith.maximumf %5, %6 : vector<256x32xf32>
    %8 = arith.truncf %7 : vector<256x32xf32> to vector<256x32xbf16>
    %c0_6 = arith.constant 0 : index
    %c0_7 = arith.constant 0 : index
    %9 = vector.load %arg5[%c0_6, %c0_7] : memref<256x32xbf16, #tpu.memory_space<vmem>>, vector<256x32xbf16>
    tpu.vector_store %arg5[%c0_6, %c0_7], %8 {strides = array<i32>} : memref<256x32xbf16, #tpu.memory_space<vmem>>, vector<256x32xbf16>,
    return
  }
  func.func @transform_0(%arg0: i32, %arg1: i32) -> (i32, i32) {
    %c0_i32 = arith.constant 0 : i32
    %c0_i32_0 = arith.constant 0 : i32
    return %arg0, %c0_i32 : i32, i32
  }
  func.func @transform_1(%arg0: i32, %arg1: i32) -> (i32, i32) {
    %c0_i32 = arith.constant 0 : i32
    %c0_i32_0 = arith.constant 0 : i32
    return %c0_i32, %arg1 : i32, i32
  }
  func.func @transform_2(%arg0: i32, %arg1: i32) -> (i32, i32) {
    %c0_i32 = arith.constant 0 : i32
    %c0_i32_0 = arith.constant 0 : i32
    return %c0_i32, %arg1 : i32, i32
  }
  func.func @transform_3(%arg0: i32, %arg1: i32) -> (i32, i32) {
    %c0_i32 = arith.constant 0 : i32
    return %arg0, %arg1 : i32, i32
  }
}

module attributes {stable_mosaic.version = 11 : i64} {
  func.func @_gemm_single_k_kernel(%arg0: i32, %arg1: i32, %arg2: memref<256x288xbf16, #tpu.memory_space<vmem>>, %arg3: memref<288x64xbf16, #tpu.memory_space<vmem>>, %arg4: memref<1x64xf32, #tpu.memory_space<vmem>>, %arg5: memref<256x64xbf16, #tpu.memory_space<vmem>>) attributes {dimension_semantics = [#tpu.dimension_semantics<parallel>, #tpu.dimension_semantics<parallel>], iteration_bounds = array<i64: 4, 1>, scalar_prefetch = 0 : i64, scratch_operands = 0 : i64, tpu.core_type = #tpu.core_type<tc>, window_params = [{transform_indices = @transform_0, window_bounds = array<i64: 256, 288>}, {transform_indices = @transform_1, window_bounds = array<i64: 288, 64>}, {transform_indices = @transform_2, window_bounds = array<i64: 1, 64>}, {transform_indices = @transform_3, window_bounds = array<i64: 256, 64>}]} {
    %c0 = arith.constant 0 : index
    %c0_0 = arith.constant 0 : index
    %0 = vector.load %arg2[%c0, %c0_0] : memref<256x288xbf16, #tpu.memory_space<vmem>>, vector<256x288xbf16>
    %c0_1 = arith.constant 0 : index
    %c0_2 = arith.constant 0 : index
    %1 = vector.load %arg3[%c0_1, %c0_2] : memref<288x64xbf16, #tpu.memory_space<vmem>>, vector<288x64xbf16>
    %cst = arith.constant dense<0.000000e+00> : vector<256x64xf32>
    %2 = tpu.matmul %0, %1, %cst {dimension_numbers = #tpu.dot_dimension_numbers<[1], [0], [0], [1], [0, 0, 1, 1], [], []>} : vector<256x288xbf16>, vector<288x64xbf16>, vector<256x64xf32> -> vector<256x64xf32>
    %c0_3 = arith.constant 0 : index
    %c0_4 = arith.constant 0 : index
    %3 = vector.load %arg4[%c0_3, %c0_4] : memref<1x64xf32, #tpu.memory_space<vmem>>, vector<1x64xf32>
    %4 = vector.broadcast %3 : vector<1x64xf32> to vector<256x64xf32>
    %5 = arith.addf %2, %4 : vector<256x64xf32>
    %cst_5 = arith.constant 0.000000e+00 : f32
    %6 = vector.broadcast %cst_5 : f32 to vector<256x64xf32>
    %7 = arith.maximumf %5, %6 : vector<256x64xf32>
    %8 = arith.truncf %7 : vector<256x64xf32> to vector<256x64xbf16>
    %c0_6 = arith.constant 0 : index
    %c0_7 = arith.constant 0 : index
    %9 = vector.load %arg5[%c0_6, %c0_7] : memref<256x64xbf16, #tpu.memory_space<vmem>>, vector<256x64xbf16>
    tpu.vector_store %arg5[%c0_6, %c0_7], %8 {strides = array<i32>} : memref<256x64xbf16, #tpu.memory_space<vmem>>, vector<256x64xbf16>,
    return
  }
  func.func @transform_0(%arg0: i32, %arg1: i32) -> (i32, i32) {
    %c0_i32 = arith.constant 0 : i32
    %c0_i32_0 = arith.constant 0 : i32
    return %arg0, %c0_i32 : i32, i32
  }
  func.func @transform_1(%arg0: i32, %arg1: i32) -> (i32, i32) {
    %c0_i32 = arith.constant 0 : i32
    %c0_i32_0 = arith.constant 0 : i32
    return %c0_i32, %arg1 : i32, i32
  }
  func.func @transform_2(%arg0: i32, %arg1: i32) -> (i32, i32) {
    %c0_i32 = arith.constant 0 : i32
    %c0_i32_0 = arith.constant 0 : i32
    return %c0_i32, %arg1 : i32, i32
  }
  func.func @transform_3(%arg0: i32, %arg1: i32) -> (i32, i32) {
    %c0_i32 = arith.constant 0 : i32
    return %arg0, %arg1 : i32, i32
  }
}

module attributes {stable_mosaic.version = 11 : i64} {
  func.func @_gemm_single_k_kernel(%arg0: i32, %arg1: i32, %arg2: memref<256x576xbf16, #tpu.memory_space<vmem>>, %arg3: memref<576x128xbf16, #tpu.memory_space<vmem>>, %arg4: memref<1x128xf32, #tpu.memory_space<vmem>>, %arg5: memref<256x128xbf16, #tpu.memory_space<vmem>>) attributes {dimension_semantics = [#tpu.dimension_semantics<parallel>, #tpu.dimension_semantics<parallel>], iteration_bounds = array<i64: 3, 1>, scalar_prefetch = 0 : i64, scratch_operands = 0 : i64, tpu.core_type = #tpu.core_type<tc>, window_params = [{transform_indices = @transform_0, window_bounds = array<i64: 256, 576>}, {transform_indices = @transform_1, window_bounds = array<i64: 576, 128>}, {transform_indices = @transform_2, window_bounds = array<i64: 1, 128>}, {transform_indices = @transform_3, window_bounds = array<i64: 256, 128>}]} {
    %c0 = arith.constant 0 : index
    %c0_0 = arith.constant 0 : index
    %0 = vector.load %arg2[%c0, %c0_0] : memref<256x576xbf16, #tpu.memory_space<vmem>>, vector<256x576xbf16>
    %c0_1 = arith.constant 0 : index
    %c0_2 = arith.constant 0 : index
    %1 = vector.load %arg3[%c0_1, %c0_2] : memref<576x128xbf16, #tpu.memory_space<vmem>>, vector<576x128xbf16>
    %cst = arith.constant dense<0.000000e+00> : vector<256x128xf32>
    %2 = tpu.matmul %0, %1, %cst {dimension_numbers = #tpu.dot_dimension_numbers<[1], [0], [0], [1], [0, 0, 1, 1], [], []>} : vector<256x576xbf16>, vector<576x128xbf16>, vector<256x128xf32> -> vector<256x128xf32>
    %c0_3 = arith.constant 0 : index
    %c0_4 = arith.constant 0 : index
    %3 = vector.load %arg4[%c0_3, %c0_4] : memref<1x128xf32, #tpu.memory_space<vmem>>, vector<1x128xf32>
    %4 = vector.broadcast %3 : vector<1x128xf32> to vector<256x128xf32>
    %5 = arith.addf %2, %4 : vector<256x128xf32>
    %cst_5 = arith.constant 0.000000e+00 : f32
    %6 = vector.broadcast %cst_5 : f32 to vector<256x128xf32>
    %7 = arith.maximumf %5, %6 : vector<256x128xf32>
    %8 = arith.truncf %7 : vector<256x128xf32> to vector<256x128xbf16>
    %c0_6 = arith.constant 0 : index
    %c0_7 = arith.constant 0 : index
    %9 = vector.load %arg5[%c0_6, %c0_7] : memref<256x128xbf16, #tpu.memory_space<vmem>>, vector<256x128xbf16>
    tpu.vector_store %arg5[%c0_6, %c0_7], %8 {strides = array<i32>} : memref<256x128xbf16, #tpu.memory_space<vmem>>, vector<256x128xbf16>,
    return
  }
  func.func @transform_0(%arg0: i32, %arg1: i32) -> (i32, i32) {
    %c0_i32 = arith.constant 0 : i32
    %c0_i32_0 = arith.constant 0 : i32
    return %arg0, %c0_i32 : i32, i32
  }
  func.func @transform_1(%arg0: i32, %arg1: i32) -> (i32, i32) {
    %c0_i32 = arith.constant 0 : i32
    %c0_i32_0 = arith.constant 0 : i32
    return %c0_i32, %arg1 : i32, i32
  }
  func.func @transform_2(%arg0: i32, %arg1: i32) -> (i32, i32) {
    %c0_i32 = arith.constant 0 : i32
    %c0_i32_0 = arith.constant 0 : i32
    return %c0_i32, %arg1 : i32, i32
  }
  func.func @transform_3(%arg0: i32, %arg1: i32) -> (i32, i32) {
    %c0_i32 = arith.constant 0 : i32
    return %arg0, %arg1 : i32, i32
  }
}

module attributes {stable_mosaic.version = 11 : i64} {
  func.func @_gemm_single_k_kernel(%arg0: i32, %arg1: i32, %arg2: memref<128x512xbf16, #tpu.memory_space<vmem>>, %arg3: memref<512x128xbf16, #tpu.memory_space<vmem>>, %arg4: memref<1x128xf32, #tpu.memory_space<vmem>>, %arg5: memref<128x128xbf16, #tpu.memory_space<vmem>>) attributes {dimension_semantics = [#tpu.dimension_semantics<parallel>, #tpu.dimension_semantics<parallel>], iteration_bounds = array<i64: 1, 2>, scalar_prefetch = 0 : i64, scratch_operands = 0 : i64, tpu.core_type = #tpu.core_type<tc>, window_params = [{transform_indices = @transform_0, window_bounds = array<i64: 128, 512>}, {transform_indices = @transform_1, window_bounds = array<i64: 512, 128>}, {transform_indices = @transform_2, window_bounds = array<i64: 1, 128>}, {transform_indices = @transform_3, window_bounds = array<i64: 128, 128>}]} {
    %c0 = arith.constant 0 : index
    %c0_0 = arith.constant 0 : index
    %0 = vector.load %arg2[%c0, %c0_0] : memref<128x512xbf16, #tpu.memory_space<vmem>>, vector<128x512xbf16>
    %c0_1 = arith.constant 0 : index
    %c0_2 = arith.constant 0 : index
    %1 = vector.load %arg3[%c0_1, %c0_2] : memref<512x128xbf16, #tpu.memory_space<vmem>>, vector<512x128xbf16>
    %cst = arith.constant dense<0.000000e+00> : vector<128x128xf32>
    %2 = tpu.matmul %0, %1, %cst {dimension_numbers = #tpu.dot_dimension_numbers<[1], [0], [0], [1], [0, 0, 1, 1], [], []>} : vector<128x512xbf16>, vector<512x128xbf16>, vector<128x128xf32> -> vector<128x128xf32>
    %c0_3 = arith.constant 0 : index
    %c0_4 = arith.constant 0 : index
    %3 = vector.load %arg4[%c0_3, %c0_4] : memref<1x128xf32, #tpu.memory_space<vmem>>, vector<1x128xf32>
    %4 = vector.broadcast %3 : vector<1x128xf32> to vector<128x128xf32>
    %5 = arith.addf %2, %4 : vector<128x128xf32>
    %cst_5 = arith.constant 0.000000e+00 : f32
    %6 = vector.broadcast %cst_5 : f32 to vector<128x128xf32>
    %7 = arith.maximumf %5, %6 : vector<128x128xf32>
    %8 = arith.truncf %7 : vector<128x128xf32> to vector<128x128xbf16>
    %c0_6 = arith.constant 0 : index
    %c0_7 = arith.constant 0 : index
    %9 = vector.load %arg5[%c0_6, %c0_7] : memref<128x128xbf16, #tpu.memory_space<vmem>>, vector<128x128xbf16>
    tpu.vector_store %arg5[%c0_6, %c0_7], %8 {strides = array<i32>} : memref<128x128xbf16, #tpu.memory_space<vmem>>, vector<128x128xbf16>,
    return
  }
  func.func @transform_0(%arg0: i32, %arg1: i32) -> (i32, i32) {
    %c0_i32 = arith.constant 0 : i32
    %c0_i32_0 = arith.constant 0 : i32
    return %arg0, %c0_i32 : i32, i32
  }
  func.func @transform_1(%arg0: i32, %arg1: i32) -> (i32, i32) {
    %c0_i32 = arith.constant 0 : i32
    %c0_i32_0 = arith.constant 0 : i32
    return %c0_i32, %arg1 : i32, i32
  }
  func.func @transform_2(%arg0: i32, %arg1: i32) -> (i32, i32) {
    %c0_i32 = arith.constant 0 : i32
    %c0_i32_0 = arith.constant 0 : i32
    return %c0_i32, %arg1 : i32, i32
  }
  func.func @transform_3(%arg0: i32, %arg1: i32) -> (i32, i32) {
    %c0_i32 = arith.constant 0 : i32
    return %arg0, %arg1 : i32, i32
  }
}

module attributes {stable_mosaic.version = 11 : i64} {
  func.func @_gemm_multi_k_kernel(%arg0: i32, %arg1: i32, %arg2: i32, %arg3: memref<16x4096xbf16, #tpu.memory_space<vmem>>, %arg4: memref<4096x128xbf16, #tpu.memory_space<vmem>>, %arg5: memref<1x128xf32, #tpu.memory_space<vmem>>, %arg6: memref<16x128xf32, #tpu.memory_space<vmem>>, %arg7: memref<16x128xf32, #tpu.memory_space<vmem>>) attributes {dimension_semantics = [#tpu.dimension_semantics<parallel>, #tpu.dimension_semantics<parallel>, #tpu.dimension_semantics<arbitrary>], iteration_bounds = array<i64: 1, 1, 4>, scalar_prefetch = 0 : i64, scratch_operands = 1 : i64, tpu.core_type = #tpu.core_type<tc>, window_params = [{transform_indices = @transform_0, window_bounds = array<i64: 16, 4096>}, {transform_indices = @transform_1, window_bounds = array<i64: 4096, 128>}, {transform_indices = @transform_2, window_bounds = array<i64: 1, 128>}, {transform_indices = @transform_3, window_bounds = array<i64: 16, 128>}]} {
    %c0_i32 = arith.constant 0 : i32
    %0 = arith.cmpi eq, %arg2, %c0_i32 : i32
    %1 = arith.extui %0 : i1 to i32
    %c0_i32_0 = arith.constant 0 : i32
    %2 = arith.cmpi ne, %1, %c0_i32_0 : i32
    scf.if %2 {
      %cst_9 = arith.constant 0.000000e+00 : f32
      %12 = vector.broadcast %cst_9 : f32 to vector<16x128xf32>
      %c0_10 = arith.constant 0 : index
      %c0_11 = arith.constant 0 : index
      %13 = vector.load %arg7[%c0_10, %c0_11] : memref<16x128xf32, #tpu.memory_space<vmem>>, vector<16x128xf32>
      tpu.vector_store %arg7[%c0_10, %c0_11], %12 {strides = array<i32>} : memref<16x128xf32, #tpu.memory_space<vmem>>, vector<16x128xf32>,
    } else {
    }
    %c0 = arith.constant 0 : index
    %c0_1 = arith.constant 0 : index
    %3 = vector.load %arg7[%c0, %c0_1] : memref<16x128xf32, #tpu.memory_space<vmem>>, vector<16x128xf32>
    %c0_2 = arith.constant 0 : index
    %c0_3 = arith.constant 0 : index
    %4 = vector.load %arg3[%c0_2, %c0_3] : memref<16x4096xbf16, #tpu.memory_space<vmem>>, vector<16x4096xbf16>
    %c0_4 = arith.constant 0 : index
    %c0_5 = arith.constant 0 : index
    %5 = vector.load %arg4[%c0_4, %c0_5] : memref<4096x128xbf16, #tpu.memory_space<vmem>>, vector<4096x128xbf16>
    %cst = arith.constant dense<0.000000e+00> : vector<16x128xf32>
    %6 = tpu.matmul %4, %5, %cst {dimension_numbers = #tpu.dot_dimension_numbers<[1], [0], [0], [1], [0, 0, 1, 1], [], []>} : vector<16x4096xbf16>, vector<4096x128xbf16>, vector<16x128xf32> -> vector<16x128xf32>
    %7 = arith.addf %3, %6 : vector<16x128xf32>
    %c0_6 = arith.constant 0 : index
    %c0_7 = arith.constant 0 : index
    %8 = vector.load %arg7[%c0_6, %c0_7] : memref<16x128xf32, #tpu.memory_space<vmem>>, vector<16x128xf32>
    tpu.vector_store %arg7[%c0_6, %c0_7], %7 {strides = array<i32>} : memref<16x128xf32, #tpu.memory_space<vmem>>, vector<16x128xf32>,
    %c3_i32 = arith.constant 3 : i32
    %9 = arith.cmpi eq, %arg2, %c3_i32 : i32
    %10 = arith.extui %9 : i1 to i32
    %c0_i32_8 = arith.constant 0 : i32
    %11 = arith.cmpi ne, %10, %c0_i32_8 : i32
    scf.if %11 {
      %c0_9 = arith.constant 0 : index
      %c0_10 = arith.constant 0 : index
      %12 = vector.load %arg7[%c0_9, %c0_10] : memref<16x128xf32, #tpu.memory_space<vmem>>, vector<16x128xf32>
      %c0_11 = arith.constant 0 : index
      %c0_12 = arith.constant 0 : index
      %13 = vector.load %arg5[%c0_11, %c0_12] : memref<1x128xf32, #tpu.memory_space<vmem>>, vector<1x128xf32>
      %14 = vector.broadcast %13 : vector<1x128xf32> to vector<16x128xf32>
      %15 = arith.addf %12, %14 : vector<16x128xf32>
      %cst_13 = arith.constant 0.000000e+00 : f32
      %16 = vector.broadcast %cst_13 : f32 to vector<16x128xf32>
      %17 = arith.maximumf %15, %16 : vector<16x128xf32>
      %c0_14 = arith.constant 0 : index
      %c0_15 = arith.constant 0 : index
      %18 = vector.load %arg6[%c0_14, %c0_15] : memref<16x128xf32, #tpu.memory_space<vmem>>, vector<16x128xf32>
      tpu.vector_store %arg6[%c0_14, %c0_15], %17 {strides = array<i32>} : memref<16x128xf32, #tpu.memory_space<vmem>>, vector<16x128xf32>,
    } else {
    }
    return
  }
  func.func @transform_0(%arg0: i32, %arg1: i32, %arg2: i32) -> (i32, i32) {
    %c0_i32 = arith.constant 0 : i32
    return %arg0, %arg2 : i32, i32
  }
  func.func @transform_1(%arg0: i32, %arg1: i32, %arg2: i32) -> (i32, i32) {
    %c0_i32 = arith.constant 0 : i32
    return %arg2, %arg1 : i32, i32
  }
  func.func @transform_2(%arg0: i32, %arg1: i32, %arg2: i32) -> (i32, i32) {
    %c0_i32 = arith.constant 0 : i32
    %c0_i32_0 = arith.constant 0 : i32
    return %c0_i32, %arg1 : i32, i32
  }
  func.func @transform_3(%arg0: i32, %arg1: i32, %arg2: i32) -> (i32, i32) {
    %c0_i32 = arith.constant 0 : i32
    return %arg0, %arg1 : i32, i32
  }
}

</mosaic_0001>

<bundles_post_ra>
// kernel: model_forward.5
= control target key start
LH: loop header
LB: loop body
LE: loop exit
PB: predicated region body
PF: predicated region fallthrough
CT: control target
= control target key end

     0   :  { %s1283_s12 = smov 0   ;;  %s1285_s13 = smov 0   ;;  %s1503_s0 = inlined_call_operand.vmem [shape: bf16[1024,160], index: 0, kind: input, shape index: {}]   ;;  %s1504_s1 = inlined_call_operand.vmem [shape: bf16[160,32], index: 1, kind: input, shape index: {}]   ;;  %s1505_s2 = inlined_call_operand.vmem [shape: f32[1,32], index: 2, kind: input, shape index: {}]   ;;  %s1506_s3 = inlined_call_operand.vmem [shape: bf16[1024,32], index: 3, kind: output, shape index: {}]  }
   0x1   :  { %s1287_s14 = smov 0  }
   0x2 LB: > { %s25_s15 = sadd.s32 1, %s1256_s13  ;;  %p1003_p0 = scmp.ge.s32.totalorder %s1260_s14, 1  ;;  %s1260_s14 = sphi %s1287_s14, %s13_s14   ;;  %s1256_s13 = sphi %s1285_s13, %s1508_s13   ;;  %s1252_s12 = sphi %s1283_s12, %s1507_s12  }
   0x3   : > { %p27_p1 = scmp.ge.s32.totalorder %s25_s15, 4  ;;  %p170_p2 = scmp.lt.s32.totalorder %s1260_s14, 5 }
   0x5   : > { %s1510_s15 = smov (%p27_p1, %s25_s15), 0  ;;  %p171_p3 = pnand %p1003_p0, %p170_p2 }
   0x6   : > { %v1180_v0 = vld [vmem:[%s1504_s1] sm:$0xff] (!%p171_p3)   ;;  %v1262_v1 = vmov (!%p171_p3), 0   ;;  %s1004_s18 = sshll.u32 (!%p171_p3), %s1252_s12, 5  ;;  %v1181_v2 = vld [vmem:[%s1504_s1 + $0x8] sm:$0xff] (!%p171_p3)   ;;  %v1182_v3 = vld [vmem:[%s1504_s1 + $0x10] sm:$0xff] (!%p171_p3)   ;;  %vm492_vm0 = vcmask (!%p171_p3), 261120  }
   0x7   : > { %174 = sbr.rel (%p171_p3) target bundleno = 324 (0x144), region = 32  ;;  %541 = vmatprep.subr.bf16.mxu0 (!%p171_p3), %v1262_v1  ;;  %1135 = vmatprep.subr.bf16.mxu1 (!%p171_p3), %v1262_v1  ;;  %p206_p4 = scmp.lt.s32.totalorder (!%p171_p3), %s1004_s18, 127  ;;  %v1183_v4 = vld [vmem:[%s1504_s1 + $0x18] sm:$0xff] (!%p171_p3)   ;;  %v1184_v7 = vld [vmem:[%s1504_s1 + $0x20] sm:$0xff] (!%p171_p3)   ;;  %v1185_v8 = vld [vmem:[%s1504_s1 + $0x28] sm:$0xff] (!%p171_p3)   ;;  %vm862_vm1 = vcmask (!%p171_p3), 257024  }
   0x8   : > { %542 = vmatpush1.bf16.msra.mxu0 (!%p171_p3), %v1180_v0  ;;  %1145 = vmatpush1.bf16.msra.mxu1 (!%p171_p3), %v1180_v0  ;;  %v1186_v9 = vld [vmem:[%s1504_s1 + $0x30] sm:$0xff] (!%p171_p3)   ;;  %v1187_v10 = vld [vmem:[%s1504_s1 + $0x38] sm:$0xff] (!%p171_p3)   ;;  %v1188_v11 = vld [vmem:[%s1504_s1 + $0x40] sm:$0xff] (!%p171_p3)  }
   0x9   : > { %543 = vmatprep.subr.bf16.mxu0 (!%p171_p3), %v1262_v1  ;;  %1136 = vmatprep.subr.bf16.mxu1 (!%p171_p3), %v1262_v1  ;;  %v1189_v12 = vld [vmem:[%s1504_s1 + $0x48] sm:$0xff] (!%p171_p3)   ;;  %v1390_v43 = vld [vmem:[%s1505_s2] ss:$0 sm:$0xff] (!%p171_p3) }
   0xc   : > { %544 = vmatpush1.bf16.msra.mxu0 (!%p171_p3), %v1181_v2  ;;  %1146 = vmatpush1.bf16.msra.mxu1 (!%p171_p3), %v1181_v2 }
   0xd   : > { %545 = vmatprep.subr.bf16.mxu0 (!%p171_p3), %v1262_v1  ;;  %1137 = vmatprep.subr.bf16.mxu1 (!%p171_p3), %v1262_v1 }
   0xe   : > { %s1512_s18 = smov (!%p206_p4, %s1004_s18), 127 }
   0xf   : > { %s1102_s23 = sshll.u32 %s1512_s18, 3  ;;  %s1008_s20 = sshll.u32 %s1512_s18, 2 }
  0x10   : > { %s1316_s26 = scalar_lea.vmem %s1503_s0, %s1102_s23  ;;  %546 = vmatpush1.bf16.msra.mxu0 %v1182_v3  ;;  %1147 = vmatpush1.bf16.msra.mxu1 %v1182_v3  ;;  %s1400_s18 = scalar_lea.vmem %s1506_s3, %s1008_s20 }
  0x11   : > { %547 = vmatprep.subr.bf16.mxu0 %v1262_v1  ;;  %1138 = vmatprep.subr.bf16.mxu1 %v1262_v1  ;;  %v1192_v5 = vld [vmem:[%s1316_s26 + $0x4] ss:$8 sps:$4 sm:$0xff]   ;;  %v1190_v13 = vld [vmem:[%s1316_s26] ss:$8 sps:$4 sm:$0xff]   ;;  %v1196_v15 = vld [vmem:[%s1316_s26 + $0x14] ss:$8 sps:$4 sm:$0xff]  }
  0x12   : > { %v1195_v6 = vld [vmem:[%s1316_s26 + $0x84] ss:$8 sps:$4 sm:$0xff]   ;;  %1052 = vmatprep.mubr.msk.bf16.mxu0 %vm492_vm0, %v1192_v5  ;;  %v1193_v14 = vld [vmem:[%s1316_s26 + $0x80] ss:$8 sps:$4 sm:$0xff]   ;;  %v1198_v16 = vld [vmem:[%s1316_s26 + $0x94] ss:$8 sps:$4 sm:$0xff]  }
  0x13   : > { %1060 = vmatprep.mubr.msk.bf16.mxu1 %vm492_vm0, %v1195_v6  ;;  %v1200_v17 = vld [vmem:[%s1316_s26 + $0x10] ss:$8 sps:$4 sm:$0xff]   ;;  %v1202_v19 = vld [vmem:[%s1316_s26 + $0x24] ss:$8 sps:$4 sm:$0xff]   ;;  %v1206_v21 = vld [vmem:[%s1316_s26 + $0x20] ss:$8 sps:$4 sm:$0xff]  }
  0x14   : > { %548 = vmatpush1.bf16.msra.mxu0 %v1183_v4  ;;  %1148 = vmatpush1.bf16.msra.mxu1 %v1183_v4  ;;  %v1201_v18 = vld [vmem:[%s1316_s26 + $0x90] ss:$8 sps:$4 sm:$0xff]   ;;  %v1204_v20 = vld [vmem:[%s1316_s26 + $0xa4] ss:$8 sps:$4 sm:$0xff]   ;;  %v1207_v22 = vld [vmem:[%s1316_s26 + $0xa0] ss:$8 sps:$4 sm:$0xff]  }
  0x15   : > { %549 = vmatprep.subr.bf16.mxu0 %v1262_v1  ;;  %1139 = vmatprep.subr.bf16.mxu1 %v1262_v1  ;;  %v1208_v23 = vld [vmem:[%s1316_s26 + $0x34] ss:$8 sps:$4 sm:$0xff]   ;;  %v1212_v25 = vld [vmem:[%s1316_s26 + $0x30] ss:$8 sps:$4 sm:$0xff]   ;;  %v1214_v27 = vld [vmem:[%s1316_s26 + $0x44] ss:$8 sps:$4 sm:$0xff]  }
  0x16   : > { %v1210_v24 = vld [vmem:[%s1316_s26 + $0xb4] ss:$8 sps:$4 sm:$0xff]   ;;  %v1213_v26 = vld [vmem:[%s1316_s26 + $0xb0] ss:$8 sps:$4 sm:$0xff]   ;;  %v1216_v28 = vld [vmem:[%s1316_s26 + $0xc4] ss:$8 sps:$4 sm:$0xff]  }
  0x17   : > { %v1218_v29 = vld [vmem:[%s1316_s26 + $0x40] ss:$8 sps:$4 sm:$0xff]   ;;  %v1220_v31 = vld [vmem:[%s1316_s26 + $0x54] ss:$8 sps:$4 sm:$0xff]   ;;  %v1224_v33 = vld [vmem:[%s1316_s26 + $0x50] ss:$8 sps:$4 sm:$0xff]  }
  0x18   : > { %550 = vmatpush1.bf16.msra.mxu0 %v1184_v7  ;;  %1149 = vmatpush1.bf16.msra.mxu1 %v1184_v7  ;;  %v1219_v30 = vld [vmem:[%s1316_s26 + $0xc0] ss:$8 sps:$4 sm:$0xff]   ;;  %v1222_v32 = vld [vmem:[%s1316_s26 + $0xd4] ss:$8 sps:$4 sm:$0xff]   ;;  %v1225_v34 = vld [vmem:[%s1316_s26 + $0xd0] ss:$8 sps:$4 sm:$0xff]  }
  0x19   : > { %551 = vmatprep.subr.bf16.mxu0 %v1262_v1  ;;  %1140 = vmatprep.subr.bf16.mxu1 %v1262_v1  ;;  %v1226_v35 = vld [vmem:[%s1316_s26 + $0x64] ss:$8 sps:$4 sm:$0xff]   ;;  %v1230_v37 = vld [vmem:[%s1316_s26 + $0x60] ss:$8 sps:$4 sm:$0xff]   ;;  %v1232_v39 = vld [vmem:[%s1316_s26 + $0x74] ss:$8 sps:$4 sm:$0xff]  }
  0x1a   : > { %v1228_v36 = vld [vmem:[%s1316_s26 + $0xe4] ss:$8 sps:$4 sm:$0xff]   ;;  %v1231_v38 = vld [vmem:[%s1316_s26 + $0xe0] ss:$8 sps:$4 sm:$0xff]   ;;  %v1234_v40 = vld [vmem:[%s1316_s26 + $0xf4] ss:$8 sps:$4 sm:$0xff]  }
  0x1b   : > { %v1236_v41 = vld [vmem:[%s1316_s26 + $0x70] ss:$8 sps:$4 sm:$0xff]  }
  0x1c   : > { %552 = vmatpush1.bf16.msra.mxu0 %v1185_v8  ;;  %1150 = vmatpush1.bf16.msra.mxu1 %v1185_v8  ;;  %v1237_v42 = vld [vmem:[%s1316_s26 + $0xf0] ss:$8 sps:$4 sm:$0xff]  }
  0x1d   : > { %553 = vmatprep.subr.bf16.mxu0 %v1262_v1  ;;  %1141 = vmatprep.subr.bf16.mxu1 %v1262_v1 }
  0x20   : > { %554 = vmatpush1.bf16.msra.mxu0 %v1186_v9  ;;  %1151 = vmatpush1.bf16.msra.mxu1 %v1186_v9 }
  0x21   : > { %555 = vmatprep.subr.bf16.mxu0 %v1262_v1  ;;  %1142 = vmatprep.subr.bf16.mxu1 %v1262_v1 }
  0x24   : > { %556 = vmatpush1.bf16.msra.mxu0 %v1187_v10  ;;  %1152 = vmatpush1.bf16.msra.mxu1 %v1187_v10 }
  0x25   : > { %557 = vmatprep.subr.bf16.mxu0 %v1262_v1  ;;  %1143 = vmatprep.subr.bf16.mxu1 %v1262_v1 }
  0x28   : > { %558 = vmatpush1.bf16.msra.mxu0 %v1188_v11  ;;  %1153 = vmatpush1.bf16.msra.mxu1 %v1188_v11 }
  0x29   : > { %559 = vmatprep.subr.bf16.mxu0 %v1262_v1  ;;  %1144 = vmatprep.subr.bf16.mxu1 %v1262_v1 }
  0x2c   : > { %560 = vmatpush1.bf16.msra.mxu0 %v1189_v12  ;;  %1154 = vmatpush1.bf16.msra.mxu1 %v1189_v12 }
  0x2f   : > { %574 = vmatmul.mubr.bf16.vlgmr.msra.gmra.mrb[0].mxu0 %v1190_v13  ;;  %638 = vmatmul.mubr.bf16.vlgmr.msra.gmra.mrb[0].mxu1 %v1193_v14 }
  0x30   : > { %1053 = vmatprep.mubr.msk.bf16.mxu0 %vm492_vm0, %v1196_v15  ;;  %1061 = vmatprep.mubr.msk.bf16.mxu1 %vm492_vm0, %v1198_v16 }
  0x37   : > { %582 = vmatmul.mubr.bf16.gmra.mrb[4].mxu0 %v1200_v17  ;;  %646 = vmatmul.mubr.bf16.gmra.mrb[4].mxu1 %v1201_v18 }
  0x38   : > { %1054 = vmatprep.mubr.msk.bf16.mxu0 %vm492_vm0, %v1202_v19  ;;  %1062 = vmatprep.mubr.msk.bf16.mxu1 %vm492_vm0, %v1204_v20 }
  0x3f   : > { %590 = vmatmul.mubr.bf16.gmra.mrb[8].mxu0 %v1206_v21  ;;  %654 = vmatmul.mubr.bf16.gmra.mrb[8].mxu1 %v1207_v22 }
  0x40   : > { %1055 = vmatprep.mubr.msk.bf16.mxu0 %vm492_vm0, %v1208_v23  ;;  %1063 = vmatprep.mubr.msk.bf16.mxu1 %vm492_vm0, %v1210_v24 }
  0x47   : > { %598 = vmatmul.mubr.bf16.gmra.mrb[12].mxu0 %v1212_v25  ;;  %662 = vmatmul.mubr.bf16.gmra.mrb[12].mxu1 %v1213_v26 }
  0x48   : > { %1056 = vmatprep.mubr.msk.bf16.mxu0 %vm492_vm0, %v1214_v27  ;;  %1064 = vmatprep.mubr.msk.bf16.mxu1 %vm492_vm0, %v1216_v28 }
  0x4f   : > { %606 = vmatmul.mubr.bf16.gmra.mrb[16].mxu0 %v1218_v29  ;;  %670 = vmatmul.mubr.bf16.gmra.mrb[16].mxu1 %v1219_v30 }
  0x50   : > { %1057 = vmatprep.mubr.msk.bf16.mxu0 %vm492_vm0, %v1220_v31  ;;  %1065 = vmatprep.mubr.msk.bf16.mxu1 %vm492_vm0, %v1222_v32 }
  0x57   : > { %614 = vmatmul.mubr.bf16.gmra.mrb[20].mxu0 %v1224_v33  ;;  %678 = vmatmul.mubr.bf16.gmra.mrb[20].mxu1 %v1225_v34 }
  0x58   : > { %1058 = vmatprep.mubr.msk.bf16.mxu0 %vm492_vm0, %v1226_v35  ;;  %1066 = vmatprep.mubr.msk.bf16.mxu1 %vm492_vm0, %v1228_v36 }
  0x5f   : > { %622 = vmatmul.mubr.bf16.gmra.mrb[24].mxu0 %v1230_v37  ;;  %686 = vmatmul.mubr.bf16.gmra.mrb[24].mxu1 %v1231_v38 }
  0x60   : > { %1059 = vmatprep.mubr.msk.bf16.mxu0 %vm492_vm0, %v1232_v39  ;;  %1067 = vmatprep.mubr.msk.bf16.mxu1 %vm492_vm0, %v1234_v40 }
  0x67   : > { %630 = vmatmul.mubr.bf16.gmra.mrb[28].mxu0 %v1236_v41  ;;  %694 = vmatmul.mubr.bf16.gmra.mrb[28].mxu1 %v1237_v42 }
 0x102   : > { %v575_v44 = vpop.f32.mrb[0].mxu0  ;;  %v639_v45 = vpop.f32.mrb[0].mxu1 }
 0x103   : > { %v576_v46 = vadd.f32 %v1390_v43, %v575_v44  ;;  %v640_v47 = vadd.f32 %v1390_v43, %v639_v45  ;;  %v577_v48 = vpop.f32.mrb[1].mxu0  ;;  %v641_v49 = vpop.f32.mrb[1].mxu1 }
 0x104   : > { %v578_v50 = vpop.f32.mrb[2].mxu0  ;;  %v642_v51 = vpop.f32.mrb[2].mxu1 }
 0x105   : > { %v702_v52 = vmax.f32 %v576_v46, 0.0  ;;  %v718_v53 = vmax.f32 %v640_v47, 0.0  ;;  %v579_v54 = vadd.f32 %v1390_v43, %v578_v50  ;;  %v643_v55 = vadd.f32 %v1390_v43, %v642_v51  ;;  %v580_v56 = vpop.f32.mrb[3].mxu0  ;;  %v644_v57 = vpop.f32.mrb[3].mxu1 }
 0x107   : > { %v1103_v58 = vpack.c.bf16 %v702_v52, %v702_v52  ;;  %v1119_v59 = vpack.c.bf16 %v718_v53, %v718_v53  ;;  %v703_v60 = vmax.f32 %v579_v54, 0.0  ;;  %v719_v61 = vmax.f32 %v643_v55, 0.0 }
 0x109   : > { %863 = vst.msk [vmem:[%s1400_s18] sm:$0xf] %vm862_vm1, %v1103_v58  ;;  %879 = vst.msk [vmem:[%s1400_s18 + $0x40] sm:$0xf] %vm862_vm1, %v1119_v59  ;;  %v1104_v62 = vpack.c.bf16 %v703_v60, %v703_v60  ;;  %v1120_v63 = vpack.c.bf16 %v719_v61, %v719_v61 }
 0x10a   : > { %v583_v0 = vpop.f32.mrb[4].mxu0  ;;  %v647_v1 = vpop.f32.mrb[4].mxu1 }
 0x10b   : > { %864 = vst.msk [vmem:[%s1400_s18 + $0x4] sm:$0xf] %vm862_vm1, %v1104_v62  ;;  %880 = vst.msk [vmem:[%s1400_s18 + $0x44] sm:$0xf] %vm862_vm1, %v1120_v63  ;;  %v584_v2 = vadd.f32 %v1390_v43, %v583_v0  ;;  %v648_v3 = vadd.f32 %v1390_v43, %v647_v1  ;;  %v585_v4 = vpop.f32.mrb[5].mxu0  ;;  %v649_v5 = vpop.f32.mrb[5].mxu1 }
 0x10c   : > { %v586_v6 = vpop.f32.mrb[6].mxu0  ;;  %v650_v7 = vpop.f32.mrb[6].mxu1 }
 0x10d   : > { %v704_v8 = vmax.f32 %v584_v2, 0.0  ;;  %v720_v9 = vmax.f32 %v648_v3, 0.0  ;;  %v587_v10 = vadd.f32 %v1390_v43, %v586_v6  ;;  %v651_v11 = vadd.f32 %v1390_v43, %v650_v7  ;;  %v588_v12 = vpop.f32.mrb[7].mxu0  ;;  %v652_v13 = vpop.f32.mrb[7].mxu1 }
 0x10f   : > { %v1105_v14 = vpack.c.bf16 %v704_v8, %v704_v8  ;;  %v1121_v15 = vpack.c.bf16 %v720_v9, %v720_v9  ;;  %v705_v16 = vmax.f32 %v587_v10, 0.0  ;;  %v721_v17 = vmax.f32 %v651_v11, 0.0 }
 0x111   : > { %865 = vst.msk [vmem:[%s1400_s18 + $0x8] sm:$0xf] %vm862_vm1, %v1105_v14  ;;  %881 = vst.msk [vmem:[%s1400_s18 + $0x48] sm:$0xf] %vm862_vm1, %v1121_v15  ;;  %v1106_v18 = vpack.c.bf16 %v705_v16, %v705_v16  ;;  %v1122_v19 = vpack.c.bf16 %v721_v17, %v721_v17 }
 0x112   : > { %v591_v20 = vpop.f32.mrb[8].mxu0  ;;  %v655_v21 = vpop.f32.mrb[8].mxu1 }
 0x113   : > { %866 = vst.msk [vmem:[%s1400_s18 + $0xc] sm:$0xf] %vm862_vm1, %v1106_v18  ;;  %882 = vst.msk [vmem:[%s1400_s18 + $0x4c] sm:$0xf] %vm862_vm1, %v1122_v19  ;;  %v592_v22 = vadd.f32 %v1390_v43, %v591_v20  ;;  %v656_v23 = vadd.f32 %v1390_v43, %v655_v21  ;;  %v593_v24 = vpop.f32.mrb[9].mxu0  ;;  %v657_v25 = vpop.f32.mrb[9].mxu1 }
 0x114   : > { %v594_v26 = vpop.f32.mrb[10].mxu0  ;;  %v658_v27 = vpop.f32.mrb[10].mxu1 }
 0x115   : > { %v706_v28 = vmax.f32 %v592_v22, 0.0  ;;  %v722_v29 = vmax.f32 %v656_v23, 0.0  ;;  %v595_v30 = vadd.f32 %v1390_v43, %v594_v26  ;;  %v659_v31 = vadd.f32 %v1390_v43, %v658_v27  ;;  %v596_v32 = vpop.f32.mrb[11].mxu0  ;;  %v660_v33 = vpop.f32.mrb[11].mxu1 }
 0x117   : > { %v1107_v34 = vpack.c.bf16 %v706_v28, %v706_v28  ;;  %v1123_v35 = vpack.c.bf16 %v722_v29, %v722_v29  ;;  %v707_v36 = vmax.f32 %v595_v30, 0.0  ;;  %v723_v37 = vmax.f32 %v659_v31, 0.0 }
 0x119   : > { %867 = vst.msk [vmem:[%s1400_s18 + $0x10] sm:$0xf] %vm862_vm1, %v1107_v34  ;;  %883 = vst.msk [vmem:[%s1400_s18 + $0x50] sm:$0xf] %vm862_vm1, %v1123_v35  ;;  %v1108_v38 = vpack.c.bf16 %v707_v36, %v707_v36  ;;  %v1124_v39 = vpack.c.bf16 %v723_v37, %v723_v37 }
 0x11a   : > { %v599_v40 = vpop.f32.mrb[12].mxu0  ;;  %v663_v41 = vpop.f32.mrb[12].mxu1 }
 0x11b   : > { %868 = vst.msk [vmem:[%s1400_s18 + $0x14] sm:$0xf] %vm862_vm1, %v1108_v38  ;;  %884 = vst.msk [vmem:[%s1400_s18 + $0x54] sm:$0xf] %vm862_vm1, %v1124_v39  ;;  %v600_v42 = vadd.f32 %v1390_v43, %v599_v40  ;;  %v664_v44 = vadd.f32 %v1390_v43, %v663_v41  ;;  %v601_v45 = vpop.f32.mrb[13].mxu0  ;;  %v665_v46 = vpop.f32.mrb[13].mxu1 }
 0x11c   : > { %v602_v47 = vpop.f32.mrb[14].mxu0  ;;  %v666_v48 = vpop.f32.mrb[14].mxu1 }
 0x11d   : > { %v708_v49 = vmax.f32 %v600_v42, 0.0  ;;  %v724_v50 = vmax.f32 %v664_v44, 0.0  ;;  %v603_v51 = vadd.f32 %v1390_v43, %v602_v47  ;;  %v667_v52 = vadd.f32 %v1390_v43, %v666_v48  ;;  %v604_v53 = vpop.f32.mrb[15].mxu0  ;;  %v668_v54 = vpop.f32.mrb[15].mxu1 }
 0x11f   : > { %v1109_v55 = vpack.c.bf16 %v708_v49, %v708_v49  ;;  %v1125_v56 = vpack.c.bf16 %v724_v50, %v724_v50  ;;  %v709_v57 = vmax.f32 %v603_v51, 0.0  ;;  %v725_v58 = vmax.f32 %v667_v52, 0.0 }
 0x121   : > { %869 = vst.msk [vmem:[%s1400_s18 + $0x18] sm:$0xf] %vm862_vm1, %v1109_v55  ;;  %885 = vst.msk [vmem:[%s1400_s18 + $0x58] sm:$0xf] %vm862_vm1, %v1125_v56  ;;  %v1110_v59 = vpack.c.bf16 %v709_v57, %v709_v57  ;;  %v1126_v60 = vpack.c.bf16 %v725_v58, %v725_v58 }
 0x122   : > { %v607_v61 = vpop.f32.mrb[16].mxu0  ;;  %v671_v62 = vpop.f32.mrb[16].mxu1 }
 0x123   : > { %870 = vst.msk [vmem:[%s1400_s18 + $0x1c] sm:$0xf] %vm862_vm1, %v1110_v59  ;;  %886 = vst.msk [vmem:[%s1400_s18 + $0x5c] sm:$0xf] %vm862_vm1, %v1126_v60  ;;  %v608_v63 = vadd.f32 %v1390_v43, %v607_v61  ;;  %v672_v0 = vadd.f32 %v1390_v43, %v671_v62  ;;  %v609_v1 = vpop.f32.mrb[17].mxu0  ;;  %v673_v2 = vpop.f32.mrb[17].mxu1 }
 0x124   : > { %v610_v3 = vpop.f32.mrb[18].mxu0  ;;  %v674_v4 = vpop.f32.mrb[18].mxu1 }
 0x125   : > { %v710_v5 = vmax.f32 %v608_v63, 0.0  ;;  %v726_v6 = vmax.f32 %v672_v0, 0.0  ;;  %v611_v7 = vadd.f32 %v1390_v43, %v610_v3  ;;  %v675_v8 = vadd.f32 %v1390_v43, %v674_v4  ;;  %v612_v9 = vpop.f32.mrb[19].mxu0  ;;  %v676_v10 = vpop.f32.mrb[19].mxu1 }
 0x127   : > { %v1111_v11 = vpack.c.bf16 %v710_v5, %v710_v5  ;;  %v1127_v12 = vpack.c.bf16 %v726_v6, %v726_v6  ;;  %v711_v13 = vmax.f32 %v611_v7, 0.0  ;;  %v727_v14 = vmax.f32 %v675_v8, 0.0 }
 0x129   : > { %871 = vst.msk [vmem:[%s1400_s18 + $0x20] sm:$0xf] %vm862_vm1, %v1111_v11  ;;  %887 = vst.msk [vmem:[%s1400_s18 + $0x60] sm:$0xf] %vm862_vm1, %v1127_v12  ;;  %v1112_v15 = vpack.c.bf16 %v711_v13, %v711_v13  ;;  %v1128_v16 = vpack.c.bf16 %v727_v14, %v727_v14 }
 0x12a   : > { %v615_v17 = vpop.f32.mrb[20].mxu0  ;;  %v679_v18 = vpop.f32.mrb[20].mxu1 }
 0x12b   : > { %872 = vst.msk [vmem:[%s1400_s18 + $0x24] sm:$0xf] %vm862_vm1, %v1112_v15  ;;  %888 = vst.msk [vmem:[%s1400_s18 + $0x64] sm:$0xf] %vm862_vm1, %v1128_v16  ;;  %v616_v19 = vadd.f32 %v1390_v43, %v615_v17  ;;  %v680_v20 = vadd.f32 %v1390_v43, %v679_v18  ;;  %v617_v21 = vpop.f32.mrb[21].mxu0  ;;  %v681_v22 = vpop.f32.mrb[21].mxu1 }
 0x12c   : > { %v618_v23 = vpop.f32.mrb[22].mxu0  ;;  %v682_v24 = vpop.f32.mrb[22].mxu1 }
 0x12d   : > { %v712_v25 = vmax.f32 %v616_v19, 0.0  ;;  %v728_v26 = vmax.f32 %v680_v20, 0.0  ;;  %v619_v27 = vadd.f32 %v1390_v43, %v618_v23  ;;  %v683_v28 = vadd.f32 %v1390_v43, %v682_v24  ;;  %v620_v29 = vpop.f32.mrb[23].mxu0  ;;  %v684_v30 = vpop.f32.mrb[23].mxu1 }
 0x12f   : > { %v1113_v31 = vpack.c.bf16 %v712_v25, %v712_v25  ;;  %v1129_v32 = vpack.c.bf16 %v728_v26, %v728_v26  ;;  %v713_v33 = vmax.f32 %v619_v27, 0.0  ;;  %v729_v34 = vmax.f32 %v683_v28, 0.0 }
 0x131   : > { %873 = vst.msk [vmem:[%s1400_s18 + $0x28] sm:$0xf] %vm862_vm1, %v1113_v31  ;;  %889 = vst.msk [vmem:[%s1400_s18 + $0x68] sm:$0xf] %vm862_vm1, %v1129_v32  ;;  %v1114_v35 = vpack.c.bf16 %v713_v33, %v713_v33  ;;  %v1130_v36 = vpack.c.bf16 %v729_v34, %v729_v34 }
 0x132   : > { %v623_v37 = vpop.f32.mrb[24].mxu0  ;;  %v687_v38 = vpop.f32.mrb[24].mxu1 }
 0x133   : > { %874 = vst.msk [vmem:[%s1400_s18 + $0x2c] sm:$0xf] %vm862_vm1, %v1114_v35  ;;  %890 = vst.msk [vmem:[%s1400_s18 + $0x6c] sm:$0xf] %vm862_vm1, %v1130_v36  ;;  %v624_v39 = vadd.f32 %v1390_v43, %v623_v37  ;;  %v688_v40 = vadd.f32 %v1390_v43, %v687_v38  ;;  %v625_v41 = vpop.f32.mrb[25].mxu0  ;;  %v689_v42 = vpop.f32.mrb[25].mxu1 }
 0x134   : > { %v626_v44 = vpop.f32.mrb[26].mxu0  ;;  %v690_v45 = vpop.f32.mrb[26].mxu1 }
 0x135   : > { %v714_v46 = vmax.f32 %v624_v39, 0.0  ;;  %v730_v47 = vmax.f32 %v688_v40, 0.0  ;;  %v627_v48 = vadd.f32 %v1390_v43, %v626_v44  ;;  %v691_v49 = vadd.f32 %v1390_v43, %v690_v45  ;;  %v628_v50 = vpop.f32.mrb[27].mxu0  ;;  %v692_v51 = vpop.f32.mrb[27].mxu1 }
 0x137   : > { %v1115_v52 = vpack.c.bf16 %v714_v46, %v714_v46  ;;  %v1131_v53 = vpack.c.bf16 %v730_v47, %v730_v47  ;;  %v715_v54 = vmax.f32 %v627_v48, 0.0  ;;  %v731_v55 = vmax.f32 %v691_v49, 0.0 }
 0x139   : > { %875 = vst.msk [vmem:[%s1400_s18 + $0x30] sm:$0xf] %vm862_vm1, %v1115_v52  ;;  %891 = vst.msk [vmem:[%s1400_s18 + $0x70] sm:$0xf] %vm862_vm1, %v1131_v53  ;;  %v1116_v56 = vpack.c.bf16 %v715_v54, %v715_v54  ;;  %v1132_v57 = vpack.c.bf16 %v731_v55, %v731_v55 }
 0x13a   : > { %v631_v58 = vpop.f32.mrb[28].mxu0  ;;  %v695_v59 = vpop.f32.mrb[28].mxu1 }
 0x13b   : > { %876 = vst.msk [vmem:[%s1400_s18 + $0x34] sm:$0xf] %vm862_vm1, %v1116_v56  ;;  %892 = vst.msk [vmem:[%s1400_s18 + $0x74] sm:$0xf] %vm862_vm1, %v1132_v57  ;;  %v632_v60 = vadd.f32 %v1390_v43, %v631_v58  ;;  %v696_v61 = vadd.f32 %v1390_v43, %v695_v59  ;;  %v633_v62 = vpop.f32.mrb[29].mxu0  ;;  %v697_v63 = vpop.f32.mrb[29].mxu1 }
 0x13c   : > { %v634_v0 = vpop.f32.mrb[30].mxu0  ;;  %v698_v1 = vpop.f32.mrb[30].mxu1 }
 0x13d   : > { %v716_v2 = vmax.f32 %v632_v60, 0.0  ;;  %v732_v3 = vmax.f32 %v696_v61, 0.0  ;;  %v635_v4 = vadd.f32 %v1390_v43, %v634_v0  ;;  %v699_v5 = vadd.f32 %v1390_v43, %v698_v1  ;;  %v636_v6 = vpop.f32.mrb[31].mxu0  ;;  %v700_v7 = vpop.f32.mrb[31].mxu1 }
 0x13f   : > { %v1117_v8 = vpack.c.bf16 %v716_v2, %v716_v2  ;;  %v1133_v9 = vpack.c.bf16 %v732_v3, %v732_v3  ;;  %v717_v10 = vmax.f32 %v635_v4, 0.0  ;;  %v733_v11 = vmax.f32 %v699_v5, 0.0 }
 0x141   : > { %877 = vst.msk [vmem:[%s1400_s18 + $0x38] sm:$0xf] %vm862_vm1, %v1117_v8  ;;  %893 = vst.msk [vmem:[%s1400_s18 + $0x78] sm:$0xf] %vm862_vm1, %v1133_v9  ;;  %v1118_v12 = vpack.c.bf16 %v717_v10, %v717_v10  ;;  %v1134_v13 = vpack.c.bf16 %v733_v11, %v733_v11 }
 0x143   : > { %878 = vst.msk [vmem:[%s1400_s18 + $0x3c] sm:$0xf] %vm862_vm1, %v1118_v12  ;;  %894 = vst.msk [vmem:[%s1400_s18 + $0x7c] sm:$0xf] %vm862_vm1, %v1134_v13 }
 0x144 PF: > { %s13_s14 = sadd.s32 1, %s1260_s14   ;;  %s1507_s12 = smov %s1256_s13 }
 0x145   : > { %p10_p5 = scmp.ge.s32.totalorder %s13_s14, 6   ;;  %s1508_s13 = smov %s1510_s15 }
 0x147   :  { %12 = sbr.rel (!%p10_p5) target bundleno = 2 (0x2), region = 68 }

// kernel: model_forward.6
= control target key start
LH: loop header
LB: loop body
LE: loop exit
PB: predicated region body
PF: predicated region fallthrough
CT: control target
= control target key end

     0   :  { %s1843_s12 = smov 0   ;;  %s1845_s13 = smov 0   ;;  %s2133_s0 = inlined_call_operand.vmem [shape: bf16[1024,288], index: 0, kind: input, shape index: {}]   ;;  %s2134_s1 = inlined_call_operand.vmem [shape: bf16[288,64], index: 1, kind: input, shape index: {}]   ;;  %s2135_s2 = inlined_call_operand.vmem [shape: f32[1,64], index: 2, kind: input, shape index: {}]   ;;  %s2136_s3 = inlined_call_operand.vmem [shape: bf16[1024,64], index: 3, kind: output, shape index: {}]  }
   0x1   :  { %s1847_s14 = smov 0  }
   0x2 LB: > { %s25_s15 = sadd.s32 1, %s1817_s13  ;;  %p1356_p0 = scmp.ge.s32.totalorder %s1821_s14, 1  ;;  %s1821_s14 = sphi %s1847_s14, %s13_s14   ;;  %s1817_s13 = sphi %s1845_s13, %s2138_s13   ;;  %s1813_s12 = sphi %s1843_s12, %s2137_s12  }
   0x3   : > { %p27_p1 = scmp.ge.s32.totalorder %s25_s15, 4  ;;  %p170_p2 = scmp.lt.s32.totalorder %s1821_s14, 5 }
   0x5   : > { %s2140_s15 = smov (%p27_p1, %s25_s15), 0  ;;  %p171_p3 = pnand %p1356_p0, %p170_p2 }
   0x6   : > { %v1717_v0 = vld [vmem:[%s2134_s1 + $0x40] sm:$0xff] (!%p171_p3)   ;;  %s1357_s18 = sshll.u32 (!%p171_p3), %s1813_s12, 5  ;;  %v1719_v2 = vld [vmem:[%s2134_s1 + $0x48] sm:$0xff] (!%p171_p3)   ;;  %v1721_v4 = vld [vmem:[%s2134_s1 + $0x50] sm:$0xff] (!%p171_p3)   ;;  %vm684_vm0 = vcmask (!%p171_p3), 261120   ;;  %vm1215_vm1 = vcmask (!%p171_p3), 519168  }
   0x7   : > { %174 = sbr.rel (%p171_p3) target bundleno = 353 (0x161), region = 32  ;;  %v1718_v1 = vld [vmem:[%s2134_s1] sm:$0xff] (!%p171_p3)   ;;  %1510 = vmatprep.subr.bf16.mxu0 (!%p171_p3), %v1717_v0  ;;  %1676 = vmatprep.subr.bf16.mxu1 (!%p171_p3), %v1717_v0  ;;  %p206_p4 = scmp.lt.s32.totalorder (!%p171_p3), %s1357_s18, 127  ;;  %v1720_v3 = vld [vmem:[%s2134_s1 + $0x8] sm:$0xff] (!%p171_p3)   ;;  %v1722_v5 = vld [vmem:[%s2134_s1 + $0x10] sm:$0xff] (!%p171_p3)  }
   0x8   : > { %1511 = vmatpush3.bf16.msra.mxu0 (!%p171_p3), %v1718_v1  ;;  %1684 = vmatpush3.bf16.msra.mxu1 (!%p171_p3), %v1718_v1  ;;  %v1723_v6 = vld [vmem:[%s2134_s1 + $0x58] sm:$0xff] (!%p171_p3)   ;;  %v1725_v8 = vld [vmem:[%s2134_s1 + $0x60] sm:$0xff] (!%p171_p3)   ;;  %v1727_v10 = vld [vmem:[%s2134_s1 + $0x68] sm:$0xff] (!%p171_p3)  }
   0x9   : > { %1512 = vmatprep.subr.bf16.mxu0 (!%p171_p3), %v1719_v2  ;;  %1677 = vmatprep.subr.bf16.mxu1 (!%p171_p3), %v1719_v2  ;;  %v1724_v7 = vld [vmem:[%s2134_s1 + $0x18] sm:$0xff] (!%p171_p3)   ;;  %v1726_v9 = vld [vmem:[%s2134_s1 + $0x20] sm:$0xff] (!%p171_p3)   ;;  %v1728_v13 = vld [vmem:[%s2134_s1 + $0x28] sm:$0xff] (!%p171_p3)  }
   0xa   : > { %v1729_v14 = vld [vmem:[%s2134_s1 + $0x70] sm:$0xff] (!%p171_p3)   ;;  %v1731_v16 = vld [vmem:[%s2134_s1 + $0x78] sm:$0xff] (!%p171_p3)   ;;  %v1739_v18 = vld [vmem:[%s2134_s1 + $0x80] sm:$0xff] (!%p171_p3)  }
   0xb   : > { %v1730_v15 = vld [vmem:[%s2134_s1 + $0x30] sm:$0xff] (!%p171_p3)   ;;  %v1732_v17 = vld [vmem:[%s2134_s1 + $0x38] sm:$0xff] (!%p171_p3)   ;;  %v1752_v23 = vld [vmem:[%s2134_s1 + $0x88] sm:$0xff] (!%p171_p3)  }
   0xc   : > { %1513 = vmatpush3.bf16.msra.mxu0 (!%p171_p3), %v1720_v3  ;;  %1685 = vmatpush3.bf16.msra.mxu1 (!%p171_p3), %v1720_v3 }
   0xd   : > { %1514 = vmatprep.subr.bf16.mxu0 (!%p171_p3), %v1721_v4  ;;  %1678 = vmatprep.subr.bf16.mxu1 (!%p171_p3), %v1721_v4 }
   0xe   : > { %s2142_s18 = smov (!%p206_p4, %s1357_s18), 127 }
   0xf   : > { %s1692_s4 = smul.u32 12, %s2142_s18  ;;  %s1360_s9 = sshll.u32 %s2142_s18, 2 }
  0x10   : > { %1515 = vmatpush3.bf16.msra.mxu0 %v1722_v5  ;;  %1686 = vmatpush3.bf16.msra.mxu1 %v1722_v5  ;;  %s2016_s12 = scalar_lea.vmem %s2136_s3, %s1360_s9 }
  0x11   : > { %1516 = vmatprep.subr.bf16.mxu0 %v1723_v6  ;;  %1679 = vmatprep.subr.bf16.mxu1 %v1723_v6  ;;  %s1894_s11 = scalar_lea.vmem %s2133_s0, %s1692_s4 }
  0x12   : > { %v1735_v11 = vld [vmem:[%s1894_s11 + $0x4] ss:$12 sps:$4 sm:$0xff]   ;;  %v1733_v19 = vld [vmem:[%s1894_s11] ss:$12 sps:$4 sm:$0xff]   ;;  %v1740_v21 = vld [vmem:[%s1894_s11 + $0x1c] ss:$12 sps:$4 sm:$0xff]  }
  0x13   : > { %v1738_v12 = vld [vmem:[%s1894_s11 + $0x124] ss:$12 sps:$4 sm:$0xff]   ;;  %765 = vmatprep.mubr.bf16.mxu0 %v1735_v11  ;;  %v1736_v20 = vld [vmem:[%s1894_s11 + $0x120] ss:$12 sps:$4 sm:$0xff]   ;;  %v1742_v22 = vld [vmem:[%s1894_s11 + $0x13c] ss:$12 sps:$4 sm:$0xff]  }
  0x14   : > { %1517 = vmatpush3.bf16.msra.mxu0 %v1724_v7  ;;  %1687 = vmatpush3.bf16.msra.mxu1 %v1724_v7  ;;  %v1744_v24 = vld [vmem:[%s1894_s11 + $0x18] ss:$12 sps:$4 sm:$0xff]   ;;  %v1746_v26 = vld [vmem:[%s1894_s11 + $0x34] ss:$12 sps:$4 sm:$0xff]   ;;  %v1750_v28 = vld [vmem:[%s1894_s11 + $0x30] ss:$12 sps:$4 sm:$0xff]  }
  0x15   : > { %1518 = vmatprep.subr.bf16.mxu0 %v1725_v8  ;;  %1680 = vmatprep.subr.bf16.mxu1 %v1725_v8  ;;  %v1745_v25 = vld [vmem:[%s1894_s11 + $0x138] ss:$12 sps:$4 sm:$0xff]   ;;  %v1748_v27 = vld [vmem:[%s1894_s11 + $0x154] ss:$12 sps:$4 sm:$0xff]   ;;  %v1751_v29 = vld [vmem:[%s1894_s11 + $0x150] ss:$12 sps:$4 sm:$0xff]  }
  0x16   : > { %861 = vmatprep.mubr.bf16.mxu1 %v1738_v12  ;;  %v1753_v30 = vld [vmem:[%s1894_s11 + $0x4c] ss:$12 sps:$4 sm:$0xff]   ;;  %v1757_v32 = vld [vmem:[%s1894_s11 + $0x48] ss:$12 sps:$4 sm:$0xff]   ;;  %v1759_v34 = vld [vmem:[%s1894_s11 + $0x64] ss:$12 sps:$4 sm:$0xff]  }
  0x17   : > { %v1755_v31 = vld [vmem:[%s1894_s11 + $0x16c] ss:$12 sps:$4 sm:$0xff]   ;;  %v1758_v33 = vld [vmem:[%s1894_s11 + $0x168] ss:$12 sps:$4 sm:$0xff]   ;;  %v1768_v41 = vld [vmem:[%s1894_s11 + $0x50] ss:$12 sps:$4 sm:$0xff]  }
  0x18   : > { %1519 = vmatpush3.bf16.msra.mxu0 %v1726_v9  ;;  %1688 = vmatpush3.bf16.msra.mxu1 %v1726_v9  ;;  %v1761_v35 = vld [vmem:[%s1894_s11 + $0x8] ss:$12 sps:$4 sm:$0xff]   ;;  %v1762_v36 = vld [vmem:[%s1894_s11 + $0x60] ss:$12 sps:$4 sm:$0xff]   ;;  %v1766_v39 = vld [vmem:[%s1894_s11 + $0x38] ss:$12 sps:$4 sm:$0xff]  }
  0x19   : > { %1520 = vmatprep.subr.bf16.mxu0 %v1727_v10  ;;  %1681 = vmatprep.subr.bf16.mxu1 %v1727_v10  ;;  %v1763_v37 = vld [vmem:[%s1894_s11 + $0x20] ss:$12 sps:$4 sm:$0xff]   ;;  %v1764_v38 = vld [vmem:[%s1894_s11 + $0x7c] ss:$12 sps:$4 sm:$0xff]   ;;  %v1767_v40 = vld [vmem:[%s1894_s11 + $0x78] ss:$12 sps:$4 sm:$0xff]  }
  0x1a   : > { %v1769_v42 = vld [vmem:[%s1894_s11 + $0x94] ss:$12 sps:$4 sm:$0xff]   ;;  %v1772_v44 = vld [vmem:[%s1894_s11 + $0x90] ss:$12 sps:$4 sm:$0xff]   ;;  %v1774_v46 = vld [vmem:[%s1894_s11 + $0xac] ss:$12 sps:$4 sm:$0xff]  }
  0x1b   : > { %v1771_v43 = vld [vmem:[%s1894_s11 + $0x68] ss:$12 sps:$4 sm:$0xff]   ;;  %v1773_v45 = vld [vmem:[%s1894_s11 + $0x80] ss:$12 sps:$4 sm:$0xff]   ;;  %v1776_v47 = vld [vmem:[%s1894_s11 + $0x98] ss:$12 sps:$4 sm:$0xff]  }
  0x1c   : > { %1521 = vmatpush3.bf16.msra.mxu0 %v1728_v13  ;;  %1689 = vmatpush3.bf16.msra.mxu1 %v1728_v13  ;;  %v1777_v48 = vld [vmem:[%s1894_s11 + $0xa8] ss:$12 sps:$4 sm:$0xff]   ;;  %v1778_v49 = vld [vmem:[%s1894_s11 + $0xb0] ss:$12 sps:$4 sm:$0xff]   ;;  %v1782_v52 = vld [vmem:[%s1894_s11 + $0xc0] ss:$12 sps:$4 sm:$0xff]  }
  0x1d   : > { %1522 = vmatprep.subr.bf16.mxu0 %v1729_v14  ;;  %1682 = vmatprep.subr.bf16.mxu1 %v1729_v14  ;;  %v1779_v50 = vld [vmem:[%s1894_s11 + $0xc4] ss:$12 sps:$4 sm:$0xff]   ;;  %v1781_v51 = vld [vmem:[%s1894_s11 + $0xc8] ss:$12 sps:$4 sm:$0xff]   ;;  %v1783_v53 = vld [vmem:[%s1894_s11 + $0xe0] ss:$12 sps:$4 sm:$0xff]  }
  0x1e   : > { %v1784_v54 = vld [vmem:[%s1894_s11 + $0xdc] ss:$12 sps:$4 sm:$0xff]   ;;  %v1786_v55 = vld [vmem:[%s1894_s11 + $0xf8] ss:$12 sps:$4 sm:$0xff]   ;;  %v1789_v58 = vld [vmem:[%s1894_s11 + $0xf4] ss:$12 sps:$4 sm:$0xff]  }
  0x1f   : > { %v1787_v56 = vld [vmem:[%s1894_s11 + $0xd8] ss:$12 sps:$4 sm:$0xff]   ;;  %v1788_v57 = vld [vmem:[%s1894_s11 + $0x110] ss:$12 sps:$4 sm:$0xff]   ;;  %v1791_v59 = vld [vmem:[%s1894_s11 + $0x128] ss:$12 sps:$4 sm:$0xff]  }
  0x20   : > { %1523 = vmatpush3.bf16.msra.mxu0 %v1730_v15  ;;  %1690 = vmatpush3.bf16.msra.mxu1 %v1730_v15  ;;  %v1792_v60 = vld [vmem:[%s1894_s11 + $0xf0] ss:$12 sps:$4 sm:$0xff]   ;;  %v1793_v61 = vld [vmem:[%s1894_s11 + $0x140] ss:$12 sps:$4 sm:$0xff]   ;;  %v1796_v63 = vld [vmem:[%s1894_s11 + $0x158] ss:$12 sps:$4 sm:$0xff]  }
  0x21   : > { %1524 = vmatprep.subr.bf16.mxu0 %v1731_v16  ;;  %1683 = vmatprep.subr.bf16.mxu1 %v1731_v16  ;;  %v1794_v62 = vld [vmem:[%s1894_s11 + $0x10c] ss:$12 sps:$4 sm:$0xff]   ;;  %v1797_v0 = vld [vmem:[%s1894_s11 + $0x108] ss:$12 sps:$4 sm:$0xff]   ;;  %v1798_v1 = vld [vmem:[%s1894_s11 + $0x170] ss:$12 sps:$4 sm:$0xff]  }
  0x24   : > { %1525 = vmatpush3.bf16.msra.mxu0 %v1732_v17  ;;  %1691 = vmatpush3.bf16.msra.mxu1 %v1732_v17 }
  0x25   : > { %1640 = vmatprep.subr.bf16.mxu1 %v1739_v18 }
  0x27   : > { %766 = vmatmul.mubr.bf16.vlgmr.msra.gmra.mrb[0].mxu0 %v1733_v19  ;;  %862 = vmatmul.mubr.bf16.vlgmr.msra.gmra.mrb[0].mxu1 %v1736_v20 }
  0x28   : > { %1641 = vmatpush3.bf16.msra.mxu1 %v1739_v18  ;;  %773 = vmatprep.mubr.bf16.mxu0 %v1740_v21 }
  0x29   : > { %869 = vmatprep.mubr.bf16.mxu1 %v1742_v22  ;;  %1642 = vmatprep.subr.bf16.mxu1 %v1752_v23 }
  0x2c   : > { %1643 = vmatpush3.bf16.msra.mxu1 %v1752_v23 }
  0x2f   : > { %774 = vmatmul.mubr.bf16.gmra.mrb[4].mxu0 %v1744_v24  ;;  %870 = vmatmul.mubr.bf16.gmra.mrb[4].mxu1 %v1745_v25 }
  0x30   : > { %781 = vmatprep.mubr.bf16.mxu0 %v1746_v26  ;;  %877 = vmatprep.mubr.bf16.mxu1 %v1748_v27 }
  0x37   : > { %782 = vmatmul.mubr.bf16.gmra.mrb[8].mxu0 %v1750_v28  ;;  %878 = vmatmul.mubr.bf16.gmra.mrb[8].mxu1 %v1751_v29 }
  0x38   : > { %789 = vmatprep.mubr.bf16.mxu0 %v1753_v30  ;;  %885 = vmatprep.mubr.bf16.mxu1 %v1755_v31 }
  0x3f   : > { %790 = vmatmul.mubr.bf16.gmra.mrb[12].mxu0 %v1757_v32  ;;  %886 = vmatmul.mubr.bf16.gmra.mrb[12].mxu1 %v1758_v33 }
  0x40   : > { %797 = vmatprep.mubr.bf16.mxu0 %v1759_v34  ;;  %1644 = vmatprep.mubr.msk.bf16.mxu1 %vm684_vm0, %v1761_v35 }
  0x47   : > { %798 = vmatmul.mubr.bf16.gmra.mrb[16].mxu0 %v1762_v36  ;;  %1645 = vmatmul.mubr.msk.bf16.vlgmr.msra.gmra.mrb[16].mxu1 %vm684_vm0, %v1763_v37 }
  0x48   : > { %805 = vmatprep.mubr.bf16.mxu0 %v1764_v38  ;;  %1648 = vmatprep.mubr.msk.bf16.mxu1 %vm684_vm0, %v1766_v39 }
  0x4f   : > { %806 = vmatmul.mubr.bf16.gmra.mrb[20].mxu0 %v1767_v40  ;;  %1649 = vmatmul.mubr.msk.bf16.gmra.mrb[20].mxu1 %vm684_vm0, %v1768_v41 }
  0x50   : > { %813 = vmatprep.mubr.bf16.mxu0 %v1769_v42  ;;  %1652 = vmatprep.mubr.msk.bf16.mxu1 %vm684_vm0, %v1771_v43 }
  0x57   : > { %814 = vmatmul.mubr.bf16.gmra.mrb[24].mxu0 %v1772_v44  ;;  %1653 = vmatmul.mubr.msk.bf16.gmra.mrb[24].mxu1 %vm684_vm0, %v1773_v45 }
  0x58   : > { %821 = vmatprep.mubr.bf16.mxu0 %v1774_v46  ;;  %1656 = vmatprep.mubr.msk.bf16.mxu1 %vm684_vm0, %v1776_v47 }
  0x5f   : > { %822 = vmatmul.mubr.bf16.gmra.mrb[28].mxu0 %v1777_v48  ;;  %1657 = vmatmul.mubr.msk.bf16.gmra.mrb[28].mxu1 %vm684_vm0, %v1778_v49 }
  0x60   : > { %829 = vmatprep.mubr.bf16.mxu0 %v1779_v50  ;;  %1660 = vmatprep.mubr.msk.bf16.mxu1 %vm684_vm0, %v1781_v51  ;;  %v2006_v50 = vld [vmem:[%s2135_s2] ss:$0 sm:$0xff] }
  0x67   : > { %830 = vmatmul.mubr.bf16.gmra.mrb[32].mxu0 %v1782_v52  ;;  %1661 = vmatmul.mubr.msk.bf16.gmra.mrb[32].mxu1 %vm684_vm0, %v1783_v53 }
  0x68   : > { %837 = vmatprep.mubr.bf16.mxu0 %v1784_v54  ;;  %1664 = vmatprep.mubr.msk.bf16.mxu1 %vm684_vm0, %v1786_v55 }
  0x6f   : > { %838 = vmatmul.mubr.bf16.gmra.mrb[36].mxu0 %v1787_v56  ;;  %1665 = vmatmul.mubr.msk.bf16.gmra.mrb[36].mxu1 %vm684_vm0, %v1788_v57 }
  0x70   : > { %845 = vmatprep.mubr.bf16.mxu0 %v1789_v58  ;;  %1668 = vmatprep.mubr.msk.bf16.mxu1 %vm684_vm0, %v1791_v59 }
  0x77   : > { %846 = vmatmul.mubr.bf16.gmra.mrb[40].mxu0 %v1792_v60  ;;  %1669 = vmatmul.mubr.msk.bf16.gmra.mrb[40].mxu1 %vm684_vm0, %v1793_v61 }
  0x78   : > { %853 = vmatprep.mubr.bf16.mxu0 %v1794_v62  ;;  %1672 = vmatprep.mubr.msk.bf16.mxu1 %vm684_vm0, %v1796_v63 }
  0x7f   : > { %854 = vmatmul.mubr.bf16.gmra.mrb[44].mxu0 %v1797_v0  ;;  %1673 = vmatmul.mubr.msk.bf16.gmra.mrb[44].mxu1 %vm684_vm0, %v1798_v1 }
  0xfa   : > { %v1526_v2 = vpop.f32.mrb[0].mxu0  ;;  %v1598_v3 = vpop.f32.mrb[0].mxu1 }
  0xfb   : > { %v1527_v4 = vpop.f32.mrb[1].mxu0  ;;  %v1599_v5 = vpop.f32.mrb[1].mxu1 }
  0xfc   : > { %v1528_v6 = vadd.f32 %v1527_v4, %v1526_v2  ;;  %v1529_v7 = vpop.f32.mrb[2].mxu0  ;;  %v1987_v8 = vadd.f32 %v1599_v5, %v1598_v3  ;;  %v1601_v9 = vpop.f32.mrb[2].mxu1 }
  0xfd   : > { %v1530_v10 = vpop.f32.mrb[3].mxu0  ;;  %v1602_v11 = vpop.f32.mrb[3].mxu1 }
  0xfe   : > { %v1531_v12 = vadd.f32 %v1530_v10, %v1529_v7  ;;  %v1989_v13 = vadd.f32 %v1602_v11, %v1601_v9  ;;  %v768_v54 = vadd.f32 %v1528_v6, %v2006_v50 }
 0x100   : > { %v771_v63 = vadd.f32 %v1531_v12, %v2006_v50 }
 0x102   : > { %v1532_v14 = vpop.f32.mrb[4].mxu0  ;;  %v1604_v15 = vpop.f32.mrb[4].mxu1 }
 0x103   : > { %v1533_v16 = vpop.f32.mrb[5].mxu0  ;;  %v1605_v17 = vpop.f32.mrb[5].mxu1 }
 0x104   : > { %v1534_v18 = vadd.f32 %v1533_v16, %v1532_v14  ;;  %v1535_v19 = vpop.f32.mrb[6].mxu0  ;;  %v1991_v20 = vadd.f32 %v1605_v17, %v1604_v15  ;;  %v1607_v21 = vpop.f32.mrb[6].mxu1 }
 0x105   : > { %v1536_v22 = vpop.f32.mrb[7].mxu0  ;;  %v1608_v23 = vpop.f32.mrb[7].mxu1 }
 0x106   : > { %v1537_v24 = vadd.f32 %v1536_v22, %v1535_v19  ;;  %v1993_v25 = vadd.f32 %v1608_v23, %v1607_v21  ;;  %v776_v51 = vadd.f32 %v1534_v18, %v2006_v50 }
 0x108   : > { %v779_v58 = vadd.f32 %v1537_v24, %v2006_v50 }
 0x10a   : > { %v1538_v26 = vpop.f32.mrb[8].mxu0  ;;  %v1610_v27 = vpop.f32.mrb[8].mxu1 }
 0x10b   : > { %v1539_v28 = vpop.f32.mrb[9].mxu0  ;;  %v1611_v29 = vpop.f32.mrb[9].mxu1 }
 0x10c   : > { %v1540_v30 = vadd.f32 %v1539_v28, %v1538_v26  ;;  %v1541_v31 = vpop.f32.mrb[10].mxu0  ;;  %v1995_v32 = vadd.f32 %v1611_v29, %v1610_v27  ;;  %v1613_v33 = vpop.f32.mrb[10].mxu1 }
 0x10d   : > { %v1542_v34 = vpop.f32.mrb[11].mxu0  ;;  %v1614_v35 = vpop.f32.mrb[11].mxu1 }
 0x10e   : > { %v1543_v36 = vadd.f32 %v1542_v34, %v1541_v31  ;;  %v1997_v37 = vadd.f32 %v1614_v35, %v1613_v33  ;;  %v784_v18 = vadd.f32 %v1540_v30, %v2006_v50 }
 0x110   : > { %v787_v29 = vadd.f32 %v1543_v36, %v2006_v50 }
 0x112   : > { %v1544_v38 = vpop.f32.mrb[12].mxu0  ;;  %v1616_v39 = vpop.f32.mrb[12].mxu1 }
 0x113   : > { %v1545_v40 = vpop.f32.mrb[13].mxu0  ;;  %v1617_v41 = vpop.f32.mrb[13].mxu1 }
 0x114   : > { %v1546_v42 = vadd.f32 %v1545_v40, %v1544_v38  ;;  %v1547_v43 = vpop.f32.mrb[14].mxu0  ;;  %v1999_v44 = vadd.f32 %v1617_v41, %v1616_v39  ;;  %v1619_v45 = vpop.f32.mrb[14].mxu1 }
 0x115   : > { %v1548_v46 = vpop.f32.mrb[15].mxu0  ;;  %v1620_v47 = vpop.f32.mrb[15].mxu1 }
 0x116   : > { %v1549_v48 = vadd.f32 %v1548_v46, %v1547_v43  ;;  %v2001_v49 = vadd.f32 %v1620_v47, %v1619_v45  ;;  %v792_v14 = vadd.f32 %v1546_v42, %v2006_v50 }
 0x118   : > { %v795_v23 = vadd.f32 %v1549_v48, %v2006_v50 }
 0x11a   : > { %v1550_v52 = vpop.f32.mrb[16].mxu0  ;;  %v1646_v53 = vpop.f32.mrb[16].mxu1 }
 0x11b   : > { %v937_v55 = vadd.f32 %v1646_v53, %v776_v51  ;;  %v1551_v56 = vpop.f32.mrb[17].mxu0  ;;  %v928_v57 = vpop.f32.mrb[17].mxu1 }
 0x11c   : > { %v1552_v59 = vadd.f32 %v1551_v56, %v1550_v52  ;;  %v929_v60 = vadd.f32 %v928_v57, %v768_v54  ;;  %v1553_v61 = vpop.f32.mrb[18].mxu0  ;;  %v1647_v62 = vpop.f32.mrb[18].mxu1 }
 0x11d   : > { %v1057_v0 = vmax.f32 %v937_v55, 0.0  ;;  %v940_v1 = vadd.f32 %v1647_v62, %v779_v58  ;;  %v1554_v2 = vpop.f32.mrb[19].mxu0  ;;  %v931_v3 = vpop.f32.mrb[19].mxu1 }
 0x11e   : > { %v1055_v4 = vmax.f32 %v929_v60, 0.0  ;;  %v1555_v5 = vadd.f32 %v1554_v2, %v1553_v61  ;;  %v932_v6 = vadd.f32 %v931_v3, %v771_v63  ;;  %v800_v51 = vadd.f32 %v1552_v59, %v2006_v50 }
 0x11f   : > { %v1480_v7 = vpack.c.bf16 %v1057_v0, %v1057_v0  ;;  %v1058_v9 = vmax.f32 %v940_v1, 0.0 }
 0x120   : > { %v1478_v10 = vpack.c.bf16 %v1055_v4, %v1055_v4  ;;  %v1056_v11 = vmax.f32 %v932_v6, 0.0  ;;  %v803_v61 = vadd.f32 %v1555_v5, %v2006_v50 }
 0x121   : > { %1218 = vst.msk [vmem:[%s2016_s12 + $0x8] sm:$0xf] %vm1215_vm1, %v1480_v7  ;;  %v1481_v12 = vpack.c.bf16 %v1058_v9, %v1058_v9 }
 0x122   : > { %1216 = vst.msk [vmem:[%s2016_s12] sm:$0xf] %vm1215_vm1, %v1478_v10  ;;  %v1479_v15 = vpack.c.bf16 %v1056_v11, %v1056_v11  ;;  %v1556_v16 = vpop.f32.mrb[20].mxu0  ;;  %v1650_v17 = vpop.f32.mrb[20].mxu1 }
 0x123   : > { %1219 = vst.msk [vmem:[%s2016_s12 + $0xc] sm:$0xf] %vm1215_vm1, %v1481_v12  ;;  %v953_v19 = vadd.f32 %v1650_v17, %v792_v14  ;;  %v1557_v21 = vpop.f32.mrb[21].mxu0  ;;  %v944_v22 = vpop.f32.mrb[21].mxu1 }
 0x124   : > { %1217 = vst.msk [vmem:[%s2016_s12 + $0x4] sm:$0xf] %vm1215_vm1, %v1479_v15  ;;  %v1558_v24 = vadd.f32 %v1557_v21, %v1556_v16  ;;  %v945_v26 = vadd.f32 %v944_v22, %v784_v18  ;;  %v1559_v27 = vpop.f32.mrb[22].mxu0  ;;  %v1651_v28 = vpop.f32.mrb[22].mxu1 }
 0x125   : > { %v1061_v31 = vmax.f32 %v953_v19, 0.0  ;;  %v956_v33 = vadd.f32 %v1651_v28, %v795_v23  ;;  %v1560_v30 = vpop.f32.mrb[23].mxu0  ;;  %v947_v34 = vpop.f32.mrb[23].mxu1 }
 0x126   : > { %v1059_v35 = vmax.f32 %v945_v26, 0.0  ;;  %v1561_v38 = vadd.f32 %v1560_v30, %v1559_v27  ;;  %v948_v39 = vadd.f32 %v947_v34, %v787_v29  ;;  %v808_v46 = vadd.f32 %v1558_v24, %v2006_v50 }
 0x127   : > { %v1484_v40 = vpack.c.bf16 %v1061_v31, %v1061_v31  ;;  %v1062_v41 = vmax.f32 %v956_v33, 0.0 }
 0x128   : > { %v1482_v42 = vpack.c.bf16 %v1059_v35, %v1059_v35  ;;  %v1060_v43 = vmax.f32 %v948_v39, 0.0  ;;  %v811_v55 = vadd.f32 %v1561_v38, %v2006_v50 }
 0x129   : > { %1222 = vst.msk [vmem:[%s2016_s12 + $0x18] sm:$0xf] %vm1215_vm1, %v1484_v40  ;;  %v1485_v45 = vpack.c.bf16 %v1062_v41, %v1062_v41 }
 0x12a   : > { %1220 = vst.msk [vmem:[%s2016_s12 + $0x10] sm:$0xf] %vm1215_vm1, %v1482_v42  ;;  %v1483_v36 = vpack.c.bf16 %v1060_v43, %v1060_v43  ;;  %v1562_v47 = vpop.f32.mrb[24].mxu0  ;;  %v1654_v48 = vpop.f32.mrb[24].mxu1 }
 0x12b   : > { %1223 = vst.msk [vmem:[%s2016_s12 + $0x1c] sm:$0xf] %vm1215_vm1, %v1485_v45  ;;  %v969_v52 = vadd.f32 %v1654_v48, %v808_v46  ;;  %v1563_v53 = vpop.f32.mrb[25].mxu0  ;;  %v960_v54 = vpop.f32.mrb[25].mxu1 }
 0x12c   : > { %1221 = vst.msk [vmem:[%s2016_s12 + $0x14] sm:$0xf] %vm1215_vm1, %v1483_v36  ;;  %v1564_v56 = vadd.f32 %v1563_v53, %v1562_v47  ;;  %v961_v57 = vadd.f32 %v960_v54, %v800_v51  ;;  %v1565_v58 = vpop.f32.mrb[26].mxu0  ;;  %v1655_v60 = vpop.f32.mrb[26].mxu1 }
 0x12d   : > { %v1065_v62 = vmax.f32 %v969_v52, 0.0  ;;  %v972_v63 = vadd.f32 %v1655_v60, %v811_v55  ;;  %v1566_v59 = vpop.f32.mrb[27].mxu0  ;;  %v963_v0 = vpop.f32.mrb[27].mxu1 }
 0x12e   : > { %v1063_v1 = vmax.f32 %v961_v57, 0.0  ;;  %v1567_v2 = vadd.f32 %v1566_v59, %v1565_v58  ;;  %v964_v3 = vadd.f32 %v963_v0, %v803_v61  ;;  %v816_v14 = vadd.f32 %v1564_v56, %v2006_v50 }
 0x12f   : > { %v1488_v4 = vpack.c.bf16 %v1065_v62, %v1065_v62  ;;  %v1066_v6 = vmax.f32 %v972_v63, 0.0 }
 0x130   : > { %v1486_v7 = vpack.c.bf16 %v1063_v1, %v1063_v1  ;;  %v1064_v9 = vmax.f32 %v964_v3, 0.0  ;;  %v819_v22 = vadd.f32 %v1567_v2, %v2006_v50 }
 0x131   : > { %1226 = vst.msk [vmem:[%s2016_s12 + $0x28] sm:$0xf] %vm1215_vm1, %v1488_v4  ;;  %v1489_v10 = vpack.c.bf16 %v1066_v6, %v1066_v6 }
 0x132   : > { %1224 = vst.msk [vmem:[%s2016_s12 + $0x20] sm:$0xf] %vm1215_vm1, %v1486_v7  ;;  %v1487_v11 = vpack.c.bf16 %v1064_v9, %v1064_v9  ;;  %v1568_v5 = vpop.f32.mrb[28].mxu0  ;;  %v1658_v12 = vpop.f32.mrb[28].mxu1 }
 0x133   : > { %1227 = vst.msk [vmem:[%s2016_s12 + $0x2c] sm:$0xf] %vm1215_vm1, %v1489_v10  ;;  %v1569_v15 = vpop.f32.mrb[29].mxu0  ;;  %v976_v16 = vpop.f32.mrb[29].mxu1 }
 0x134   : > { %1225 = vst.msk [vmem:[%s2016_s12 + $0x24] sm:$0xf] %vm1215_vm1, %v1487_v11  ;;  %v1570_v17 = vadd.f32 %v1569_v15, %v1568_v5  ;;  %v977_v18 = vadd.f32 %v976_v16, %v816_v14  ;;  %v1571_v19 = vpop.f32.mrb[30].mxu0  ;;  %v1659_v21 = vpop.f32.mrb[30].mxu1  ;;  %v872_v14 = vadd.f32 %v1991_v20, %v2006_v50 }
 0x135   : > { %v1572_v23 = vpop.f32.mrb[31].mxu0  ;;  %v979_v24 = vpop.f32.mrb[31].mxu1 }
 0x136   : > { %v824_v26 = vadd.f32 %v1570_v17, %v2006_v50  ;;  %v1067_v27 = vmax.f32 %v977_v18, 0.0  ;;  %v1573_v28 = vadd.f32 %v1572_v23, %v1571_v19  ;;  %v980_v29 = vadd.f32 %v979_v24, %v819_v22 }
 0x137   : > { %v864_v19 = vadd.f32 %v1987_v8, %v2006_v50  ;;  %v875_v24 = vadd.f32 %v1993_v25, %v2006_v50  ;;  %v867_v8 = vadd.f32 %v1989_v13, %v2006_v50 }
 0x138   : > { %v985_v31 = vadd.f32 %v1658_v12, %v824_v26  ;;  %v1490_v33 = vpack.c.bf16 %v1067_v27, %v1067_v27  ;;  %v827_v30 = vadd.f32 %v1573_v28, %v2006_v50  ;;  %v1068_v34 = vmax.f32 %v980_v29, 0.0 }
 0x13a   : > { %v1069_v35 = vmax.f32 %v985_v31, 0.0  ;;  %1228 = vst.msk [vmem:[%s2016_s12 + $0x30] sm:$0xf] %vm1215_vm1, %v1490_v33  ;;  %v988_v38 = vadd.f32 %v1659_v21, %v827_v30  ;;  %v1491_v39 = vpack.c.bf16 %v1068_v34, %v1068_v34  ;;  %v1574_v40 = vpop.f32.mrb[32].mxu0  ;;  %v1662_v41 = vpop.f32.mrb[32].mxu1 }
 0x13b   : > { %v1575_v42 = vpop.f32.mrb[33].mxu0  ;;  %v992_v43 = vpop.f32.mrb[33].mxu1 }
 0x13c   : > { %v1492_v45 = vpack.c.bf16 %v1069_v35, %v1069_v35  ;;  %v1070_v46 = vmax.f32 %v988_v38, 0.0  ;;  %1229 = vst.msk [vmem:[%s2016_s12 + $0x34] sm:$0xf] %vm1215_vm1, %v1491_v39  ;;  %v1576_v36 = vadd.f32 %v1575_v42, %v1574_v40  ;;  %v1577_v47 = vpop.f32.mrb[34].mxu0  ;;  %v1663_v48 = vpop.f32.mrb[34].mxu1 }
 0x13d   : > { %v1578_v51 = vpop.f32.mrb[35].mxu0  ;;  %v995_v52 = vpop.f32.mrb[35].mxu1 }
 0x13e   : > { %1230 = vst.msk [vmem:[%s2016_s12 + $0x38] sm:$0xf] %vm1215_vm1, %v1492_v45  ;;  %v1493_v53 = vpack.c.bf16 %v1070_v46, %v1070_v46  ;;  %v832_v54 = vadd.f32 %v1576_v36, %v2006_v50  ;;  %v1579_v55 = vadd.f32 %v1578_v51, %v1577_v47 }
 0x140   : > { %1231 = vst.msk [vmem:[%s2016_s12 + $0x3c] sm:$0xf] %vm1215_vm1, %v1493_v53  ;;  %v993_v56 = vadd.f32 %v992_v43, %v832_v54  ;;  %v835_v57 = vadd.f32 %v1579_v55, %v2006_v50  ;;  %v880_v55 = vadd.f32 %v1995_v32, %v2006_v50 }
 0x142   : > { %v1071_v58 = vmax.f32 %v993_v56, 0.0  ;;  %v996_v60 = vadd.f32 %v995_v52, %v835_v57  ;;  %v1580_v61 = vpop.f32.mrb[36].mxu0  ;;  %v2064_v62 = vpop.f32.mrb[36].mxu1 }
 0x143   : > { %v1581_v63 = vpop.f32.mrb[37].mxu0  ;;  %v1008_v59 = vpop.f32.mrb[37].mxu1 }
 0x144   : > { %v1494_v0 = vpack.c.bf16 %v1071_v58, %v1071_v58  ;;  %v1072_v1 = vmax.f32 %v996_v60, 0.0  ;;  %v1582_v2 = vadd.f32 %v1581_v63, %v1580_v61  ;;  %v1583_v3 = vpop.f32.mrb[38].mxu0  ;;  %v2066_v4 = vpop.f32.mrb[38].mxu1 }
 0x145   : > { %v1584_v6 = vpop.f32.mrb[39].mxu0  ;;  %v1011_v7 = vpop.f32.mrb[39].mxu1 }
 0x146   : > { %1232 = vst.msk [vmem:[%s2016_s12 + $0x40] sm:$0xf] %vm1215_vm1, %v1494_v0  ;;  %v1495_v9 = vpack.c.bf16 %v1072_v1, %v1072_v1  ;;  %v840_v10 = vadd.f32 %v1582_v2, %v2006_v50  ;;  %v1585_v11 = vadd.f32 %v1584_v6, %v1583_v3 }
 0x148   : > { %1233 = vst.msk [vmem:[%s2016_s12 + $0x44] sm:$0xf] %vm1215_vm1, %v1495_v9  ;;  %v1001_v5 = vadd.f32 %v1662_v41, %v840_v10  ;;  %v843_v12 = vadd.f32 %v1585_v11, %v2006_v50 }
 0x14a   : > { %v1073_v15 = vmax.f32 %v1001_v5, 0.0  ;;  %v1004_v16 = vadd.f32 %v1663_v48, %v843_v12  ;;  %v1586_v17 = vpop.f32.mrb[40].mxu0  ;;  %v1670_v18 = vpop.f32.mrb[40].mxu1  ;;  %v888_v48 = vadd.f32 %v1999_v44, %v2006_v50  ;;  %v891_v44 = vadd.f32 %v2001_v49, %v2006_v50 }
 0x14b   : > { %v1033_v21 = vadd.f32 %v1670_v18, %v872_v14  ;;  %v1587_v22 = vpop.f32.mrb[41].mxu0  ;;  %v1024_v23 = vpop.f32.mrb[41].mxu1 }
 0x14c   : > { %v1496_v26 = vpack.c.bf16 %v1073_v15, %v1073_v15  ;;  %v1074_v27 = vmax.f32 %v1004_v16, 0.0  ;;  %v1588_v28 = vadd.f32 %v1587_v22, %v1586_v17  ;;  %v1025_v29 = vadd.f32 %v1024_v23, %v864_v19  ;;  %v1589_v20 = vpop.f32.mrb[42].mxu0  ;;  %v1671_v31 = vpop.f32.mrb[42].mxu1 }
 0x14d   : > { %v1081_v33 = vmax.f32 %v1033_v21, 0.0  ;;  %v1036_v30 = vadd.f32 %v1671_v31, %v875_v24  ;;  %v1590_v34 = vpop.f32.mrb[43].mxu0  ;;  %v1027_v35 = vpop.f32.mrb[43].mxu1 }
 0x14e   : > { %1234 = vst.msk [vmem:[%s2016_s12 + $0x48] sm:$0xf] %vm1215_vm1, %v1496_v26  ;;  %v1497_v38 = vpack.c.bf16 %v1074_v27, %v1074_v27  ;;  %v848_v25 = vadd.f32 %v1588_v28, %v2006_v50  ;;  %v1079_v39 = vmax.f32 %v1025_v29, 0.0  ;;  %v1591_v40 = vadd.f32 %v1590_v34, %v1589_v20 }
 0x14f   : > { %v1504_v41 = vpack.c.bf16 %v1081_v33, %v1081_v33  ;;  %v1082_v42 = vmax.f32 %v1036_v30, 0.0  ;;  %v1028_v43 = vadd.f32 %v1027_v35, %v867_v8 }
 0x150   : > { %1235 = vst.msk [vmem:[%s2016_s12 + $0x4c] sm:$0xf] %vm1215_vm1, %v1497_v38  ;;  %v1009_v45 = vadd.f32 %v1008_v59, %v848_v25  ;;  %v1502_v46 = vpack.c.bf16 %v1079_v39, %v1079_v39  ;;  %v851_v36 = vadd.f32 %v1591_v40, %v2006_v50 }
 0x151   : > { %1242 = vst.msk [vmem:[%s2016_s12 + $0x68] sm:$0xf] %vm1215_vm1, %v1504_v41  ;;  %v1505_v13 = vpack.c.bf16 %v1082_v42, %v1082_v42  ;;  %v1080_v47 = vmax.f32 %v1028_v43, 0.0 }
 0x152   : > { %v1075_v51 = vmax.f32 %v1009_v45, 0.0  ;;  %1240 = vst.msk [vmem:[%s2016_s12 + $0x60] sm:$0xf] %vm1215_vm1, %v1502_v46  ;;  %v1012_v52 = vadd.f32 %v1011_v7, %v851_v36  ;;  %v1592_v53 = vpop.f32.mrb[44].mxu0  ;;  %v1674_v54 = vpop.f32.mrb[44].mxu1  ;;  %v883_v7 = vadd.f32 %v1997_v37, %v2006_v50 }
 0x153   : > { %1243 = vst.msk [vmem:[%s2016_s12 + $0x6c] sm:$0xf] %vm1215_vm1, %v1505_v13  ;;  %v1503_v56 = vpack.c.bf16 %v1080_v47, %v1080_v47  ;;  %v1049_v57 = vadd.f32 %v1674_v54, %v888_v48  ;;  %v1593_v58 = vpop.f32.mrb[45].mxu0  ;;  %v1040_v60 = vpop.f32.mrb[45].mxu1 }
 0x154   : > { %v1498_v61 = vpack.c.bf16 %v1075_v51, %v1075_v51  ;;  %v1076_v63 = vmax.f32 %v1012_v52, 0.0  ;;  %v1594_v59 = vadd.f32 %v1593_v58, %v1592_v53  ;;  %v1041_v0 = vadd.f32 %v1040_v60, %v880_v55  ;;  %v1595_v1 = vpop.f32.mrb[46].mxu0  ;;  %v1675_v2 = vpop.f32.mrb[46].mxu1 }
 0x155   : > { %1241 = vst.msk [vmem:[%s2016_s12 + $0x64] sm:$0xf] %vm1215_vm1, %v1503_v56  ;;  %v1085_v32 = vmax.f32 %v1049_v57, 0.0  ;;  %v1052_v3 = vadd.f32 %v1675_v2, %v891_v44  ;;  %v1596_v6 = vpop.f32.mrb[47].mxu0  ;;  %v1043_v9 = vpop.f32.mrb[47].mxu1 }
 0x156   : > { %1236 = vst.msk [vmem:[%s2016_s12 + $0x50] sm:$0xf] %vm1215_vm1, %v1498_v61  ;;  %v1499_v49 = vpack.c.bf16 %v1076_v63, %v1076_v63  ;;  %v856_v10 = vadd.f32 %v1594_v59, %v2006_v50  ;;  %v1083_v11 = vmax.f32 %v1041_v0, 0.0  ;;  %v1597_v5 = vadd.f32 %v1596_v6, %v1595_v1 }
 0x157   : > { %v1508_v12 = vpack.c.bf16 %v1085_v32, %v1085_v32  ;;  %v1086_v14 = vmax.f32 %v1052_v3, 0.0  ;;  %v1044_v15 = vadd.f32 %v1043_v9, %v883_v7 }
 0x158   : > { %1237 = vst.msk [vmem:[%s2016_s12 + $0x54] sm:$0xf] %vm1215_vm1, %v1499_v49  ;;  %v1017_v16 = vadd.f32 %v2064_v62, %v856_v10  ;;  %v1506_v37 = vpack.c.bf16 %v1083_v11, %v1083_v11  ;;  %v859_v17 = vadd.f32 %v1597_v5, %v2006_v50 }
 0x159   : > { %1246 = vst.msk [vmem:[%s2016_s12 + $0x78] sm:$0xf] %vm1215_vm1, %v1508_v12  ;;  %v1509_v18 = vpack.c.bf16 %v1086_v14, %v1086_v14  ;;  %v1084_v19 = vmax.f32 %v1044_v15, 0.0 }
 0x15a   : > { %v1077_v21 = vmax.f32 %v1017_v16, 0.0  ;;  %1244 = vst.msk [vmem:[%s2016_s12 + $0x70] sm:$0xf] %vm1215_vm1, %v1506_v37  ;;  %v1020_v22 = vadd.f32 %v2066_v4, %v859_v17 }
 0x15b   : > { %1247 = vst.msk [vmem:[%s2016_s12 + $0x7c] sm:$0xf] %vm1215_vm1, %v1509_v18  ;;  %v1507_v23 = vpack.c.bf16 %v1084_v19, %v1084_v19 }
 0x15c   : > { %v1500_v24 = vpack.c.bf16 %v1077_v21, %v1077_v21  ;;  %v1078_v26 = vmax.f32 %v1020_v22, 0.0 }
 0x15d   : > { %1245 = vst.msk [vmem:[%s2016_s12 + $0x74] sm:$0xf] %vm1215_vm1, %v1507_v23 }
 0x15e   : > { %1238 = vst.msk [vmem:[%s2016_s12 + $0x58] sm:$0xf] %vm1215_vm1, %v1500_v24  ;;  %v1501_v62 = vpack.c.bf16 %v1078_v26, %v1078_v26 }
 0x160   : > { %1239 = vst.msk [vmem:[%s2016_s12 + $0x5c] sm:$0xf] %vm1215_vm1, %v1501_v62 }
 0x161 PF: > { %s13_s14 = sadd.s32 1, %s1821_s14   ;;  %s2137_s12 = smov %s1817_s13 }
 0x162   : > { %p10_p5 = scmp.ge.s32.totalorder %s13_s14, 6   ;;  %s2138_s13 = smov %s2140_s15 }
 0x164   :  { %12 = sbr.rel (!%p10_p5) target bundleno = 2 (0x2), region = 68 }

// kernel: model_forward.7
= control target key start
LH: loop header
LB: loop body
LE: loop exit
PB: predicated region body
PF: predicated region fallthrough
CT: control target
= control target key end

     0   :  { %s2668_s12 = smov 0   ;;  %s2670_s13 = smov 0   ;;  %s3077_s0 = inlined_call_operand.vmem [shape: bf16[768,576], index: 0, kind: input, shape index: {}]   ;;  %s3078_s1 = inlined_call_operand.vmem [shape: bf16[576,128], index: 1, kind: input, shape index: {}]   ;;  %s3079_s2 = inlined_call_operand.vmem [shape: f32[1,128], index: 2, kind: input, shape index: {}]   ;;  %s3080_s3 = inlined_call_operand.vmem [shape: bf16[768,128], index: 3, kind: output, shape index: {}]  }
   0x1   :  { %s2672_s14 = smov 0  }
   0x2 LB: > { %s25_s15 = sadd.s32 1, %s2642_s13  ;;  %p1852_p0 = scmp.ge.s32.totalorder %s2646_s14, 1  ;;  %s2646_s14 = sphi %s2672_s14, %s13_s14   ;;  %s2642_s13 = sphi %s2670_s13, %s3082_s13   ;;  %s2638_s12 = sphi %s2668_s12, %s3081_s12  }
   0x3   : > { %p27_p1 = scmp.ge.s32.totalorder %s25_s15, 3  ;;  %p170_p2 = scmp.lt.s32.totalorder %s2646_s14, 4 }
   0x5   : > { %s3084_s15 = smov (%p27_p1, %s25_s15), 0  ;;  %p171_p3 = pnand %p1852_p0, %p170_p2 }
   0x6   : > { %v2476_v0 = vld [vmem:[%s3078_s1 + $0x40] sm:$0xff] (!%p171_p3)   ;;  %s1853_s18 = sshll.u32 (!%p171_p3), %s2638_s12, 5  ;;  %v2478_v2 = vld [vmem:[%s3078_s1 + $0x48] sm:$0xff] (!%p171_p3)   ;;  %v2480_v4 = vld [vmem:[%s3078_s1 + $0x50] sm:$0xff] (!%p171_p3)   ;;  %vm1020_vm0 = vcmask (!%p171_p3), 523264  }
   0x7   : > { %174 = sbr.rel (%p171_p3) target bundleno = 417 (0x1a1), region = 32  ;;  %v2477_v1 = vld [vmem:[%s3078_s1] sm:$0xff] (!%p171_p3)   ;;  %2151 = vmatprep.subr.bf16.mxu0 (!%p171_p3), %v2476_v0  ;;  %2435 = vmatprep.subr.bf16.mxu1 (!%p171_p3), %v2476_v0  ;;  %p206_p4 = scmp.lt.s32.totalorder (!%p171_p3), %s1853_s18, 95  ;;  %v2479_v3 = vld [vmem:[%s3078_s1 + $0x8] sm:$0xff] (!%p171_p3)   ;;  %v2481_v5 = vld [vmem:[%s3078_s1 + $0x10] sm:$0xff] (!%p171_p3)  }
   0x8   : > { %2152 = vmatpush3.bf16.msra.mxu0 (!%p171_p3), %v2477_v1  ;;  %2443 = vmatpush3.bf16.msra.mxu1 (!%p171_p3), %v2477_v1  ;;  %v2482_v6 = vld [vmem:[%s3078_s1 + $0x58] sm:$0xff] (!%p171_p3)   ;;  %v2484_v8 = vld [vmem:[%s3078_s1 + $0x60] sm:$0xff] (!%p171_p3)   ;;  %v2486_v10 = vld [vmem:[%s3078_s1 + $0x68] sm:$0xff] (!%p171_p3)  }
   0x9   : > { %2153 = vmatprep.subr.bf16.mxu0 (!%p171_p3), %v2478_v2  ;;  %2436 = vmatprep.subr.bf16.mxu1 (!%p171_p3), %v2478_v2  ;;  %v2483_v7 = vld [vmem:[%s3078_s1 + $0x18] sm:$0xff] (!%p171_p3)   ;;  %v2485_v9 = vld [vmem:[%s3078_s1 + $0x20] sm:$0xff] (!%p171_p3)   ;;  %v2487_v13 = vld [vmem:[%s3078_s1 + $0x28] sm:$0xff] (!%p171_p3)  }
   0xa   : > { %v2488_v14 = vld [vmem:[%s3078_s1 + $0x70] sm:$0xff] (!%p171_p3)   ;;  %v2490_v16 = vld [vmem:[%s3078_s1 + $0x78] sm:$0xff] (!%p171_p3)   ;;  %v2498_v18 = vld [vmem:[%s3078_s1 + $0xc0] sm:$0xff] (!%p171_p3)  }
   0xb   : > { %v2489_v15 = vld [vmem:[%s3078_s1 + $0x30] sm:$0xff] (!%p171_p3)   ;;  %v2491_v17 = vld [vmem:[%s3078_s1 + $0x38] sm:$0xff] (!%p171_p3)   ;;  %v2501_v19 = vld [vmem:[%s3078_s1 + $0x100] sm:$0xff] (!%p171_p3)  }
   0xc   : > { %2154 = vmatpush3.bf16.msra.mxu0 (!%p171_p3), %v2479_v3  ;;  %2444 = vmatpush3.bf16.msra.mxu1 (!%p171_p3), %v2479_v3  ;;  %v2499_v22 = vld [vmem:[%s3078_s1 + $0x80] sm:$0xff] (!%p171_p3)   ;;  %v2500_v23 = vld [vmem:[%s3078_s1 + $0xc8] sm:$0xff] (!%p171_p3)   ;;  %v2509_v28 = vld [vmem:[%s3078_s1 + $0xd0] sm:$0xff] (!%p171_p3)  }
   0xd   : > { %2155 = vmatprep.subr.bf16.mxu0 (!%p171_p3), %v2480_v4  ;;  %2437 = vmatprep.subr.bf16.mxu1 (!%p171_p3), %v2480_v4  ;;  %v2502_v26 = vld [vmem:[%s3078_s1 + $0x88] sm:$0xff] (!%p171_p3)   ;;  %v2510_v30 = vld [vmem:[%s3078_s1 + $0x90] sm:$0xff] (!%p171_p3)   ;;  %v2511_v31 = vld [vmem:[%s3078_s1 + $0xd8] sm:$0xff] (!%p171_p3)  }
   0xe   : > { %s3086_s18 = smov (!%p206_p4, %s1853_s18), 95  ;;  %v2512_v34 = vld [vmem:[%s3078_s1 + $0x98] sm:$0xff]   ;;  %v2532_v35 = vld [vmem:[%s3078_s1 + $0x108] sm:$0xff]   ;;  %v2519_v37 = vld [vmem:[%s3078_s1 + $0xe0] sm:$0xff]  }
   0xf   : > { %s2451_s4 = smul.u32 20, %s3086_s18  ;;  %v2520_v39 = vld [vmem:[%s3078_s1 + $0xa0] sm:$0xff]   ;;  %v2521_v40 = vld [vmem:[%s3078_s1 + $0xe8] sm:$0xff]   ;;  %v2529_v46 = vld [vmem:[%s3078_s1 + $0xf0] sm:$0xff]   ;;  %s1856_s27 = sshll.u32 %s3086_s18, 2 }
  0x10   : > { %2156 = vmatpush3.bf16.msra.mxu0 %v2481_v5  ;;  %2445 = vmatpush3.bf16.msra.mxu1 %v2481_v5  ;;  %v2522_v43 = vld [vmem:[%s3078_s1 + $0xa8] sm:$0xff]   ;;  %v2552_v47 = vld [vmem:[%s3078_s1 + $0x110] sm:$0xff]   ;;  %v2531_v49 = vld [vmem:[%s3078_s1 + $0xf8] sm:$0xff]   ;;  %s2994_s30 = scalar_lea.vmem %s3080_s3, %s1856_s27 }
  0x11   : > { %2157 = vmatprep.subr.bf16.mxu0 %v2482_v6  ;;  %2438 = vmatprep.subr.bf16.mxu1 %v2482_v6  ;;  %s2719_s11 = scalar_lea.vmem %s3077_s0, %s2451_s4  ;;  %v2530_v48 = vld [vmem:[%s3078_s1 + $0xb0] sm:$0xff]   ;;  %v2533_v52 = vld [vmem:[%s3078_s1 + $0xb8] sm:$0xff]  }
  0x12   : > { %v2494_v11 = vld [vmem:[%s2719_s11 + $0x4] ss:$20 sps:$4 sm:$0xff]   ;;  %v2492_v20 = vld [vmem:[%s2719_s11] ss:$20 sps:$4 sm:$0xff]   ;;  %v2507_v27 = vld [vmem:[%s2719_s11 + $0x28] ss:$20 sps:$4 sm:$0xff]  }
  0x13   : > { %v2497_v12 = vld [vmem:[%s2719_s11 + $0x1e4] ss:$20 sps:$4 sm:$0xff]   ;;  %1101 = vmatprep.mubr.bf16.mxu0 %v2494_v11  ;;  %v2495_v21 = vld [vmem:[%s2719_s11 + $0x1e0] ss:$20 sps:$4 sm:$0xff]   ;;  %v2508_v29 = vld [vmem:[%s2719_s11 + $0x208] ss:$20 sps:$4 sm:$0xff]  }
  0x14   : > { %2158 = vmatpush3.bf16.msra.mxu0 %v2483_v7  ;;  %2446 = vmatpush3.bf16.msra.mxu1 %v2483_v7  ;;  %v2503_v24 = vld [vmem:[%s2719_s11 + $0x2c] ss:$20 sps:$4 sm:$0xff]   ;;  %v2513_v32 = vld [vmem:[%s2719_s11 + $0x54] ss:$20 sps:$4 sm:$0xff]   ;;  %v2517_v36 = vld [vmem:[%s2719_s11 + $0x50] ss:$20 sps:$4 sm:$0xff]  }
  0x15   : > { %2159 = vmatprep.subr.bf16.mxu0 %v2484_v8  ;;  %2439 = vmatprep.subr.bf16.mxu1 %v2484_v8  ;;  %v2505_v25 = vld [vmem:[%s2719_s11 + $0x20c] ss:$20 sps:$4 sm:$0xff]   ;;  %v2515_v33 = vld [vmem:[%s2719_s11 + $0x234] ss:$20 sps:$4 sm:$0xff]   ;;  %v2518_v38 = vld [vmem:[%s2719_s11 + $0x230] ss:$20 sps:$4 sm:$0xff]  }
  0x16   : > { %1197 = vmatprep.mubr.bf16.mxu1 %v2497_v12  ;;  %v2523_v41 = vld [vmem:[%s2719_s11 + $0x7c] ss:$20 sps:$4 sm:$0xff]   ;;  %v2527_v44 = vld [vmem:[%s2719_s11 + $0x78] ss:$20 sps:$4 sm:$0xff]   ;;  %v2539_v54 = vld [vmem:[%s2719_s11 + $0xa0] ss:$20 sps:$4 sm:$0xff]  }
  0x17   : > { %v2525_v42 = vld [vmem:[%s2719_s11 + $0x25c] ss:$20 sps:$4 sm:$0xff]   ;;  %v2528_v45 = vld [vmem:[%s2719_s11 + $0x258] ss:$20 sps:$4 sm:$0xff]   ;;  %v2542_v57 = vld [vmem:[%s2719_s11 + $0x34] ss:$20 sps:$4 sm:$0xff]  }
  0x18   : > { %2160 = vmatpush3.bf16.msra.mxu0 %v2485_v9  ;;  %2447 = vmatpush3.bf16.msra.mxu1 %v2485_v9  ;;  %v2534_v50 = vld [vmem:[%s2719_s11 + $0xa4] ss:$20 sps:$4 sm:$0xff]   ;;  %v2538_v51 = vld [vmem:[%s2719_s11 + $0xc] ss:$20 sps:$4 sm:$0xff]   ;;  %v2536_v53 = vld [vmem:[%s2719_s11 + $0x8] ss:$20 sps:$4 sm:$0xff]  }
  0x19   : > { %2161 = vmatprep.subr.bf16.mxu0 %v2486_v10  ;;  %2440 = vmatprep.subr.bf16.mxu1 %v2486_v10  ;;  %v2540_v55 = vld [vmem:[%s2719_s11 + $0xcc] ss:$20 sps:$4 sm:$0xff]   ;;  %v2571_v56 = vld [vmem:[%s3078_s1 + $0x118] sm:$0xff]   ;;  %v2545_v59 = vld [vmem:[%s2719_s11 + $0x30] ss:$20 sps:$4 sm:$0xff]  }
  0x1a   : > { %v2544_v58 = vld [vmem:[%s2719_s11 + $0xc8] ss:$20 sps:$4 sm:$0xff]   ;;  %v2550_v62 = vld [vmem:[%s2719_s11 + $0xf0] ss:$20 sps:$4 sm:$0xff]   ;;  %v2551_v63 = vld [vmem:[%s2719_s11 + $0x58] ss:$20 sps:$4 sm:$0xff]  }
  0x1b   : > { %v2546_v60 = vld [vmem:[%s2719_s11 + $0xf4] ss:$20 sps:$4 sm:$0xff]   ;;  %v2548_v61 = vld [vmem:[%s2719_s11 + $0x5c] ss:$20 sps:$4 sm:$0xff]   ;;  %v2555_v1 = vld [vmem:[%s2719_s11 + $0x84] ss:$20 sps:$4 sm:$0xff]  }
  0x1c   : > { %2162 = vmatpush3.bf16.msra.mxu0 %v2487_v13  ;;  %2448 = vmatpush3.bf16.msra.mxu1 %v2487_v13  ;;  %v2553_v0 = vld [vmem:[%s2719_s11 + $0x11c] ss:$20 sps:$4 sm:$0xff]   ;;  %v2557_v2 = vld [vmem:[%s2719_s11 + $0x118] ss:$20 sps:$4 sm:$0xff]   ;;  %v2558_v3 = vld [vmem:[%s2719_s11 + $0x80] ss:$20 sps:$4 sm:$0xff]  }
  0x1d   : > { %2163 = vmatprep.subr.bf16.mxu0 %v2488_v14  ;;  %2441 = vmatprep.subr.bf16.mxu1 %v2488_v14  ;;  %v2559_v4 = vld [vmem:[%s2719_s11 + $0x144] ss:$20 sps:$4 sm:$0xff]   ;;  %v2561_v5 = vld [vmem:[%s2719_s11 + $0xac] ss:$20 sps:$4 sm:$0xff]   ;;  %v2564_v7 = vld [vmem:[%s2719_s11 + $0xa8] ss:$20 sps:$4 sm:$0xff]  }
  0x1e   : > { %v2563_v6 = vld [vmem:[%s2719_s11 + $0x140] ss:$20 sps:$4 sm:$0xff]   ;;  %v2569_v10 = vld [vmem:[%s2719_s11 + $0x168] ss:$20 sps:$4 sm:$0xff]   ;;  %v2570_v11 = vld [vmem:[%s2719_s11 + $0xd0] ss:$20 sps:$4 sm:$0xff]  }
  0x1f   : > { %v2565_v8 = vld [vmem:[%s2719_s11 + $0x16c] ss:$20 sps:$4 sm:$0xff]   ;;  %v2567_v9 = vld [vmem:[%s2719_s11 + $0xd4] ss:$20 sps:$4 sm:$0xff]   ;;  %v2574_v13 = vld [vmem:[%s2719_s11 + $0xfc] ss:$20 sps:$4 sm:$0xff]  }
  0x20   : > { %2164 = vmatpush3.bf16.msra.mxu0 %v2489_v15  ;;  %2449 = vmatpush3.bf16.msra.mxu1 %v2489_v15  ;;  %v2572_v12 = vld [vmem:[%s2719_s11 + $0x194] ss:$20 sps:$4 sm:$0xff]   ;;  %v2576_v14 = vld [vmem:[%s2719_s11 + $0x190] ss:$20 sps:$4 sm:$0xff]   ;;  %v2577_v15 = vld [vmem:[%s2719_s11 + $0xf8] ss:$20 sps:$4 sm:$0xff]  }
  0x21   : > { %2165 = vmatprep.subr.bf16.mxu0 %v2490_v16  ;;  %2442 = vmatprep.subr.bf16.mxu1 %v2490_v16  ;;  %v2578_v16 = vld [vmem:[%s2719_s11 + $0x1bc] ss:$20 sps:$4 sm:$0xff]  }
  0x24   : > { %2166 = vmatpush3.bf16.msra.mxu0 %v2491_v17  ;;  %2450 = vmatpush3.bf16.msra.mxu1 %v2491_v17  ;;  %v2580_v17 = vld [vmem:[%s2719_s11 + $0x124] ss:$20 sps:$4 sm:$0xff]  }
  0x25   : > { %2263 = vmatprep.subr.bf16.mxu1 %v2498_v18  ;;  %2395 = vmatprep.subr.bf16.mxu0 %v2501_v19  ;;  %v2582_v18 = vld [vmem:[%s2719_s11 + $0x1b8] ss:$20 sps:$4 sm:$0xff]  }
  0x27   : > { %1102 = vmatmul.mubr.bf16.vlgmr.msra.gmra.mrb[0].mxu0 %v2492_v20  ;;  %1198 = vmatmul.mubr.bf16.vlgmr.msra.gmra.mrb[0].mxu1 %v2495_v21  ;;  %v2584_v20 = vld [vmem:[%s2719_s11 + $0x14c] ss:$20 sps:$4 sm:$0xff]   ;;  %v2586_v21 = vld [vmem:[%s2719_s11 + $0x10] ss:$20 sps:$4 sm:$0xff]  }
  0x28   : > { %2264 = vmatpush3.bf16.msra.mxu1 %v2499_v22  ;;  %2396 = vmatpush3.bf16.msra.mxu0 %v2501_v19  ;;  %v2583_v19 = vld [vmem:[%s2719_s11 + $0x120] ss:$20 sps:$4 sm:$0xff]   ;;  %v2587_v22 = vld [vmem:[%s2719_s11 + $0x148] ss:$20 sps:$4 sm:$0xff]  }
  0x29   : > { %2265 = vmatprep.subr.bf16.mxu1 %v2500_v23  ;;  %1109 = vmatprep.mubr.bf16.mxu0 %v2503_v24  ;;  %v2588_v23 = vld [vmem:[%s2719_s11 + $0x38] ss:$20 sps:$4 sm:$0xff]   ;;  %v2589_v24 = vld [vmem:[%s2719_s11 + $0x174] ss:$20 sps:$4 sm:$0xff]  }
  0x2a   : > { %1205 = vmatprep.mubr.bf16.mxu1 %v2505_v25  ;;  %2397 = vmatprep.subr.bf16.mxu0 %v2532_v35  ;;  %v2591_v25 = vld [vmem:[%s2719_s11 + $0x60] ss:$20 sps:$4 sm:$0xff]  }
  0x2c   : > { %2266 = vmatpush3.bf16.msra.mxu1 %v2502_v26  ;;  %2398 = vmatpush3.bf16.msra.mxu0 %v2532_v35  ;;  %v2592_v26 = vld [vmem:[%s2719_s11 + $0x170] ss:$20 sps:$4 sm:$0xff]   ;;  %v2603_v35 = vld [vmem:[%s2719_s11 + $0x128] ss:$20 sps:$4 sm:$0xff]  }
  0x2d   : > { %2267 = vmatprep.subr.bf16.mxu1 %v2509_v28  ;;  %2399 = vmatprep.subr.bf16.mxu0 %v2552_v47  ;;  %v2594_v28 = vld [vmem:[%s2719_s11 + $0x19c] ss:$20 sps:$4 sm:$0xff]  }
  0x2f   : > { %1110 = vmatmul.mubr.bf16.gmra.mrb[4].mxu0 %v2507_v27  ;;  %1206 = vmatmul.mubr.bf16.gmra.mrb[4].mxu1 %v2508_v29  ;;  %v2593_v27 = vld [vmem:[%s2719_s11 + $0x88] ss:$20 sps:$4 sm:$0xff]   ;;  %v2596_v29 = vld [vmem:[%s2719_s11 + $0xb0] ss:$20 sps:$4 sm:$0xff]  }
  0x30   : > { %2268 = vmatpush3.bf16.msra.mxu1 %v2510_v30  ;;  %1117 = vmatprep.mubr.bf16.mxu0 %v2513_v32  ;;  %v2597_v30 = vld [vmem:[%s2719_s11 + $0x198] ss:$20 sps:$4 sm:$0xff]  }
  0x31   : > { %2269 = vmatprep.subr.bf16.mxu1 %v2511_v31  ;;  %1213 = vmatprep.mubr.bf16.mxu1 %v2515_v33  ;;  %v2598_v31 = vld [vmem:[%s2719_s11 + $0xd8] ss:$20 sps:$4 sm:$0xff]   ;;  %v2601_v33 = vld [vmem:[%s2719_s11 + $0x100] ss:$20 sps:$4 sm:$0xff]  }
  0x32   : > { %2400 = vmatpush3.bf16.msra.mxu0 %v2552_v47  ;;  %v2599_v32 = vld [vmem:[%s2719_s11 + $0x1c4] ss:$20 sps:$4 sm:$0xff]  }
  0x33   : > { %2401 = vmatprep.subr.bf16.mxu0 %v2571_v56  ;;  %v2618_v47 = vld [vmem:[%s2719_s11 + $0x218] ss:$20 sps:$4 sm:$0xff]  }
  0x34   : > { %2270 = vmatpush3.bf16.msra.mxu1 %v2512_v34  ;;  %v2602_v34 = vld [vmem:[%s2719_s11 + $0x1c0] ss:$20 sps:$4 sm:$0xff]  }
  0x35   : > { %2271 = vmatprep.subr.bf16.mxu1 %v2519_v37  ;;  %v2606_v37 = vld [vmem:[%s2719_s11 + $0x150] ss:$20 sps:$4 sm:$0xff]  }
  0x36   : > { %2402 = vmatpush3.bf16.msra.mxu0 %v2571_v56 }
  0x37   : > { %1118 = vmatmul.mubr.bf16.gmra.mrb[8].mxu0 %v2517_v36  ;;  %1214 = vmatmul.mubr.bf16.gmra.mrb[8].mxu1 %v2518_v38  ;;  %v2604_v36 = vld [vmem:[%s2719_s11 + $0x1ec] ss:$20 sps:$4 sm:$0xff]   ;;  %v2607_v38 = vld [vmem:[%s2719_s11 + $0x1e8] ss:$20 sps:$4 sm:$0xff]  }
  0x38   : > { %2272 = vmatpush3.bf16.msra.mxu1 %v2520_v39  ;;  %1125 = vmatprep.mubr.bf16.mxu0 %v2523_v41  ;;  %v2608_v39 = vld [vmem:[%s2719_s11 + $0x178] ss:$20 sps:$4 sm:$0xff]   ;;  %v2611_v41 = vld [vmem:[%s2719_s11 + $0x1a0] ss:$20 sps:$4 sm:$0xff]  }
  0x39   : > { %2273 = vmatprep.subr.bf16.mxu1 %v2521_v40  ;;  %1221 = vmatprep.mubr.bf16.mxu1 %v2525_v42  ;;  %v2609_v40 = vld [vmem:[%s2719_s11 + $0x214] ss:$20 sps:$4 sm:$0xff]   ;;  %v2612_v42 = vld [vmem:[%s2719_s11 + $0x210] ss:$20 sps:$4 sm:$0xff]  }
  0x3c   : > { %2274 = vmatpush3.bf16.msra.mxu1 %v2522_v43  ;;  %v2613_v43 = vld [vmem:[%s2719_s11 + $0x1c8] ss:$20 sps:$4 sm:$0xff]  }
  0x3d   : > { %2275 = vmatprep.subr.bf16.mxu1 %v2529_v46  ;;  %v2617_v46 = vld [vmem:[%s2719_s11 + $0x238] ss:$20 sps:$4 sm:$0xff]  }
  0x3f   : > { %1126 = vmatmul.mubr.bf16.gmra.mrb[12].mxu0 %v2527_v44  ;;  %1222 = vmatmul.mubr.bf16.gmra.mrb[12].mxu1 %v2528_v45  ;;  %v2614_v44 = vld [vmem:[%s2719_s11 + $0x23c] ss:$20 sps:$4 sm:$0xff]  }
  0x40   : > { %2276 = vmatpush3.bf16.msra.mxu1 %v2530_v48  ;;  %1133 = vmatprep.mubr.bf16.mxu0 %v2534_v50  ;;  %v2616_v45 = vld [vmem:[%s2719_s11 + $0x1f0] ss:$20 sps:$4 sm:$0xff]   ;;  %v2622_v50 = vld [vmem:[%s2719_s11 + $0x260] ss:$20 sps:$4 sm:$0xff]  }
  0x41   : > { %2277 = vmatprep.subr.bf16.mxu1 %v2531_v49  ;;  %1262 = vmatprep.mubr.bf16.mxu1 %v2538_v51  ;;  %v2619_v48 = vld [vmem:[%s2719_s11 + $0x264] ss:$20 sps:$4 sm:$0xff]   ;;  %v2621_v49 = vld [vmem:[%s2719_s11 + $0x240] ss:$20 sps:$4 sm:$0xff]   ;;  %v2623_v51 = vld [vmem:[%s2719_s11 + $0x268] ss:$20 sps:$4 sm:$0xff]  }
  0x44   : > { %2278 = vmatpush3.bf16.msra.mxu1 %v2533_v52 }
  0x47   : > { %1134 = vmatmul.mubr.bf16.gmra.mrb[16].mxu0 %v2539_v54  ;;  %1263 = vmatmul.mubr.bf16.vlgmr.msra.gmra.mrb[16].mxu1 %v2536_v53 }
  0x48   : > { %1141 = vmatprep.mubr.bf16.mxu0 %v2540_v55  ;;  %1270 = vmatprep.mubr.bf16.mxu1 %v2542_v57 }
  0x4f   : > { %1142 = vmatmul.mubr.bf16.gmra.mrb[20].mxu0 %v2544_v58  ;;  %1271 = vmatmul.mubr.bf16.gmra.mrb[20].mxu1 %v2545_v59 }
  0x50   : > { %1149 = vmatprep.mubr.bf16.mxu0 %v2546_v60  ;;  %1278 = vmatprep.mubr.bf16.mxu1 %v2548_v61 }
  0x57   : > { %1150 = vmatmul.mubr.bf16.gmra.mrb[24].mxu0 %v2550_v62  ;;  %1279 = vmatmul.mubr.bf16.gmra.mrb[24].mxu1 %v2551_v63 }
  0x58   : > { %1157 = vmatprep.mubr.bf16.mxu0 %v2553_v0  ;;  %1286 = vmatprep.mubr.bf16.mxu1 %v2555_v1 }
  0x5f   : > { %1158 = vmatmul.mubr.bf16.gmra.mrb[28].mxu0 %v2557_v2  ;;  %1287 = vmatmul.mubr.bf16.gmra.mrb[28].mxu1 %v2558_v3 }
  0x60   : > { %1165 = vmatprep.mubr.bf16.mxu0 %v2559_v4  ;;  %1294 = vmatprep.mubr.bf16.mxu1 %v2561_v5 }
  0x67   : > { %1166 = vmatmul.mubr.bf16.gmra.mrb[32].mxu0 %v2563_v6  ;;  %1295 = vmatmul.mubr.bf16.gmra.mrb[32].mxu1 %v2564_v7 }
  0x68   : > { %1173 = vmatprep.mubr.bf16.mxu0 %v2565_v8  ;;  %1302 = vmatprep.mubr.bf16.mxu1 %v2567_v9 }
  0x6f   : > { %1174 = vmatmul.mubr.bf16.gmra.mrb[36].mxu0 %v2569_v10  ;;  %1303 = vmatmul.mubr.bf16.gmra.mrb[36].mxu1 %v2570_v11 }
  0x70   : > { %1181 = vmatprep.mubr.bf16.mxu0 %v2572_v12  ;;  %1310 = vmatprep.mubr.bf16.mxu1 %v2574_v13 }
  0x77   : > { %1182 = vmatmul.mubr.bf16.gmra.mrb[40].mxu0 %v2576_v14  ;;  %1311 = vmatmul.mubr.bf16.gmra.mrb[40].mxu1 %v2577_v15 }
  0x78   : > { %1189 = vmatprep.mubr.bf16.mxu0 %v2578_v16  ;;  %1318 = vmatprep.mubr.bf16.mxu1 %v2580_v17 }
  0x7f   : > { %1190 = vmatmul.mubr.bf16.gmra.mrb[44].mxu0 %v2582_v18  ;;  %1319 = vmatmul.mubr.bf16.gmra.mrb[44].mxu1 %v2583_v19 }
  0x80   : > { %1326 = vmatprep.mubr.bf16.mxu1 %v2584_v20  ;;  %2403 = vmatprep.mubr.msk.bf16.mxu0 %vm1020_vm0, %v2586_v21 }
  0x87   : > { %1327 = vmatmul.mubr.bf16.gmra.mrb[48].mxu1 %v2587_v22  ;;  %2404 = vmatmul.mubr.msk.bf16.vlgmr.msra.gmra.mrb[48].mxu0 %vm1020_vm0, %v2588_v23 }
  0x88   : > { %1334 = vmatprep.mubr.bf16.mxu1 %v2589_v24  ;;  %2407 = vmatprep.mubr.msk.bf16.mxu0 %vm1020_vm0, %v2591_v25 }
  0x8f   : > { %1335 = vmatmul.mubr.bf16.gmra.mrb[52].mxu1 %v2592_v26  ;;  %2408 = vmatmul.mubr.msk.bf16.gmra.mrb[52].mxu0 %vm1020_vm0, %v2593_v27 }
  0x90   : > { %1342 = vmatprep.mubr.bf16.mxu1 %v2594_v28  ;;  %2411 = vmatprep.mubr.msk.bf16.mxu0 %vm1020_vm0, %v2596_v29 }
  0x97   : > { %1343 = vmatmul.mubr.bf16.gmra.mrb[56].mxu1 %v2597_v30  ;;  %2412 = vmatmul.mubr.msk.bf16.gmra.mrb[56].mxu0 %vm1020_vm0, %v2598_v31 }
  0x98   : > { %1350 = vmatprep.mubr.bf16.mxu1 %v2599_v32  ;;  %2415 = vmatprep.mubr.msk.bf16.mxu0 %vm1020_vm0, %v2601_v33 }
  0x9f   : > { %1351 = vmatmul.mubr.bf16.gmra.mrb[60].mxu1 %v2602_v34  ;;  %2416 = vmatmul.mubr.msk.bf16.gmra.mrb[60].mxu0 %vm1020_vm0, %v2603_v35 }
  0xa0   : > { %1358 = vmatprep.mubr.bf16.mxu1 %v2604_v36  ;;  %2419 = vmatprep.mubr.msk.bf16.mxu0 %vm1020_vm0, %v2606_v37 }
  0xa7   : > { %1359 = vmatmul.mubr.bf16.gmra.mrb[64].mxu1 %v2607_v38  ;;  %2420 = vmatmul.mubr.msk.bf16.gmra.mrb[64].mxu0 %vm1020_vm0, %v2608_v39  ;;  %v2917_v38 = vld [vmem:[%s3079_s2] ss:$0 sm:$0xff] }
  0xa8   : > { %1366 = vmatprep.mubr.bf16.mxu1 %v2609_v40  ;;  %2423 = vmatprep.mubr.msk.bf16.mxu0 %vm1020_vm0, %v2611_v41 }
  0xaf   : > { %1367 = vmatmul.mubr.bf16.gmra.mrb[68].mxu1 %v2612_v42  ;;  %2424 = vmatmul.mubr.msk.bf16.gmra.mrb[68].mxu0 %vm1020_vm0, %v2613_v43 }
  0xb0   : > { %1374 = vmatprep.mubr.bf16.mxu1 %v2614_v44  ;;  %2427 = vmatprep.mubr.msk.bf16.mxu0 %vm1020_vm0, %v2616_v45 }
  0xb7   : > { %1375 = vmatmul.mubr.bf16.gmra.mrb[72].mxu1 %v2617_v46  ;;  %2428 = vmatmul.mubr.msk.bf16.gmra.mrb[72].mxu0 %vm1020_vm0, %v2618_v47 }
  0xb8   : > { %1382 = vmatprep.mubr.bf16.mxu1 %v2619_v48  ;;  %2431 = vmatprep.mubr.msk.bf16.mxu0 %vm1020_vm0, %v2621_v49 }
  0xbf   : > { %1383 = vmatmul.mubr.bf16.gmra.mrb[76].mxu1 %v2622_v50  ;;  %2432 = vmatmul.mubr.msk.bf16.gmra.mrb[76].mxu0 %vm1020_vm0, %v2623_v51 }
  0xfa   : > { %v2239_v52 = vpop.f32.mrb[0].mxu1  ;;  %v2167_v53 = vpop.f32.mrb[0].mxu0 }
  0xfb   : > { %v2240_v54 = vpop.f32.mrb[1].mxu1  ;;  %v2168_v55 = vpop.f32.mrb[1].mxu0 }
  0xfc   : > { %v2898_v56 = vadd.f32 %v2240_v54, %v2239_v52  ;;  %v2242_v57 = vpop.f32.mrb[2].mxu1  ;;  %v2169_v58 = vadd.f32 %v2168_v55, %v2167_v53  ;;  %v2170_v59 = vpop.f32.mrb[2].mxu0 }
  0xfd   : > { %v2243_v60 = vpop.f32.mrb[3].mxu1  ;;  %v2171_v61 = vpop.f32.mrb[3].mxu0 }
  0xfe   : > { %v2900_v62 = vadd.f32 %v2243_v60, %v2242_v57  ;;  %v2172_v63 = vadd.f32 %v2171_v61, %v2170_v59  ;;  %v1104_v41 = vadd.f32 %v2169_v58, %v2917_v38 }
 0x100   : > { %v1107_v48 = vadd.f32 %v2172_v63, %v2917_v38 }
 0x102   : > { %v2245_v0 = vpop.f32.mrb[4].mxu1  ;;  %v2173_v1 = vpop.f32.mrb[4].mxu0 }
 0x103   : > { %v2246_v2 = vpop.f32.mrb[5].mxu1  ;;  %v2174_v3 = vpop.f32.mrb[5].mxu0 }
 0x104   : > { %v2902_v4 = vadd.f32 %v2246_v2, %v2245_v0  ;;  %v2248_v5 = vpop.f32.mrb[6].mxu1  ;;  %v2175_v6 = vadd.f32 %v2174_v3, %v2173_v1  ;;  %v2176_v7 = vpop.f32.mrb[6].mxu0 }
 0x105   : > { %v2249_v8 = vpop.f32.mrb[7].mxu1  ;;  %v2177_v9 = vpop.f32.mrb[7].mxu0 }
 0x106   : > { %v2904_v10 = vadd.f32 %v2249_v8, %v2248_v5  ;;  %v2178_v11 = vadd.f32 %v2177_v9, %v2176_v7  ;;  %v1112_v58 = vadd.f32 %v2175_v6, %v2917_v38 }
 0x108   : > { %v1115_v63 = vadd.f32 %v2178_v11, %v2917_v38 }
 0x10a   : > { %v2251_v12 = vpop.f32.mrb[8].mxu1  ;;  %v2179_v13 = vpop.f32.mrb[8].mxu0 }
 0x10b   : > { %v2252_v14 = vpop.f32.mrb[9].mxu1  ;;  %v2180_v15 = vpop.f32.mrb[9].mxu0 }
 0x10c   : > { %v2906_v16 = vadd.f32 %v2252_v14, %v2251_v12  ;;  %v2254_v17 = vpop.f32.mrb[10].mxu1  ;;  %v2181_v18 = vadd.f32 %v2180_v15, %v2179_v13  ;;  %v2182_v19 = vpop.f32.mrb[10].mxu0 }
 0x10d   : > { %v2255_v20 = vpop.f32.mrb[11].mxu1  ;;  %v2183_v21 = vpop.f32.mrb[11].mxu0 }
 0x10e   : > { %v2908_v22 = vadd.f32 %v2255_v20, %v2254_v17  ;;  %v2184_v23 = vadd.f32 %v2183_v21, %v2182_v19  ;;  %v1120_v6 = vadd.f32 %v2181_v18, %v2917_v38 }
 0x110   : > { %v1123_v11 = vadd.f32 %v2184_v23, %v2917_v38 }
 0x112   : > { %v2257_v24 = vpop.f32.mrb[12].mxu1  ;;  %v2185_v25 = vpop.f32.mrb[12].mxu0 }
 0x113   : > { %v2258_v26 = vpop.f32.mrb[13].mxu1  ;;  %v2186_v27 = vpop.f32.mrb[13].mxu0 }
 0x114   : > { %v2910_v28 = vadd.f32 %v2258_v26, %v2257_v24  ;;  %v2260_v29 = vpop.f32.mrb[14].mxu1  ;;  %v2187_v30 = vadd.f32 %v2186_v27, %v2185_v25  ;;  %v2188_v31 = vpop.f32.mrb[14].mxu0 }
 0x115   : > { %v2261_v32 = vpop.f32.mrb[15].mxu1  ;;  %v2189_v33 = vpop.f32.mrb[15].mxu0 }
 0x116   : > { %v2912_v34 = vadd.f32 %v2261_v32, %v2260_v29  ;;  %v2190_v35 = vadd.f32 %v2189_v33, %v2188_v31  ;;  %v1128_v18 = vadd.f32 %v2187_v30, %v2917_v38 }
 0x118   : > { %v1131_v23 = vadd.f32 %v2190_v35, %v2917_v38 }
 0x11a   : > { %v2279_v36 = vpop.f32.mrb[16].mxu1  ;;  %v2191_v37 = vpop.f32.mrb[16].mxu0 }
 0x11b   : > { %v2280_v39 = vpop.f32.mrb[17].mxu1  ;;  %v2192_v40 = vpop.f32.mrb[17].mxu0 }
 0x11c   : > { %v2281_v42 = vadd.f32 %v2280_v39, %v2279_v36  ;;  %v2282_v43 = vpop.f32.mrb[18].mxu1  ;;  %v2193_v44 = vadd.f32 %v2192_v40, %v2191_v37  ;;  %v2194_v45 = vpop.f32.mrb[18].mxu0 }
 0x11d   : > { %v2283_v46 = vpop.f32.mrb[19].mxu1  ;;  %v2195_v47 = vpop.f32.mrb[19].mxu0 }
 0x11e   : > { %v2284_v49 = vadd.f32 %v2283_v46, %v2282_v43  ;;  %v2196_v50 = vadd.f32 %v2195_v47, %v2194_v45  ;;  %v2921_v51 = vadd.f32 %v2281_v42, %v1104_v41  ;;  %v1136_v30 = vadd.f32 %v2193_v44, %v2917_v38 }
 0x120   : > { %v2923_v52 = vadd.f32 %v2284_v49, %v1107_v48  ;;  %v1139_v35 = vadd.f32 %v2196_v50, %v2917_v38 }
 0x122   : > { %v2285_v53 = vpop.f32.mrb[20].mxu1  ;;  %v2197_v54 = vpop.f32.mrb[20].mxu0 }
 0x123   : > { %v2286_v55 = vpop.f32.mrb[21].mxu1  ;;  %v2198_v57 = vpop.f32.mrb[21].mxu0 }
 0x124   : > { %v2287_v59 = vadd.f32 %v2286_v55, %v2285_v53  ;;  %v2288_v60 = vpop.f32.mrb[22].mxu1  ;;  %v2199_v61 = vadd.f32 %v2198_v57, %v2197_v54  ;;  %v2200_v0 = vpop.f32.mrb[22].mxu0 }
 0x125   : > { %v2289_v1 = vpop.f32.mrb[23].mxu1  ;;  %v2201_v2 = vpop.f32.mrb[23].mxu0 }
 0x126   : > { %v2290_v3 = vadd.f32 %v2289_v1, %v2288_v60  ;;  %v2202_v5 = vadd.f32 %v2201_v2, %v2200_v0  ;;  %v2927_v7 = vadd.f32 %v2287_v59, %v1112_v58  ;;  %v1144_v44 = vadd.f32 %v2199_v61, %v2917_v38 }
 0x128   : > { %v2929_v8 = vadd.f32 %v2290_v3, %v1115_v63 }
 0x12a   : > { %v2291_v9 = vpop.f32.mrb[24].mxu1  ;;  %v2203_v12 = vpop.f32.mrb[24].mxu0 }
 0x12b   : > { %v2292_v13 = vpop.f32.mrb[25].mxu1  ;;  %v2204_v14 = vpop.f32.mrb[25].mxu0 }
 0x12c   : > { %v2293_v15 = vadd.f32 %v2292_v13, %v2291_v9  ;;  %v2294_v17 = vpop.f32.mrb[26].mxu1  ;;  %v2205_v19 = vadd.f32 %v2204_v14, %v2203_v12  ;;  %v2206_v20 = vpop.f32.mrb[26].mxu0 }
 0x12d   : > { %v2295_v21 = vpop.f32.mrb[27].mxu1  ;;  %v2207_v24 = vpop.f32.mrb[27].mxu0 }
 0x12e   : > { %v2296_v25 = vadd.f32 %v2295_v21, %v2294_v17  ;;  %v2208_v26 = vadd.f32 %v2207_v24, %v2206_v20  ;;  %v2933_v27 = vadd.f32 %v2293_v15, %v1120_v6 }
 0x130   : > { %v2935_v29 = vadd.f32 %v2296_v25, %v1123_v11  ;;  %v1147_v11 = vadd.f32 %v2202_v5, %v2917_v38 }
 0x132   : > { %v2297_v31 = vpop.f32.mrb[28].mxu1  ;;  %v2209_v32 = vpop.f32.mrb[28].mxu0 }
 0x133   : > { %v2298_v33 = vpop.f32.mrb[29].mxu1  ;;  %v2210_v36 = vpop.f32.mrb[29].mxu0 }
 0x134   : > { %v2299_v37 = vadd.f32 %v2298_v33, %v2297_v31  ;;  %v2300_v39 = vpop.f32.mrb[30].mxu1  ;;  %v2211_v40 = vadd.f32 %v2210_v36, %v2209_v32  ;;  %v2212_v41 = vpop.f32.mrb[30].mxu0 }
 0x135   : > { %v2301_v42 = vpop.f32.mrb[31].mxu1  ;;  %v2213_v43 = vpop.f32.mrb[31].mxu0 }
 0x136   : > { %v2302_v45 = vadd.f32 %v2301_v42, %v2300_v39  ;;  %v2214_v46 = vadd.f32 %v2213_v43, %v2212_v41  ;;  %v2939_v47 = vadd.f32 %v2299_v37, %v1128_v18  ;;  %v1152_v39 = vadd.f32 %v2205_v19, %v2917_v38 }
 0x138   : > { %v2941_v48 = vadd.f32 %v2302_v45, %v1131_v23 }
 0x13a   : > { %v2303_v49 = vpop.f32.mrb[32].mxu1  ;;  %v2215_v53 = vpop.f32.mrb[32].mxu0 }
 0x13b   : > { %v2304_v54 = vpop.f32.mrb[33].mxu1  ;;  %v2216_v55 = vpop.f32.mrb[33].mxu0 }
 0x13c   : > { %v2305_v57 = vadd.f32 %v2304_v54, %v2303_v49  ;;  %v2306_v58 = vpop.f32.mrb[34].mxu1  ;;  %v2217_v59 = vadd.f32 %v2216_v55, %v2215_v53  ;;  %v2218_v60 = vpop.f32.mrb[34].mxu0  ;;  %v1155_v49 = vadd.f32 %v2208_v26, %v2917_v38 }
 0x13d   : > { %v2307_v0 = vpop.f32.mrb[35].mxu1  ;;  %v2219_v1 = vpop.f32.mrb[35].mxu0 }
 0x13e   : > { %v2308_v2 = vadd.f32 %v2307_v0, %v2306_v58  ;;  %v2945_v63 = vadd.f32 %v2219_v1, %v2218_v60  ;;  %v2947_v3 = vadd.f32 %v2305_v57, %v1136_v30  ;;  %v1160_v0 = vadd.f32 %v2211_v40, %v2917_v38 }
 0x140   : > { %v2949_v9 = vadd.f32 %v2308_v2, %v1139_v35 }
 0x142   : > { %v2309_v12 = vpop.f32.mrb[36].mxu1  ;;  %v2221_v13 = vpop.f32.mrb[36].mxu0 }
 0x143   : > { %v2310_v14 = vpop.f32.mrb[37].mxu1  ;;  %v2222_v6 = vpop.f32.mrb[37].mxu0 }
 0x144   : > { %v2311_v15 = vadd.f32 %v2310_v14, %v2309_v12  ;;  %v2312_v17 = vpop.f32.mrb[38].mxu1  ;;  %v2952_v20 = vadd.f32 %v2222_v6, %v2221_v13  ;;  %v2224_v21 = vpop.f32.mrb[38].mxu0  ;;  %v1163_v14 = vadd.f32 %v2214_v46, %v2917_v38 }
 0x145   : > { %v2313_v24 = vpop.f32.mrb[39].mxu1  ;;  %v2225_v50 = vpop.f32.mrb[39].mxu0 }
 0x146   : > { %v2314_v25 = vadd.f32 %v2313_v24, %v2312_v17  ;;  %v2955_v31 = vadd.f32 %v2225_v50, %v2224_v21  ;;  %v2957_v32 = vadd.f32 %v2311_v15, %v1144_v44 }
 0x148   : > { %v2959_v33 = vadd.f32 %v2314_v25, %v1147_v11  ;;  %v1168_v25 = vadd.f32 %v2217_v59, %v2917_v38 }
 0x14a   : > { %v2315_v36 = vpop.f32.mrb[40].mxu1  ;;  %v2227_v18 = vpop.f32.mrb[40].mxu0 }
 0x14b   : > { %v2316_v37 = vpop.f32.mrb[41].mxu1  ;;  %v2228_v61 = vpop.f32.mrb[41].mxu0 }
 0x14c   : > { %v2317_v41 = vadd.f32 %v2316_v37, %v2315_v36  ;;  %v2318_v42 = vpop.f32.mrb[42].mxu1  ;;  %v2962_v43 = vadd.f32 %v2228_v61, %v2227_v18  ;;  %v2230_v23 = vpop.f32.mrb[42].mxu0 }
 0x14d   : > { %v2319_v45 = vpop.f32.mrb[43].mxu1  ;;  %v2231_v5 = vpop.f32.mrb[43].mxu0 }
 0x14e   : > { %v2320_v53 = vadd.f32 %v2319_v45, %v2318_v42  ;;  %v2965_v54 = vadd.f32 %v2231_v5, %v2230_v23  ;;  %v2967_v55 = vadd.f32 %v2317_v41, %v1152_v39  ;;  %v1171_v42 = vadd.f32 %v2945_v63, %v2917_v38 }
 0x150   : > { %v2969_v30 = vadd.f32 %v2320_v53, %v1155_v49 }
 0x152   : > { %v2321_v57 = vpop.f32.mrb[44].mxu1  ;;  %v2233_v58 = vpop.f32.mrb[44].mxu0 }
 0x153   : > { %v2322_v60 = vpop.f32.mrb[45].mxu1  ;;  %v2234_v19 = vpop.f32.mrb[45].mxu0 }
 0x154   : > { %v2323_v1 = vadd.f32 %v2322_v60, %v2321_v57  ;;  %v2324_v35 = vpop.f32.mrb[46].mxu1  ;;  %v2972_v2 = vadd.f32 %v2234_v19, %v2233_v58  ;;  %v2236_v12 = vpop.f32.mrb[46].mxu0 }
 0x155   : > { %v2325_v13 = vpop.f32.mrb[47].mxu1  ;;  %v2237_v26 = vpop.f32.mrb[47].mxu0 }
 0x156   : > { %v2326_v6 = vadd.f32 %v2325_v13, %v2324_v35  ;;  %v2975_v44 = vadd.f32 %v2237_v26, %v2236_v12  ;;  %v2977_v15 = vadd.f32 %v2323_v1, %v1160_v0  ;;  %v1176_v0 = vadd.f32 %v2952_v20, %v2917_v38 }
 0x158   : > { %v2979_v17 = vadd.f32 %v2326_v6, %v1163_v14 }
 0x15a   : > { %v2327_v21 = vpop.f32.mrb[48].mxu1  ;;  %v2405_v24 = vpop.f32.mrb[48].mxu0 }
 0x15b   : > { %v1434_v40 = vadd.f32 %v2405_v24, %v2927_v7  ;;  %v2328_v50 = vpop.f32.mrb[49].mxu1  ;;  %v1425_v11 = vpop.f32.mrb[49].mxu0 }
 0x15c   : > { %v2329_v36 = vadd.f32 %v2328_v50, %v2327_v21  ;;  %v1426_v18 = vadd.f32 %v1425_v11, %v2921_v51  ;;  %v2330_v37 = vpop.f32.mrb[50].mxu1  ;;  %v2406_v46 = vpop.f32.mrb[50].mxu0  ;;  %v1179_v21 = vadd.f32 %v2955_v31, %v2917_v38 }
 0x15d   : > { %v1437_v61 = vadd.f32 %v2406_v46, %v2929_v8  ;;  %v2331_v39 = vpop.f32.mrb[51].mxu1  ;;  %v1428_v41 = vpop.f32.mrb[51].mxu0  ;;  %v1554_v5 = vmax.f32 %v1434_v40, 0.0 }
 0x15e   : > { %v2332_v23 = vadd.f32 %v2331_v39, %v2330_v37  ;;  %v1429_v7 = vadd.f32 %v1428_v41, %v2923_v52  ;;  %v2989_v45 = vadd.f32 %v2329_v36, %v1168_v25  ;;  %v1552_v49 = vmax.f32 %v1426_v18, 0.0 }
 0x15f   : > { %v1555_v59 = vmax.f32 %v1437_v61, 0.0 }
 0x160   : > { %v1553_v51 = vmax.f32 %v1429_v7, 0.0  ;;  %v2996_v8 = vadd.f32 %v2332_v23, %v1171_v42 }
 0x161   : > { %v2064_v53 = vpack.c.bf16 %v1555_v59, %v1554_v5 }
 0x162   : > { %v2059_v63 = vpack.c.bf16 %v1553_v51, %v1552_v49  ;;  %v2333_v57 = vpop.f32.mrb[52].mxu1  ;;  %v2409_v58 = vpop.f32.mrb[52].mxu0  ;;  %v1187_v49 = vadd.f32 %v2965_v54, %v2917_v38 }
 0x163   : > { %2136 = vst [vmem:[%s2994_s30 + $0x8] sm:$0xff] %v2064_v53   ;;  %v1450_v52 = vadd.f32 %v2409_v58, %v2939_v47  ;;  %v2334_v60 = vpop.f32.mrb[53].mxu1  ;;  %v1441_v19 = vpop.f32.mrb[53].mxu0 }
 0x164   : > { %2060 = vst [vmem:[%s2994_s30] sm:$0xff] %v2059_v63   ;;  %v2335_v1 = vadd.f32 %v2334_v60, %v2333_v57  ;;  %v1442_v35 = vadd.f32 %v1441_v19, %v2933_v27  ;;  %v2336_v12 = vpop.f32.mrb[54].mxu1  ;;  %v2410_v13 = vpop.f32.mrb[54].mxu0 }
 0x165   : > { %v1453_v26 = vadd.f32 %v2410_v13, %v2941_v48  ;;  %v2337_v14 = vpop.f32.mrb[55].mxu1  ;;  %v1444_v6 = vpop.f32.mrb[55].mxu0  ;;  %v1558_v20 = vmax.f32 %v1450_v52, 0.0 }
 0x166   : > { %v2338_v47 = vadd.f32 %v2337_v14, %v2336_v12  ;;  %v1445_v24 = vadd.f32 %v1444_v6, %v2935_v29  ;;  %v3008_v40 = vadd.f32 %v2335_v1, %v1176_v0  ;;  %v1556_v11 = vmax.f32 %v1442_v35, 0.0 }
 0x167   : > { %v1559_v50 = vmax.f32 %v1453_v26, 0.0  ;;  %v1184_v29 = vadd.f32 %v2962_v43, %v2917_v38 }
 0x168   : > { %v1557_v27 = vmax.f32 %v1445_v24, 0.0  ;;  %v3010_v25 = vadd.f32 %v2338_v47, %v1179_v21  ;;  %v1195_v47 = vadd.f32 %v2975_v44, %v2917_v38  ;;  %v1200_v44 = vadd.f32 %v2898_v56, %v2917_v38 }
 0x169   : > { %v2074_v36 = vpack.c.bf16 %v1559_v50, %v1558_v20 }
 0x16a   : > { %v2069_v48 = vpack.c.bf16 %v1557_v27, %v1556_v11  ;;  %v2339_v18 = vpop.f32.mrb[56].mxu1  ;;  %v2413_v37 = vpop.f32.mrb[56].mxu0 }
 0x16b   : > { %2138 = vst [vmem:[%s2994_s30 + $0x18] sm:$0xff] %v2074_v36   ;;  %v1466_v46 = vadd.f32 %v2413_v37, %v2957_v32  ;;  %v2340_v31 = vpop.f32.mrb[57].mxu1  ;;  %v1457_v61 = vpop.f32.mrb[57].mxu0 }
 0x16c   : > { %2137 = vst [vmem:[%s2994_s30 + $0x10] sm:$0xff] %v2069_v48   ;;  %v2341_v39 = vadd.f32 %v2340_v31, %v2339_v18  ;;  %v1458_v41 = vadd.f32 %v1457_v61, %v2947_v3  ;;  %v2342_v42 = vpop.f32.mrb[58].mxu1  ;;  %v2414_v23 = vpop.f32.mrb[58].mxu0 }
 0x16d   : > { %v1469_v7 = vadd.f32 %v2414_v23, %v2959_v33  ;;  %v2343_v5 = vpop.f32.mrb[59].mxu1  ;;  %v1460_v59 = vpop.f32.mrb[59].mxu0  ;;  %v1562_v43 = vmax.f32 %v1466_v46, 0.0 }
 0x16e   : > { %v2344_v32 = vadd.f32 %v2343_v5, %v2342_v42  ;;  %v1461_v51 = vadd.f32 %v1460_v59, %v2949_v9  ;;  %v3022_v53 = vadd.f32 %v2341_v39, %v1184_v29  ;;  %v1560_v57 = vmax.f32 %v1458_v41, 0.0 }
 0x16f   : > { %v1563_v63 = vmax.f32 %v1469_v7, 0.0  ;;  %v1192_v9 = vadd.f32 %v2972_v2, %v2917_v38  ;;  %v1203_v7 = vadd.f32 %v2900_v62, %v2917_v38  ;;  %v1208_v62 = vadd.f32 %v2902_v4, %v2917_v38 }
 0x170   : > { %v1561_v3 = vmax.f32 %v1461_v51, 0.0  ;;  %v3024_v58 = vadd.f32 %v2344_v32, %v1187_v49 }
 0x171   : > { %v2084_v52 = vpack.c.bf16 %v1563_v63, %v1562_v43 }
 0x172   : > { %v2079_v33 = vpack.c.bf16 %v1561_v3, %v1560_v57  ;;  %v2345_v60 = vpop.f32.mrb[60].mxu1  ;;  %v2417_v19 = vpop.f32.mrb[60].mxu0 }
 0x173   : > { %2140 = vst [vmem:[%s2994_s30 + $0x28] sm:$0xff] %v2084_v52   ;;  %v1482_v0 = vadd.f32 %v2417_v19, %v2977_v15  ;;  %v2346_v54 = vpop.f32.mrb[61].mxu1  ;;  %v1473_v1 = vpop.f32.mrb[61].mxu0 }
 0x174   : > { %2139 = vst [vmem:[%s2994_s30 + $0x20] sm:$0xff] %v2079_v33   ;;  %v2347_v35 = vadd.f32 %v2346_v54, %v2345_v60  ;;  %v1474_v12 = vadd.f32 %v1473_v1, %v2967_v55  ;;  %v2348_v13 = vpop.f32.mrb[62].mxu1  ;;  %v2418_v26 = vpop.f32.mrb[62].mxu0 }
 0x175   : > { %v1485_v14 = vadd.f32 %v2418_v26, %v2979_v17  ;;  %v2349_v6 = vpop.f32.mrb[63].mxu1  ;;  %v1476_v21 = vpop.f32.mrb[63].mxu0  ;;  %v1566_v2 = vmax.f32 %v1482_v0, 0.0 }
 0x176   : > { %v2350_v15 = vadd.f32 %v2349_v6, %v2348_v13  ;;  %v1477_v24 = vadd.f32 %v1476_v21, %v2969_v30  ;;  %v1353_v20 = vadd.f32 %v2347_v35, %v1192_v9  ;;  %v1564_v11 = vmax.f32 %v1474_v12, 0.0 }
 0x177   : > { %v1567_v50 = vmax.f32 %v1485_v14, 0.0  ;;  %v1211_v35 = vadd.f32 %v2904_v10, %v2917_v38  ;;  %v1216_v10 = vadd.f32 %v2906_v16, %v2917_v38 }
 0x178   : > { %v1565_v27 = vmax.f32 %v1477_v24, 0.0  ;;  %v1356_v55 = vadd.f32 %v2350_v15, %v1195_v47 }
 0x179   : > { %v2094_v36 = vpack.c.bf16 %v1567_v50, %v1566_v2 }
 0x17a   : > { %v2089_v48 = vpack.c.bf16 %v1565_v27, %v1564_v11  ;;  %v2351_v18 = vpop.f32.mrb[64].mxu1  ;;  %v2421_v17 = vpop.f32.mrb[64].mxu0 }
 0x17b   : > { %2142 = vst [vmem:[%s2994_s30 + $0x38] sm:$0xff] %v2094_v36   ;;  %v1498_v37 = vadd.f32 %v2421_v17, %v3008_v40  ;;  %v2352_v46 = vpop.f32.mrb[65].mxu1  ;;  %v1489_v31 = vpop.f32.mrb[65].mxu0 }
 0x17c   : > { %2141 = vst [vmem:[%s2994_s30 + $0x30] sm:$0xff] %v2089_v48   ;;  %v2353_v30 = vadd.f32 %v2352_v46, %v2351_v18  ;;  %v1490_v61 = vadd.f32 %v1489_v31, %v2989_v45  ;;  %v2354_v29 = vpop.f32.mrb[66].mxu1  ;;  %v2422_v39 = vpop.f32.mrb[66].mxu0 }
 0x17d   : > { %v1501_v41 = vadd.f32 %v2422_v39, %v3010_v25  ;;  %v2355_v42 = vpop.f32.mrb[67].mxu1  ;;  %v1492_v23 = vpop.f32.mrb[67].mxu0  ;;  %v1570_v56 = vmax.f32 %v1498_v37, 0.0  ;;  %v1219_v37 = vadd.f32 %v2908_v22, %v2917_v38 }
 0x17e   : > { %v2356_v40 = vadd.f32 %v2355_v42, %v2354_v29  ;;  %v1493_v5 = vadd.f32 %v1492_v23, %v2996_v8  ;;  %v1361_v59 = vadd.f32 %v2353_v30, %v1200_v44  ;;  %v1568_v32 = vmax.f32 %v1490_v61, 0.0 }
 0x17f   : > { %v1571_v49 = vmax.f32 %v1501_v41, 0.0 }
 0x180   : > { %v1569_v51 = vmax.f32 %v1493_v5, 0.0  ;;  %v1364_v45 = vadd.f32 %v2356_v40, %v1203_v7 }
 0x181   : > { %v2104_v43 = vpack.c.bf16 %v1571_v49, %v1570_v56 }
 0x182   : > { %v2099_v63 = vpack.c.bf16 %v1569_v51, %v1568_v32  ;;  %v2357_v57 = vpop.f32.mrb[68].mxu1  ;;  %v2425_v25 = vpop.f32.mrb[68].mxu0 }
 0x183   : > { %2144 = vst [vmem:[%s2994_s30 + $0x48] sm:$0xff] %v2104_v43   ;;  %v1514_v3 = vadd.f32 %v2425_v25, %v1353_v20  ;;  %v2358_v52 = vpop.f32.mrb[69].mxu1  ;;  %v1505_v33 = vpop.f32.mrb[69].mxu0  ;;  %v1227_v43 = vadd.f32 %v2912_v34, %v2917_v38 }
 0x184   : > { %2143 = vst [vmem:[%s2994_s30 + $0x40] sm:$0xff] %v2099_v63   ;;  %v2359_v8 = vadd.f32 %v2358_v52, %v2357_v57  ;;  %v1506_v60 = vadd.f32 %v1505_v33, %v3022_v53  ;;  %v2360_v19 = vpop.f32.mrb[70].mxu1  ;;  %v2426_v0 = vpop.f32.mrb[70].mxu0 }
 0x185   : > { %v1517_v54 = vadd.f32 %v2426_v0, %v1356_v55  ;;  %v2361_v1 = vpop.f32.mrb[71].mxu1  ;;  %v1508_v9 = vpop.f32.mrb[71].mxu0  ;;  %v1574_v14 = vmax.f32 %v1514_v3, 0.0 }
 0x186   : > { %v2362_v12 = vadd.f32 %v2361_v1, %v2360_v19  ;;  %v1509_v13 = vadd.f32 %v1508_v9, %v3024_v58  ;;  %v1369_v26 = vadd.f32 %v2359_v8, %v1208_v62  ;;  %v1572_v6 = vmax.f32 %v1506_v60, 0.0 }
 0x187   : > { %v1575_v4 = vmax.f32 %v1517_v54, 0.0 }
 0x188   : > { %v1573_v21 = vmax.f32 %v1509_v13, 0.0  ;;  %v1372_v47 = vadd.f32 %v2362_v12, %v1211_v35 }
 0x189   : > { %v2114_v53 = vpack.c.bf16 %v1575_v4, %v1574_v14 }
 0x18a   : > { %v2109_v15 = vpack.c.bf16 %v1573_v21, %v1572_v6  ;;  %v2363_v24 = vpop.f32.mrb[72].mxu1  ;;  %v2429_v20 = vpop.f32.mrb[72].mxu0 }
 0x18b   : > { %2146 = vst [vmem:[%s2994_s30 + $0x58] sm:$0xff] %v2114_v53   ;;  %v1530_v2 = vadd.f32 %v2429_v20, %v1369_v26  ;;  %v2364_v50 = vpop.f32.mrb[73].mxu1  ;;  %v1521_v11 = vpop.f32.mrb[73].mxu0 }
 0x18c   : > { %2145 = vst [vmem:[%s2994_s30 + $0x50] sm:$0xff] %v2109_v15   ;;  %v2365_v58 = vadd.f32 %v2364_v50, %v2363_v24  ;;  %v1522_v27 = vadd.f32 %v1521_v11, %v1361_v59  ;;  %v2366_v55 = vpop.f32.mrb[74].mxu1  ;;  %v2430_v36 = vpop.f32.mrb[74].mxu0  ;;  %v1224_v59 = vadd.f32 %v2910_v28, %v2917_v38 }
 0x18d   : > { %v1533_v48 = vadd.f32 %v2430_v36, %v1372_v47  ;;  %v2367_v18 = vpop.f32.mrb[75].mxu1  ;;  %v1524_v17 = vpop.f32.mrb[75].mxu0  ;;  %v1578_v30 = vmax.f32 %v1530_v2, 0.0 }
 0x18e   : > { %v2368_v46 = vadd.f32 %v2367_v18, %v2366_v55  ;;  %v1525_v31 = vadd.f32 %v1524_v17, %v1364_v45  ;;  %v1377_v44 = vadd.f32 %v2365_v58, %v1216_v10  ;;  %v1576_v29 = vmax.f32 %v1522_v27, 0.0 }
 0x18f   : > { %v1579_v61 = vmax.f32 %v1533_v48, 0.0 }
 0x190   : > { %v1577_v16 = vmax.f32 %v1525_v31, 0.0  ;;  %v1380_v39 = vadd.f32 %v2368_v46, %v1219_v37 }
 0x191   : > { %v2124_v41 = vpack.c.bf16 %v1579_v61, %v1578_v30 }
 0x192   : > { %v2119_v42 = vpack.c.bf16 %v1577_v16, %v1576_v29  ;;  %v2369_v23 = vpop.f32.mrb[76].mxu1  ;;  %v2433_v7 = vpop.f32.mrb[76].mxu0 }
 0x193   : > { %2148 = vst [vmem:[%s2994_s30 + $0x68] sm:$0xff] %v2124_v41   ;;  %v2370_v40 = vpop.f32.mrb[77].mxu1  ;;  %v1537_v5 = vpop.f32.mrb[77].mxu0 }
 0x194   : > { %2147 = vst [vmem:[%s2994_s30 + $0x60] sm:$0xff] %v2119_v42   ;;  %v2371_v22 = vadd.f32 %v2370_v40, %v2369_v23  ;;  %v1538_v56 = vadd.f32 %v1537_v5, %v1377_v44  ;;  %v2372_v49 = vpop.f32.mrb[78].mxu1  ;;  %v2434_v32 = vpop.f32.mrb[78].mxu0 }
 0x195   : > { %v2373_v51 = vpop.f32.mrb[79].mxu1  ;;  %v1540_v45 = vpop.f32.mrb[79].mxu0 }
 0x196   : > { %v1385_v63 = vadd.f32 %v2371_v22, %v1224_v59  ;;  %v2374_v57 = vadd.f32 %v2373_v51, %v2372_v49  ;;  %v1541_v25 = vadd.f32 %v1540_v45, %v1380_v39  ;;  %v1580_v52 = vmax.f32 %v1538_v56, 0.0 }
 0x198   : > { %v1546_v3 = vadd.f32 %v2433_v7, %v1385_v63  ;;  %v1388_v33 = vadd.f32 %v2374_v57, %v1227_v43  ;;  %v1581_v62 = vmax.f32 %v1541_v25, 0.0 }
 0x19a   : > { %v1549_v28 = vadd.f32 %v2434_v32, %v1388_v33  ;;  %v2129_v8 = vpack.c.bf16 %v1581_v62, %v1580_v52  ;;  %v1582_v60 = vmax.f32 %v1546_v3, 0.0 }
 0x19c   : > { %v1583_v19 = vmax.f32 %v1549_v28, 0.0  ;;  %2149 = vst [vmem:[%s2994_s30 + $0x70] sm:$0xff] %v2129_v8  }
 0x19e   : > { %v2134_v0 = vpack.c.bf16 %v1583_v19, %v1582_v60 }
 0x1a0   : > { %2150 = vst [vmem:[%s2994_s30 + $0x78] sm:$0xff] %v2134_v0  }
 0x1a1 PF: > { %s13_s14 = sadd.s32 1, %s2646_s14   ;;  %s3081_s12 = smov %s2642_s13 }
 0x1a2   : > { %p10_p5 = scmp.ge.s32.totalorder %s13_s14, 5   ;;  %s3082_s13 = smov %s3084_s15 }
 0x1a4   :  { %12 = sbr.rel (!%p10_p5) target bundleno = 2 (0x2), region = 68 }

// kernel: model_forward.8
= control target key start
LH: loop header
LB: loop body
LE: loop exit
PB: predicated region body
PF: predicated region fallthrough
CT: control target
= control target key end

     0   :  { %s1926_s12 = smov 0   ;;  %s1928_s13 = smov 0   ;;  %s2313_s0 = inlined_call_operand.vmem [shape: bf16[128,512], index: 0, kind: input, shape index: {}]   ;;  %s2314_s1 = inlined_call_operand.vmem [shape: bf16[512,256], index: 1, kind: input, shape index: {}]   ;;  %s2315_s2 = inlined_call_operand.vmem [shape: f32[1,256], index: 2, kind: input, shape index: {}]   ;;  %s2316_s3 = inlined_call_operand.vmem [shape: bf16[128,256], index: 3, kind: output, shape index: {}]  }
   0x1   :  { %s1930_s14 = smov 0   ;;  %s1932_s15 = smov 0  }
   0x2   :  { %s1934_s16 = smov 0  }
   0x3 LB: > { %s22_s17 = sadd.s32 1, %s1900_s15  ;;  %s1460_s18 = sadd.s32 4294967295, %s1904_s16   ;;  %s1904_s16 = sphi %s1934_s16, %s13_s16   ;;  %s1900_s15 = sphi %s1932_s15, %s2321_s15   ;;  %s1896_s14 = sphi %s1930_s14, %s2320_s14   ;;  %s1892_s13 = sphi %s1928_s13, %s2319_s13   ;;  %s1888_s12 = sphi %s1926_s12, %s2318_s12  }
   0x4   : > { %p23_p0 = scmp.ge.s32.totalorder %s22_s17, 2  ;;  %p65_p1 = scmp.ne.s32.totalorder %s1892_s13, %s1888_s12 }
   0x5   : > { %p66_p2 = scmp.eq.s32.totalorder %s1904_s16, 0  ;;  %p123_p4 = scmp.eq.s32.totalorder %s1460_s18, 1 }
   0x6   : > { %s2323_s17 = smov (%p23_p0, %s22_s17), 0  ;;  %s58_s20 = sadd.s32 1, %s1892_s13 }
   0x7   : > { %p67_p3 = por %p66_p2, %p65_p1  ;;  %s55_s19 = ssub.s32 %s1900_s15, %s2323_s17 }
   0x8   : > { %p56_p5 = scmp.eq.s32.totalorder %s55_s19, 0  ;;  %p1961_p6 = por %p123_p4, %p65_p1 }
   0x9   : > { %p1464_p7 = scmp.ge.s32.totalorder %s1904_s16, 2 }
   0xa   : > { %s1966_s22 = scalar_select %p56_p5, %s1892_s13, %s58_s20  }
   0xb   : > { %155 = sbr.rel (%p1464_p7) target bundleno = 64 (0x40), region = 20 }
  0x12   : > { %158 = sbr.rel (!%p67_p3) target bundleno = 64 (0x40), region = 24  ;;  %s160_s23 = sand.u32 (%p67_p3), 1, %s1892_s13  }
  0x13   : > { %s1466_s24 = sshll.u32 (%p67_p3), %s1900_s15, 2  ;;  %s1465_s25 = sshll.u32 (%p67_p3), %s160_s23, 8 }
  0x14   : > { %s1974_s28 = scalar_lea.vmem (%p67_p3), %s2314_s1, %s1466_s24  ;;  %s1978_s29 = scalar_lea.vmem (%p67_p3), [#allocation2], %s1465_s25 }
  0x15   : > { %v180_v0 = vld [vmem:[%s1974_s28] sm:$0xf] (%p67_p3)  ;;  %v182_v1 = vld [vmem:[%s1974_s28 + $0x8] sm:$0xf] (%p67_p3)  ;;  %v184_v2 = vld [vmem:[%s1974_s28 + $0x10] sm:$0xf] (%p67_p3) }
  0x16   : > { %181 = vst [vmem:[%s1978_s29] sm:$0xf] (%p67_p3), %v180_v0  ;;  %183 = vst [vmem:[%s1978_s29 + $0x4] sm:$0xf] (%p67_p3), %v182_v1  ;;  %v186_v3 = vld [vmem:[%s1974_s28 + $0x18] sm:$0xf] (%p67_p3) }
  0x17   : > { %v188_v4 = vld [vmem:[%s1974_s28 + $0x20] sm:$0xf] (%p67_p3)  ;;  %185 = vst [vmem:[%s1978_s29 + $0x8] sm:$0xf] (%p67_p3), %v184_v2  ;;  %187 = vst [vmem:[%s1978_s29 + $0xc] sm:$0xf] (%p67_p3), %v186_v3 }
  0x18   : > { %189 = vst [vmem:[%s1978_s29 + $0x10] sm:$0xf] (%p67_p3), %v188_v4  ;;  %v190_v5 = vld [vmem:[%s1974_s28 + $0x28] sm:$0xf] (%p67_p3)  ;;  %v192_v6 = vld [vmem:[%s1974_s28 + $0x30] sm:$0xf] (%p67_p3) }
  0x19   : > { %v194_v7 = vld [vmem:[%s1974_s28 + $0x38] sm:$0xf]  ;;  %191 = vst [vmem:[%s1978_s29 + $0x14] sm:$0xf] %v190_v5  ;;  %193 = vst [vmem:[%s1978_s29 + $0x18] sm:$0xf] %v192_v6 }
  0x1a   : > { %195 = vst [vmem:[%s1978_s29 + $0x1c] sm:$0xf] %v194_v7  ;;  %v196_v8 = vld [vmem:[%s1974_s28 + $0x40] sm:$0xf]  ;;  %v198_v9 = vld [vmem:[%s1974_s28 + $0x48] sm:$0xf] }
  0x1b   : > { %v200_v10 = vld [vmem:[%s1974_s28 + $0x50] sm:$0xf]  ;;  %197 = vst [vmem:[%s1978_s29 + $0x20] sm:$0xf] %v196_v8  ;;  %199 = vst [vmem:[%s1978_s29 + $0x24] sm:$0xf] %v198_v9 }
  0x1c   : > { %201 = vst [vmem:[%s1978_s29 + $0x28] sm:$0xf] %v200_v10  ;;  %v202_v11 = vld [vmem:[%s1974_s28 + $0x58] sm:$0xf]  ;;  %v204_v12 = vld [vmem:[%s1974_s28 + $0x60] sm:$0xf] }
  0x1d   : > { %v206_v13 = vld [vmem:[%s1974_s28 + $0x68] sm:$0xf]  ;;  %203 = vst [vmem:[%s1978_s29 + $0x2c] sm:$0xf] %v202_v11  ;;  %205 = vst [vmem:[%s1978_s29 + $0x30] sm:$0xf] %v204_v12 }
  0x1e   : > { %207 = vst [vmem:[%s1978_s29 + $0x34] sm:$0xf] %v206_v13  ;;  %v208_v14 = vld [vmem:[%s1974_s28 + $0x70] sm:$0xf]  ;;  %v210_v15 = vld [vmem:[%s1974_s28 + $0x78] sm:$0xf] }
  0x1f   : > { %v212_v16 = vld [vmem:[%s1974_s28 + $0x80] sm:$0xf]  ;;  %209 = vst [vmem:[%s1978_s29 + $0x38] sm:$0xf] %v208_v14  ;;  %211 = vst [vmem:[%s1978_s29 + $0x3c] sm:$0xf] %v210_v15 }
  0x20   : > { %213 = vst [vmem:[%s1978_s29 + $0x40] sm:$0xf] %v212_v16  ;;  %v214_v17 = vld [vmem:[%s1974_s28 + $0x88] sm:$0xf]  ;;  %v216_v18 = vld [vmem:[%s1974_s28 + $0x90] sm:$0xf] }
  0x21   : > { %v218_v19 = vld [vmem:[%s1974_s28 + $0x98] sm:$0xf]  ;;  %215 = vst [vmem:[%s1978_s29 + $0x44] sm:$0xf] %v214_v17  ;;  %217 = vst [vmem:[%s1978_s29 + $0x48] sm:$0xf] %v216_v18 }
  0x22   : > { %219 = vst [vmem:[%s1978_s29 + $0x4c] sm:$0xf] %v218_v19  ;;  %v220_v20 = vld [vmem:[%s1974_s28 + $0xa0] sm:$0xf]  ;;  %v222_v21 = vld [vmem:[%s1974_s28 + $0xa8] sm:$0xf] }
  0x23   : > { %v224_v22 = vld [vmem:[%s1974_s28 + $0xb0] sm:$0xf]  ;;  %221 = vst [vmem:[%s1978_s29 + $0x50] sm:$0xf] %v220_v20  ;;  %223 = vst [vmem:[%s1978_s29 + $0x54] sm:$0xf] %v222_v21 }
  0x24   : > { %225 = vst [vmem:[%s1978_s29 + $0x58] sm:$0xf] %v224_v22  ;;  %v226_v23 = vld [vmem:[%s1974_s28 + $0xb8] sm:$0xf]  ;;  %v228_v24 = vld [vmem:[%s1974_s28 + $0xc0] sm:$0xf] }
  0x25   : > { %v230_v25 = vld [vmem:[%s1974_s28 + $0xc8] sm:$0xf]  ;;  %227 = vst [vmem:[%s1978_s29 + $0x5c] sm:$0xf] %v226_v23  ;;  %229 = vst [vmem:[%s1978_s29 + $0x60] sm:$0xf] %v228_v24 }
  0x26   : > { %231 = vst [vmem:[%s1978_s29 + $0x64] sm:$0xf] %v230_v25  ;;  %v232_v26 = vld [vmem:[%s1974_s28 + $0xd0] sm:$0xf]  ;;  %v234_v27 = vld [vmem:[%s1974_s28 + $0xd8] sm:$0xf] }
  0x27   : > { %v236_v28 = vld [vmem:[%s1974_s28 + $0xe0] sm:$0xf]  ;;  %233 = vst [vmem:[%s1978_s29 + $0x68] sm:$0xf] %v232_v26  ;;  %235 = vst [vmem:[%s1978_s29 + $0x6c] sm:$0xf] %v234_v27 }
  0x28   : > { %237 = vst [vmem:[%s1978_s29 + $0x70] sm:$0xf] %v236_v28  ;;  %v238_v29 = vld [vmem:[%s1974_s28 + $0xe8] sm:$0xf]  ;;  %v240_v30 = vld [vmem:[%s1974_s28 + $0xf0] sm:$0xf] }
  0x29   : > { %v242_v31 = vld [vmem:[%s1974_s28 + $0xf8] sm:$0xf]  ;;  %239 = vst [vmem:[%s1978_s29 + $0x74] sm:$0xf] %v238_v29  ;;  %241 = vst [vmem:[%s1978_s29 + $0x78] sm:$0xf] %v240_v30 }
  0x2a   : > { %243 = vst [vmem:[%s1978_s29 + $0x7c] sm:$0xf] %v242_v31  ;;  %v244_v32 = vld [vmem:[%s1974_s28 + $0x100] sm:$0xf]  ;;  %v246_v33 = vld [vmem:[%s1974_s28 + $0x108] sm:$0xf] }
  0x2b   : > { %v248_v34 = vld [vmem:[%s1974_s28 + $0x110] sm:$0xf]  ;;  %245 = vst [vmem:[%s1978_s29 + $0x80] sm:$0xf] %v244_v32  ;;  %247 = vst [vmem:[%s1978_s29 + $0x84] sm:$0xf] %v246_v33 }
  0x2c   : > { %249 = vst [vmem:[%s1978_s29 + $0x88] sm:$0xf] %v248_v34  ;;  %v250_v35 = vld [vmem:[%s1974_s28 + $0x118] sm:$0xf]  ;;  %v252_v36 = vld [vmem:[%s1974_s28 + $0x120] sm:$0xf] }
  0x2d   : > { %v254_v37 = vld [vmem:[%s1974_s28 + $0x128] sm:$0xf]  ;;  %251 = vst [vmem:[%s1978_s29 + $0x8c] sm:$0xf] %v250_v35  ;;  %253 = vst [vmem:[%s1978_s29 + $0x90] sm:$0xf] %v252_v36 }
  0x2e   : > { %255 = vst [vmem:[%s1978_s29 + $0x94] sm:$0xf] %v254_v37  ;;  %v256_v38 = vld [vmem:[%s1974_s28 + $0x130] sm:$0xf]  ;;  %v258_v39 = vld [vmem:[%s1974_s28 + $0x138] sm:$0xf] }
  0x2f   : > { %v260_v40 = vld [vmem:[%s1974_s28 + $0x140] sm:$0xf]  ;;  %257 = vst [vmem:[%s1978_s29 + $0x98] sm:$0xf] %v256_v38  ;;  %259 = vst [vmem:[%s1978_s29 + $0x9c] sm:$0xf] %v258_v39 }
  0x30   : > { %261 = vst [vmem:[%s1978_s29 + $0xa0] sm:$0xf] %v260_v40  ;;  %v262_v41 = vld [vmem:[%s1974_s28 + $0x148] sm:$0xf]  ;;  %v264_v42 = vld [vmem:[%s1974_s28 + $0x150] sm:$0xf] }
  0x31   : > { %v266_v43 = vld [vmem:[%s1974_s28 + $0x158] sm:$0xf]  ;;  %263 = vst [vmem:[%s1978_s29 + $0xa4] sm:$0xf] %v262_v41  ;;  %265 = vst [vmem:[%s1978_s29 + $0xa8] sm:$0xf] %v264_v42 }
  0x32   : > { %267 = vst [vmem:[%s1978_s29 + $0xac] sm:$0xf] %v266_v43  ;;  %v268_v44 = vld [vmem:[%s1974_s28 + $0x160] sm:$0xf]  ;;  %v270_v45 = vld [vmem:[%s1974_s28 + $0x168] sm:$0xf] }
  0x33   : > { %v272_v46 = vld [vmem:[%s1974_s28 + $0x170] sm:$0xf]  ;;  %269 = vst [vmem:[%s1978_s29 + $0xb0] sm:$0xf] %v268_v44  ;;  %271 = vst [vmem:[%s1978_s29 + $0xb4] sm:$0xf] %v270_v45 }
  0x34   : > { %273 = vst [vmem:[%s1978_s29 + $0xb8] sm:$0xf] %v272_v46  ;;  %v274_v47 = vld [vmem:[%s1974_s28 + $0x178] sm:$0xf]  ;;  %v276_v48 = vld [vmem:[%s1974_s28 + $0x180] sm:$0xf] }
  0x35   : > { %v278_v49 = vld [vmem:[%s1974_s28 + $0x188] sm:$0xf]  ;;  %275 = vst [vmem:[%s1978_s29 + $0xbc] sm:$0xf] %v274_v47  ;;  %277 = vst [vmem:[%s1978_s29 + $0xc0] sm:$0xf] %v276_v48 }
  0x36   : > { %279 = vst [vmem:[%s1978_s29 + $0xc4] sm:$0xf] %v278_v49  ;;  %v280_v50 = vld [vmem:[%s1974_s28 + $0x190] sm:$0xf]  ;;  %v282_v51 = vld [vmem:[%s1974_s28 + $0x198] sm:$0xf] }
  0x37   : > { %v284_v52 = vld [vmem:[%s1974_s28 + $0x1a0] sm:$0xf]  ;;  %281 = vst [vmem:[%s1978_s29 + $0xc8] sm:$0xf] %v280_v50  ;;  %283 = vst [vmem:[%s1978_s29 + $0xcc] sm:$0xf] %v282_v51 }
  0x38   : > { %285 = vst [vmem:[%s1978_s29 + $0xd0] sm:$0xf] %v284_v52  ;;  %v286_v53 = vld [vmem:[%s1974_s28 + $0x1a8] sm:$0xf]  ;;  %v288_v54 = vld [vmem:[%s1974_s28 + $0x1b0] sm:$0xf] }
  0x39   : > { %v290_v55 = vld [vmem:[%s1974_s28 + $0x1b8] sm:$0xf]  ;;  %287 = vst [vmem:[%s1978_s29 + $0xd4] sm:$0xf] %v286_v53  ;;  %289 = vst [vmem:[%s1978_s29 + $0xd8] sm:$0xf] %v288_v54 }
  0x3a   : > { %291 = vst [vmem:[%s1978_s29 + $0xdc] sm:$0xf] %v290_v55  ;;  %v292_v56 = vld [vmem:[%s1974_s28 + $0x1c0] sm:$0xf]  ;;  %v294_v57 = vld [vmem:[%s1974_s28 + $0x1c8] sm:$0xf] }
  0x3b   : > { %v296_v58 = vld [vmem:[%s1974_s28 + $0x1d0] sm:$0xf]  ;;  %293 = vst [vmem:[%s1978_s29 + $0xe0] sm:$0xf] %v292_v56  ;;  %295 = vst [vmem:[%s1978_s29 + $0xe4] sm:$0xf] %v294_v57 }
  0x3c   : > { %297 = vst [vmem:[%s1978_s29 + $0xe8] sm:$0xf] %v296_v58  ;;  %v298_v59 = vld [vmem:[%s1974_s28 + $0x1d8] sm:$0xf]  ;;  %v300_v60 = vld [vmem:[%s1974_s28 + $0x1e0] sm:$0xf] }
  0x3d   : > { %v302_v61 = vld [vmem:[%s1974_s28 + $0x1e8] sm:$0xf]  ;;  %299 = vst [vmem:[%s1978_s29 + $0xec] sm:$0xf] %v298_v59  ;;  %301 = vst [vmem:[%s1978_s29 + $0xf0] sm:$0xf] %v300_v60 }
  0x3e   : > { %303 = vst [vmem:[%s1978_s29 + $0xf4] sm:$0xf] %v302_v61  ;;  %v304_v62 = vld [vmem:[%s1974_s28 + $0x1f0] sm:$0xf]  ;;  %v306_v63 = vld [vmem:[%s1974_s28 + $0x1f8] sm:$0xf] }
  0x3f   : > { %305 = vst [vmem:[%s1978_s29 + $0xf8] sm:$0xf] %v304_v62  ;;  %307 = vst [vmem:[%s1978_s29 + $0xfc] sm:$0xf] %v306_v63 }
  0x40 PF: > { %p1467_p8 = scmp.ge.s32.totalorder %s1904_s16, 1  ;;  %p463_p9 = scmp.lt.s32.totalorder %s1904_s16, 3 }
  0x42   : > { %p464_p10 = pnand %p1467_p8, %p463_p9 }
  0x43   : > { %s470_s30 = sand.u32 (!%p464_p10), 1, %s1888_s12   ;;  %v1820_v0 = vld [vmem:[%s2313_s0 + $0x4] ss:$16 sps:$4 sm:$0xff] (!%p464_p10)   ;;  %v1823_v1 = vld [vmem:[%s2313_s0 + $0xc] ss:$16 sps:$4 sm:$0xff] (!%p464_p10)   ;;  %p508_p11 = scmp.lt.s32.totalorder (!%p464_p10), %s1896_s14, 1 }
  0x44   : > { %467 = sbr.rel (%p464_p10) target bundleno = 394 (0x18a), region = 69  ;;  %s1468_s4 = sshll.u32 (!%p464_p10), %s470_s30, 8  ;;  %1000 = vmatprep.mubr.bf16.mxu0 (!%p464_p10), %v1820_v0  ;;  %1097 = vmatprep.mubr.bf16.mxu1 (!%p464_p10), %v1823_v1  ;;  %v1818_v32 = vld [vmem:[%s2313_s0] ss:$16 sps:$4 sm:$0xff] (!%p464_p10)   ;;  %v1821_v34 = vld [vmem:[%s2313_s0 + $0x8] ss:$16 sps:$4 sm:$0xff] (!%p464_p10)  }
  0x45   : > { %s2117_s9 = scalar_lea.vmem (!%p464_p10), [#allocation2], %s1468_s4  ;;  %v1824_v36 = vld [vmem:[%s2313_s0 + $0x24] ss:$16 sps:$4 sm:$0xff] (!%p464_p10)   ;;  %v1826_v37 = vld [vmem:[%s2313_s0 + $0x2c] ss:$16 sps:$4 sm:$0xff] (!%p464_p10)   ;;  %s1469_s28 = sshll.u32 (!%p464_p10), %s470_s30, 6 }
  0x46   : > { %v1786_v2 = vld [vmem:[%s2117_s9 + $0x40] sm:$0xff] (!%p464_p10)   ;;  %v1790_v6 = vld [vmem:[%s2117_s9 + $0x48] sm:$0xff] (!%p464_p10)   ;;  %v1794_v10 = vld [vmem:[%s2117_s9 + $0x50] sm:$0xff] (!%p464_p10)   ;;  %s2253_s12 = scalar_lea.vmem (!%p464_p10), [#allocation3], %s1469_s28 }
  0x47   : > { %v1787_v3 = vld [vmem:[%s2117_s9 + $0xc0] sm:$0xff] (!%p464_p10)   ;;  %1618 = vmatprep.subr.bf16.mxu0 (!%p464_p10), %v1786_v2  ;;  %v1791_v7 = vld [vmem:[%s2117_s9 + $0xc8] sm:$0xff] (!%p464_p10)   ;;  %v1795_v11 = vld [vmem:[%s2117_s9 + $0xd0] sm:$0xff] (!%p464_p10)  }
  0x48   : > { %v1788_v4 = vld [vmem:[%s2117_s9] sm:$0xff] (!%p464_p10)   ;;  %1682 = vmatprep.subr.bf16.mxu1 (!%p464_p10), %v1787_v3  ;;  %v1792_v8 = vld [vmem:[%s2117_s9 + $0x8] sm:$0xff] (!%p464_p10)   ;;  %v1796_v12 = vld [vmem:[%s2117_s9 + $0x10] sm:$0xff] (!%p464_p10)  }
  0x49   : > { %v1789_v5 = vld [vmem:[%s2117_s9 + $0x80] sm:$0xff] (!%p464_p10)   ;;  %1619 = vmatpush3.bf16.msra.mxu0 (!%p464_p10), %v1788_v4  ;;  %v1793_v9 = vld [vmem:[%s2117_s9 + $0x88] sm:$0xff] (!%p464_p10)   ;;  %v1797_v13 = vld [vmem:[%s2117_s9 + $0x90] sm:$0xff] (!%p464_p10)  }
  0x4a   : > { %1683 = vmatpush3.bf16.msra.mxu1 (!%p464_p10), %v1789_v5  ;;  %1620 = vmatprep.subr.bf16.mxu0 (!%p464_p10), %v1790_v6  ;;  %v1798_v14 = vld [vmem:[%s2117_s9 + $0x58] sm:$0xff] (!%p464_p10)   ;;  %v1802_v18 = vld [vmem:[%s2117_s9 + $0x60] sm:$0xff] (!%p464_p10)   ;;  %v1806_v22 = vld [vmem:[%s2117_s9 + $0x68] sm:$0xff] (!%p464_p10)  }
  0x4b   : > { %1684 = vmatprep.subr.bf16.mxu1 %v1791_v7  ;;  %v1799_v15 = vld [vmem:[%s2117_s9 + $0xd8] sm:$0xff]   ;;  %v1803_v19 = vld [vmem:[%s2117_s9 + $0xe0] sm:$0xff]   ;;  %v1807_v23 = vld [vmem:[%s2117_s9 + $0xe8] sm:$0xff]   ;;  %s509_s24 = scalar_select %p508_p11, %s1896_s14, 1 }
  0x4c   : > { %v1800_v16 = vld [vmem:[%s2117_s9 + $0x18] sm:$0xff]   ;;  %v1804_v20 = vld [vmem:[%s2117_s9 + $0x20] sm:$0xff]   ;;  %v1808_v24 = vld [vmem:[%s2117_s9 + $0x28] sm:$0xff]   ;;  %s1552_s30 = sshll.u32 (%p1961_p6), %s1896_s14, 2 }
  0x4d   : > { %1621 = vmatpush3.bf16.msra.mxu0 %v1792_v8  ;;  %v1801_v17 = vld [vmem:[%s2117_s9 + $0x98] sm:$0xff]   ;;  %v1805_v21 = vld [vmem:[%s2117_s9 + $0xa0] sm:$0xff]   ;;  %v1809_v25 = vld [vmem:[%s2117_s9 + $0xa8] sm:$0xff]   ;;  %s510_s27 = scalar_lea.vmem %s2315_s2, %s509_s24  ;;  %s1269_s5 = scalar_lea.vmem (%p1961_p6), %s2316_s3, %s1552_s30 }
  0x4e   : > { %1685 = vmatpush3.bf16.msra.mxu1 %v1793_v9  ;;  %1622 = vmatprep.subr.bf16.mxu0 %v1794_v10  ;;  %v1810_v26 = vld [vmem:[%s2117_s9 + $0x70] sm:$0xff]   ;;  %v1814_v30 = vld [vmem:[%s2117_s9 + $0x78] sm:$0xff]  }
  0x4f   : > { %1686 = vmatprep.subr.bf16.mxu1 %v1795_v11  ;;  %v1811_v27 = vld [vmem:[%s2117_s9 + $0xf0] sm:$0xff]   ;;  %v1815_v31 = vld [vmem:[%s2117_s9 + $0xf8] sm:$0xff]  }
  0x50   : > { %v1812_v28 = vld [vmem:[%s2117_s9 + $0x30] sm:$0xff]   ;;  %v1816_v33 = vld [vmem:[%s2117_s9 + $0x38] sm:$0xff]  }
  0x51   : > { %1623 = vmatpush3.bf16.msra.mxu0 %v1796_v12  ;;  %v1813_v29 = vld [vmem:[%s2117_s9 + $0xb0] sm:$0xff]   ;;  %v1817_v35 = vld [vmem:[%s2117_s9 + $0xb8] sm:$0xff]  }
  0x52   : > { %1687 = vmatpush3.bf16.msra.mxu1 %v1797_v13  ;;  %1624 = vmatprep.subr.bf16.mxu0 %v1798_v14  ;;  %v1828_v38 = vld [vmem:[%s2313_s0 + $0x20] ss:$16 sps:$4 sm:$0xff]   ;;  %v1829_v39 = vld [vmem:[%s2313_s0 + $0x28] ss:$16 sps:$4 sm:$0xff]   ;;  %v1830_v40 = vld [vmem:[%s2313_s0 + $0x44] ss:$16 sps:$4 sm:$0xff]  }
  0x53   : > { %1688 = vmatprep.subr.bf16.mxu1 %v1799_v15  ;;  %v1832_v41 = vld [vmem:[%s2313_s0 + $0x4c] ss:$16 sps:$4 sm:$0xff]   ;;  %v1834_v42 = vld [vmem:[%s2313_s0 + $0x40] ss:$16 sps:$4 sm:$0xff]   ;;  %v1835_v43 = vld [vmem:[%s2313_s0 + $0x48] ss:$16 sps:$4 sm:$0xff]  }
  0x54   : > { %v1836_v44 = vld [vmem:[%s2313_s0 + $0x64] ss:$16 sps:$4 sm:$0xff]   ;;  %v1838_v45 = vld [vmem:[%s2313_s0 + $0x6c] ss:$16 sps:$4 sm:$0xff]   ;;  %v1840_v46 = vld [vmem:[%s2313_s0 + $0x60] ss:$16 sps:$4 sm:$0xff]  }
  0x55   : > { %1625 = vmatpush3.bf16.msra.mxu0 %v1800_v16  ;;  %v1841_v47 = vld [vmem:[%s2313_s0 + $0x68] ss:$16 sps:$4 sm:$0xff]   ;;  %v1842_v48 = vld [vmem:[%s2313_s0 + $0x84] ss:$16 sps:$4 sm:$0xff]   ;;  %v1844_v49 = vld [vmem:[%s2313_s0 + $0x8c] ss:$16 sps:$4 sm:$0xff]  }
  0x56   : > { %1689 = vmatpush3.bf16.msra.mxu1 %v1801_v17  ;;  %1626 = vmatprep.subr.bf16.mxu0 %v1802_v18  ;;  %v1846_v50 = vld [vmem:[%s2313_s0 + $0x80] ss:$16 sps:$4 sm:$0xff]   ;;  %v1847_v51 = vld [vmem:[%s2313_s0 + $0x88] ss:$16 sps:$4 sm:$0xff]   ;;  %v1848_v52 = vld [vmem:[%s2313_s0 + $0xa4] ss:$16 sps:$4 sm:$0xff]  }
  0x57   : > { %1690 = vmatprep.subr.bf16.mxu1 %v1803_v19  ;;  %v1850_v53 = vld [vmem:[%s2313_s0 + $0xac] ss:$16 sps:$4 sm:$0xff]   ;;  %v1852_v54 = vld [vmem:[%s2313_s0 + $0xa0] ss:$16 sps:$4 sm:$0xff]   ;;  %v1853_v55 = vld [vmem:[%s2313_s0 + $0xa8] ss:$16 sps:$4 sm:$0xff]  }
  0x58   : > { %v1854_v56 = vld [vmem:[%s2313_s0 + $0xc4] ss:$16 sps:$4 sm:$0xff]   ;;  %v1856_v57 = vld [vmem:[%s2313_s0 + $0xcc] ss:$16 sps:$4 sm:$0xff]   ;;  %v1858_v58 = vld [vmem:[%s2313_s0 + $0xc0] ss:$16 sps:$4 sm:$0xff]  }
  0x59   : > { %1627 = vmatpush3.bf16.msra.mxu0 %v1804_v20  ;;  %v1859_v59 = vld [vmem:[%s2313_s0 + $0xc8] ss:$16 sps:$4 sm:$0xff]   ;;  %v1860_v60 = vld [vmem:[%s2313_s0 + $0xe4] ss:$16 sps:$4 sm:$0xff]   ;;  %v1862_v61 = vld [vmem:[%s2313_s0 + $0xec] ss:$16 sps:$4 sm:$0xff]  }
  0x5a   : > { %1691 = vmatpush3.bf16.msra.mxu1 %v1805_v21  ;;  %1628 = vmatprep.subr.bf16.mxu0 %v1806_v22  ;;  %v1864_v62 = vld [vmem:[%s2313_s0 + $0xe0] ss:$16 sps:$4 sm:$0xff]   ;;  %v1865_v63 = vld [vmem:[%s2313_s0 + $0xe8] ss:$16 sps:$4 sm:$0xff]  }
  0x5b   : > { %1692 = vmatprep.subr.bf16.mxu1 %v1807_v23  ;;  %v2246_v2 = vld [vmem:[%s510_s27] ss:$0 sm:$0xff] }
  0x5d   : > { %1629 = vmatpush3.bf16.msra.mxu0 %v1808_v24 }
  0x5e   : > { %1693 = vmatpush3.bf16.msra.mxu1 %v1809_v25  ;;  %1630 = vmatprep.subr.bf16.mxu0 %v1810_v26 }
  0x5f   : > { %1694 = vmatprep.subr.bf16.mxu1 %v1811_v27 }
  0x61   : > { %1631 = vmatpush3.bf16.msra.mxu0 %v1812_v28 }
  0x62   : > { %1695 = vmatpush3.bf16.msra.mxu1 %v1813_v29  ;;  %1632 = vmatprep.subr.bf16.mxu0 %v1814_v30 }
  0x63   : > { %1696 = vmatprep.subr.bf16.mxu1 %v1815_v31 }
  0x65   : > { %1633 = vmatpush3.bf16.msra.mxu0 %v1816_v33 }
  0x66   : > { %1697 = vmatpush3.bf16.msra.mxu1 %v1817_v35 }
  0x68   : > { %1001 = vmatmul.mubr.bf16.vlgmr.msra.gmra.mrb[0].mxu0 %v1818_v32 }
  0x69   : > { %1098 = vmatmul.mubr.bf16.vlgmr.msra.gmra.mrb[0].mxu1 %v1821_v34  ;;  %1008 = vmatprep.mubr.bf16.mxu0 %v1824_v36 }
  0x6a   : > { %1105 = vmatprep.mubr.bf16.mxu1 %v1826_v37 }
  0x70   : > { %1009 = vmatmul.mubr.bf16.gmra.mrb[4].mxu0 %v1828_v38 }
  0x71   : > { %1106 = vmatmul.mubr.bf16.gmra.mrb[4].mxu1 %v1829_v39  ;;  %1016 = vmatprep.mubr.bf16.mxu0 %v1830_v40 }
  0x72   : > { %1113 = vmatprep.mubr.bf16.mxu1 %v1832_v41 }
  0x78   : > { %1017 = vmatmul.mubr.bf16.gmra.mrb[8].mxu0 %v1834_v42 }
  0x79   : > { %1114 = vmatmul.mubr.bf16.gmra.mrb[8].mxu1 %v1835_v43  ;;  %1024 = vmatprep.mubr.bf16.mxu0 %v1836_v44 }
  0x7a   : > { %1121 = vmatprep.mubr.bf16.mxu1 %v1838_v45 }
  0x80   : > { %1025 = vmatmul.mubr.bf16.gmra.mrb[12].mxu0 %v1840_v46 }
  0x81   : > { %1122 = vmatmul.mubr.bf16.gmra.mrb[12].mxu1 %v1841_v47  ;;  %1032 = vmatprep.mubr.bf16.mxu0 %v1842_v48 }
  0x82   : > { %1129 = vmatprep.mubr.bf16.mxu1 %v1844_v49 }
  0x88   : > { %1033 = vmatmul.mubr.bf16.gmra.mrb[16].mxu0 %v1846_v50 }
  0x89   : > { %1130 = vmatmul.mubr.bf16.gmra.mrb[16].mxu1 %v1847_v51  ;;  %1040 = vmatprep.mubr.bf16.mxu0 %v1848_v52 }
  0x8a   : > { %1137 = vmatprep.mubr.bf16.mxu1 %v1850_v53 }
  0x90   : > { %1041 = vmatmul.mubr.bf16.gmra.mrb[20].mxu0 %v1852_v54 }
  0x91   : > { %1138 = vmatmul.mubr.bf16.gmra.mrb[20].mxu1 %v1853_v55  ;;  %1048 = vmatprep.mubr.bf16.mxu0 %v1854_v56 }
  0x92   : > { %1145 = vmatprep.mubr.bf16.mxu1 %v1856_v57 }
  0x98   : > { %1049 = vmatmul.mubr.bf16.gmra.mrb[24].mxu0 %v1858_v58 }
  0x99   : > { %1146 = vmatmul.mubr.bf16.gmra.mrb[24].mxu1 %v1859_v59  ;;  %1056 = vmatprep.mubr.bf16.mxu0 %v1860_v60 }
  0x9a   : > { %1153 = vmatprep.mubr.bf16.mxu1 %v1862_v61 }
  0xa0   : > { %1057 = vmatmul.mubr.bf16.gmra.mrb[28].mxu0 %v1864_v62 }
  0xa1   : > { %1154 = vmatmul.mubr.bf16.gmra.mrb[28].mxu1 %v1865_v63 }
 0x13b   : > { %v1634_v0 = vpop.f32.mrb[0].mxu0 }
 0x13c   : > { %v1698_v1 = vpop.f32.mrb[0].mxu1  ;;  %v1635_v3 = vpop.f32.mrb[1].mxu0 }
 0x13d   : > { %v1636_v4 = vadd.f32 %v1635_v3, %v1634_v0  ;;  %v1699_v5 = vpop.f32.mrb[1].mxu1  ;;  %v1637_v6 = vpop.f32.mrb[2].mxu0 }
 0x13e   : > { %v1700_v7 = vadd.f32 %v1699_v5, %v1698_v1  ;;  %v1701_v8 = vpop.f32.mrb[2].mxu1  ;;  %v1638_v9 = vpop.f32.mrb[3].mxu0 }
 0x13f   : > { %v1003_v10 = vadd.f32 %v1636_v4, %v2246_v2  ;;  %v1639_v11 = vadd.f32 %v1638_v9, %v1637_v6  ;;  %v1702_v12 = vpop.f32.mrb[3].mxu1 }
 0x140   : > { %v1703_v13 = vadd.f32 %v1702_v12, %v1701_v8 }
 0x141   : > { %v1100_v14 = vadd.f32 %v1700_v7, %v1003_v10  ;;  %v1006_v15 = vadd.f32 %v1639_v11, %v2246_v2 }
 0x143   : > { %v1103_v16 = vadd.f32 %v1703_v13, %v1006_v15  ;;  %v1640_v17 = vpop.f32.mrb[4].mxu0  ;;  %v1162_v20 = vmax.f32 %v1100_v14, 0.0 }
 0x144   : > { %v1704_v18 = vpop.f32.mrb[4].mxu1  ;;  %v1641_v19 = vpop.f32.mrb[5].mxu0 }
 0x145   : > { %v1163_v21 = vmax.f32 %v1103_v16, 0.0  ;;  %v1642_v22 = vadd.f32 %v1641_v19, %v1640_v17  ;;  %v1705_v23 = vpop.f32.mrb[5].mxu1  ;;  %v1643_v24 = vpop.f32.mrb[6].mxu0 }
 0x146   : > { %v1706_v25 = vadd.f32 %v1705_v23, %v1704_v18  ;;  %v1707_v26 = vpop.f32.mrb[6].mxu1  ;;  %v1644_v27 = vpop.f32.mrb[7].mxu0 }
 0x147   : > { %v1574_v28 = vpack.c.bf16 %v1163_v21, %v1162_v20  ;;  %v1011_v29 = vadd.f32 %v1642_v22, %v2246_v2  ;;  %v1645_v30 = vadd.f32 %v1644_v27, %v1643_v24  ;;  %v1708_v31 = vpop.f32.mrb[7].mxu1 }
 0x148   : > { %v1709_v32 = vadd.f32 %v1708_v31, %v1707_v26 }
 0x149   : > { %1575 = vst [vmem:[%s2253_s12] sm:$0xff] %v1574_v28   ;;  %v1108_v33 = vadd.f32 %v1706_v25, %v1011_v29  ;;  %v1014_v34 = vadd.f32 %v1645_v30, %v2246_v2 }
 0x14b   : > { %v1111_v35 = vadd.f32 %v1709_v32, %v1014_v34  ;;  %v1646_v36 = vpop.f32.mrb[8].mxu0  ;;  %v1164_v39 = vmax.f32 %v1108_v33, 0.0 }
 0x14c   : > { %v1710_v37 = vpop.f32.mrb[8].mxu1  ;;  %v1647_v38 = vpop.f32.mrb[9].mxu0 }
 0x14d   : > { %v1165_v40 = vmax.f32 %v1111_v35, 0.0  ;;  %v1648_v41 = vadd.f32 %v1647_v38, %v1646_v36  ;;  %v1711_v42 = vpop.f32.mrb[9].mxu1  ;;  %v1649_v43 = vpop.f32.mrb[10].mxu0 }
 0x14e   : > { %v1712_v44 = vadd.f32 %v1711_v42, %v1710_v37  ;;  %v1713_v45 = vpop.f32.mrb[10].mxu1  ;;  %v1650_v46 = vpop.f32.mrb[11].mxu0 }
 0x14f   : > { %v1579_v47 = vpack.c.bf16 %v1165_v40, %v1164_v39  ;;  %v1019_v48 = vadd.f32 %v1648_v41, %v2246_v2  ;;  %v1651_v49 = vadd.f32 %v1650_v46, %v1649_v43  ;;  %v1714_v50 = vpop.f32.mrb[11].mxu1 }
 0x150   : > { %v1715_v51 = vadd.f32 %v1714_v50, %v1713_v45 }
 0x151   : > { %1611 = vst [vmem:[%s2253_s12 + $0x8] sm:$0xff] %v1579_v47   ;;  %v1116_v52 = vadd.f32 %v1712_v44, %v1019_v48  ;;  %v1022_v53 = vadd.f32 %v1651_v49, %v2246_v2 }
 0x153   : > { %v1119_v54 = vadd.f32 %v1715_v51, %v1022_v53  ;;  %v1652_v55 = vpop.f32.mrb[12].mxu0  ;;  %v1166_v58 = vmax.f32 %v1116_v52, 0.0 }
 0x154   : > { %v1716_v56 = vpop.f32.mrb[12].mxu1  ;;  %v1653_v57 = vpop.f32.mrb[13].mxu0 }
 0x155   : > { %v1167_v59 = vmax.f32 %v1119_v54, 0.0  ;;  %v1654_v60 = vadd.f32 %v1653_v57, %v1652_v55  ;;  %v1717_v61 = vpop.f32.mrb[13].mxu1  ;;  %v1655_v62 = vpop.f32.mrb[14].mxu0 }
 0x156   : > { %v1718_v63 = vadd.f32 %v1717_v61, %v1716_v56  ;;  %v1719_v0 = vpop.f32.mrb[14].mxu1  ;;  %v1656_v1 = vpop.f32.mrb[15].mxu0 }
 0x157   : > { %v1584_v3 = vpack.c.bf16 %v1167_v59, %v1166_v58  ;;  %v1027_v4 = vadd.f32 %v1654_v60, %v2246_v2  ;;  %v1657_v5 = vadd.f32 %v1656_v1, %v1655_v62  ;;  %v1720_v6 = vpop.f32.mrb[15].mxu1 }
 0x158   : > { %v1721_v7 = vadd.f32 %v1720_v6, %v1719_v0 }
 0x159   : > { %1612 = vst [vmem:[%s2253_s12 + $0x10] sm:$0xff] %v1584_v3   ;;  %v1124_v8 = vadd.f32 %v1718_v63, %v1027_v4  ;;  %v1030_v9 = vadd.f32 %v1657_v5, %v2246_v2 }
 0x15b   : > { %v1127_v10 = vadd.f32 %v1721_v7, %v1030_v9  ;;  %v1658_v11 = vpop.f32.mrb[16].mxu0  ;;  %v1168_v14 = vmax.f32 %v1124_v8, 0.0 }
 0x15c   : > { %v1722_v12 = vpop.f32.mrb[16].mxu1  ;;  %v1659_v13 = vpop.f32.mrb[17].mxu0 }
 0x15d   : > { %v1169_v15 = vmax.f32 %v1127_v10, 0.0  ;;  %v1660_v16 = vadd.f32 %v1659_v13, %v1658_v11  ;;  %v1723_v17 = vpop.f32.mrb[17].mxu1  ;;  %v1661_v18 = vpop.f32.mrb[18].mxu0 }
 0x15e   : > { %v1724_v19 = vadd.f32 %v1723_v17, %v1722_v12  ;;  %v1725_v20 = vpop.f32.mrb[18].mxu1  ;;  %v1662_v21 = vpop.f32.mrb[19].mxu0 }
 0x15f   : > { %v1589_v22 = vpack.c.bf16 %v1169_v15, %v1168_v14  ;;  %v1035_v23 = vadd.f32 %v1660_v16, %v2246_v2  ;;  %v1663_v24 = vadd.f32 %v1662_v21, %v1661_v18  ;;  %v1726_v25 = vpop.f32.mrb[19].mxu1 }
 0x160   : > { %v1727_v26 = vadd.f32 %v1726_v25, %v1725_v20 }
 0x161   : > { %1613 = vst [vmem:[%s2253_s12 + $0x18] sm:$0xff] %v1589_v22   ;;  %v1132_v27 = vadd.f32 %v1724_v19, %v1035_v23  ;;  %v1038_v28 = vadd.f32 %v1663_v24, %v2246_v2 }
 0x163   : > { %v1135_v29 = vadd.f32 %v1727_v26, %v1038_v28  ;;  %v1664_v30 = vpop.f32.mrb[20].mxu0  ;;  %v1170_v33 = vmax.f32 %v1132_v27, 0.0  ;;  %v1285_v27 = vld [vmem:[%s2253_s12] sm:$0xf] (%p1961_p6)  ;;  %v1289_v28 = vld [vmem:[%s2253_s12 + $0x8] sm:$0xf] (%p1961_p6) }
 0x164   : > { %v1728_v31 = vpop.f32.mrb[20].mxu1  ;;  %v1665_v32 = vpop.f32.mrb[21].mxu0  ;;  %1286 = vst [vmem:[%s1269_s5] sm:$0xf] (%p1961_p6), %v1285_v27  ;;  %1290 = vst [vmem:[%s1269_s5 + $0x10] sm:$0xf] (%p1961_p6), %v1289_v28 }
 0x165   : > { %v1171_v34 = vmax.f32 %v1135_v29, 0.0  ;;  %v1666_v35 = vadd.f32 %v1665_v32, %v1664_v30  ;;  %v1729_v36 = vpop.f32.mrb[21].mxu1  ;;  %v1667_v37 = vpop.f32.mrb[22].mxu0  ;;  %v1291_v29 = vld [vmem:[%s2253_s12 + $0xc] sm:$0xf] (%p1961_p6) }
 0x166   : > { %v1730_v38 = vadd.f32 %v1729_v36, %v1728_v31  ;;  %v1731_v39 = vpop.f32.mrb[22].mxu1  ;;  %v1668_v40 = vpop.f32.mrb[23].mxu0  ;;  %v1293_v30 = vld [vmem:[%s2253_s12 + $0x10] sm:$0xf] (%p1961_p6)  ;;  %1292 = vst [vmem:[%s1269_s5 + $0x18] sm:$0xf] (%p1961_p6), %v1291_v29 }
 0x167   : > { %v1594_v41 = vpack.c.bf16 %v1171_v34, %v1170_v33  ;;  %v1043_v42 = vadd.f32 %v1666_v35, %v2246_v2  ;;  %v1669_v43 = vadd.f32 %v1668_v40, %v1667_v37  ;;  %v1732_v44 = vpop.f32.mrb[23].mxu1  ;;  %1294 = vst [vmem:[%s1269_s5 + $0x20] sm:$0xf] (%p1961_p6), %v1293_v30  ;;  %v1295_v31 = vld [vmem:[%s2253_s12 + $0x14] sm:$0xf] (%p1961_p6) }
 0x168   : > { %v1733_v45 = vadd.f32 %v1732_v44, %v1731_v39  ;;  %v1297_v32 = vld [vmem:[%s2253_s12 + $0x18] sm:$0xf] (%p1961_p6)  ;;  %v1299_v33 = vld [vmem:[%s2253_s12 + $0x1c] sm:$0xf] (%p1961_p6)  ;;  %1296 = vst [vmem:[%s1269_s5 + $0x28] sm:$0xf] (%p1961_p6), %v1295_v31 }
 0x169   : > { %1614 = vst [vmem:[%s2253_s12 + $0x20] sm:$0xff] %v1594_v41   ;;  %v1140_v46 = vadd.f32 %v1730_v38, %v1043_v42  ;;  %v1046_v47 = vadd.f32 %v1669_v43, %v2246_v2  ;;  %1298 = vst [vmem:[%s1269_s5 + $0x30] sm:$0xf] (%p1961_p6), %v1297_v32 }
 0x16a   : > { %1300 = vst [vmem:[%s1269_s5 + $0x38] sm:$0xf] (%p1961_p6), %v1299_v33 }
 0x16b   : > { %v1143_v48 = vadd.f32 %v1733_v45, %v1046_v47  ;;  %v1670_v49 = vpop.f32.mrb[24].mxu0  ;;  %v1172_v52 = vmax.f32 %v1140_v46, 0.0 }
 0x16c   : > { %v1734_v50 = vpop.f32.mrb[24].mxu1  ;;  %v1671_v51 = vpop.f32.mrb[25].mxu0 }
 0x16d   : > { %v1173_v53 = vmax.f32 %v1143_v48, 0.0  ;;  %v1672_v54 = vadd.f32 %v1671_v51, %v1670_v49  ;;  %v1735_v55 = vpop.f32.mrb[25].mxu1  ;;  %v1673_v56 = vpop.f32.mrb[26].mxu0 }
 0x16e   : > { %v1736_v57 = vadd.f32 %v1735_v55, %v1734_v50  ;;  %v1737_v58 = vpop.f32.mrb[26].mxu1  ;;  %v1674_v59 = vpop.f32.mrb[27].mxu0 }
 0x16f   : > { %v1599_v60 = vpack.c.bf16 %v1173_v53, %v1172_v52  ;;  %v1051_v61 = vadd.f32 %v1672_v54, %v2246_v2  ;;  %v1675_v62 = vadd.f32 %v1674_v59, %v1673_v56  ;;  %v1738_v63 = vpop.f32.mrb[27].mxu1 }
 0x170   : > { %v1739_v0 = vadd.f32 %v1738_v63, %v1737_v58  ;;  %v1301_v34 = vld [vmem:[%s2253_s12 + $0x20] sm:$0xf] (%p1961_p6)  ;;  %v1303_v35 = vld [vmem:[%s2253_s12 + $0x24] sm:$0xf] (%p1961_p6) }
 0x171   : > { %1615 = vst [vmem:[%s2253_s12 + $0x28] sm:$0xff] %v1599_v60   ;;  %v1148_v1 = vadd.f32 %v1736_v57, %v1051_v61  ;;  %v1054_v3 = vadd.f32 %v1675_v62, %v2246_v2  ;;  %1302 = vst [vmem:[%s1269_s5 + $0x40] sm:$0xf] (%p1961_p6), %v1301_v34 }
 0x172   : > { %1304 = vst [vmem:[%s1269_s5 + $0x48] sm:$0xf] (%p1961_p6), %v1303_v35 }
 0x173   : > { %v1151_v4 = vadd.f32 %v1739_v0, %v1054_v3  ;;  %v1676_v5 = vpop.f32.mrb[28].mxu0  ;;  %v1174_v8 = vmax.f32 %v1148_v1, 0.0 }
 0x174   : > { %v1740_v6 = vpop.f32.mrb[28].mxu1  ;;  %v1677_v7 = vpop.f32.mrb[29].mxu0 }
 0x175   : > { %v1175_v9 = vmax.f32 %v1151_v4, 0.0  ;;  %v1678_v10 = vadd.f32 %v1677_v7, %v1676_v5  ;;  %v1741_v11 = vpop.f32.mrb[29].mxu1  ;;  %v1679_v12 = vpop.f32.mrb[30].mxu0 }
 0x176   : > { %v1742_v13 = vadd.f32 %v1741_v11, %v1740_v6  ;;  %v1743_v14 = vpop.f32.mrb[30].mxu1  ;;  %v1680_v15 = vpop.f32.mrb[31].mxu0 }
 0x177   : > { %v1604_v16 = vpack.c.bf16 %v1175_v9, %v1174_v8  ;;  %v1059_v17 = vadd.f32 %v1678_v10, %v2246_v2  ;;  %v1681_v18 = vadd.f32 %v1680_v15, %v1679_v12  ;;  %v1744_v19 = vpop.f32.mrb[31].mxu1 }
 0x178   : > { %v1745_v20 = vadd.f32 %v1744_v19, %v1743_v14  ;;  %v1305_v36 = vld [vmem:[%s2253_s12 + $0x28] sm:$0xf] (%p1961_p6)  ;;  %v1307_v37 = vld [vmem:[%s2253_s12 + $0x2c] sm:$0xf] (%p1961_p6) }
 0x179   : > { %1616 = vst [vmem:[%s2253_s12 + $0x30] sm:$0xff] %v1604_v16   ;;  %v1156_v21 = vadd.f32 %v1742_v13, %v1059_v17  ;;  %v1062_v22 = vadd.f32 %v1681_v18, %v2246_v2  ;;  %v1287_v2 = vld [vmem:[%s2253_s12 + $0x4] sm:$0xf] (%p1961_p6)  ;;  %1306 = vst [vmem:[%s1269_s5 + $0x50] sm:$0xf] (%p1961_p6), %v1305_v36 }
 0x17a   : > { %1288 = vst [vmem:[%s1269_s5 + $0x8] sm:$0xf] (%p1961_p6), %v1287_v2  ;;  %1308 = vst [vmem:[%s1269_s5 + $0x58] sm:$0xf] (%p1961_p6), %v1307_v37 }
 0x17b   : > { %v1159_v23 = vadd.f32 %v1745_v20, %v1062_v22  ;;  %v1176_v24 = vmax.f32 %v1156_v21, 0.0  ;;  %1264 = sbr.rel (!%p1961_p6) target bundleno = 394 (0x18a), region = 77 }
 0x17d   : > { %v1177_v25 = vmax.f32 %v1159_v23, 0.0 }
 0x17f   : > { %v1609_v26 = vpack.c.bf16 %v1177_v25, %v1176_v24 }
 0x180   : > { %v1309_v38 = vld [vmem:[%s2253_s12 + $0x30] sm:$0xf] (%p1961_p6)  ;;  %v1311_v39 = vld [vmem:[%s2253_s12 + $0x34] sm:$0xf] (%p1961_p6) }
 0x181   : > { %1617 = vst [vmem:[%s2253_s12 + $0x38] sm:$0xff] %v1609_v26   ;;  %1310 = vst [vmem:[%s1269_s5 + $0x60] sm:$0xf] (%p1961_p6), %v1309_v38 }
 0x182   : > { %1312 = vst [vmem:[%s1269_s5 + $0x68] sm:$0xf] %v1311_v39 }
 0x188   : > { %v1313_v40 = vld [vmem:[%s2253_s12 + $0x38] sm:$0xf]  ;;  %v1315_v41 = vld [vmem:[%s2253_s12 + $0x3c] sm:$0xf] }
 0x189   : > { %1314 = vst [vmem:[%s1269_s5 + $0x70] sm:$0xf] %v1313_v40  ;;  %1316 = vst [vmem:[%s1269_s5 + $0x78] sm:$0xf] %v1315_v41 }
 0x18a PF: > { %s13_s16 = sadd.s32 1, %s1904_s16   ;;  %s2318_s12 = smov %s1892_s13 }
 0x18b   : > { %p10_p12 = scmp.ge.s32.totalorder %s13_s16, 4   ;;  %s2319_s13 = smov %s1966_s22 }
 0x18c   : > { %s2320_s14 = smov %s1900_s15  ;;  %s2321_s15 = smov %s2323_s17 }
 0x18d   :  { %12 = sbr.rel (!%p10_p12) target bundleno = 3 (0x3), region = 155 }

// kernel: model_forward.9
= control target key start
LH: loop header
LB: loop body
LE: loop exit
PB: predicated region body
PF: predicated region fallthrough
CT: control target
= control target key end

     0   :  { %s4391_s12 = smov 0   ;;  %s4393_s13 = smov 0   ;;  %s4827_s0 = inlined_call_operand.vmem [shape: bf16[16,16384], index: 0, kind: input, shape index: {}]   ;;  %s4828_s1 = inlined_call_operand.vmem [shape: bf16[16384,128], index: 1, kind: input, shape index: {}]   ;;  %s4829_s2 = inlined_call_operand.vmem [shape: f32[1,128], index: 2, kind: input, shape index: {}]   ;;  %s4830_s3 = inlined_call_operand.vmem [shape: f32[16,128], index: 3, kind: output, shape index: {}]  }
   0x1   :  { %s4395_s14 = smov 0   ;;  %s4397_s15 = smov 0  }
   0x2   :  { %s4399_s16 = smov 0  }
   0x3 LB: > { %s25_s17 = sadd.s32 1, %s4364_s15  ;;  %p48_p1 = scmp.ne.s32.totalorder %s4356_s13, %s4352_s12  ;;  %s4368_s16 = sphi %s4399_s16, %s13_s16   ;;  %s4364_s15 = sphi %s4397_s15, %s4834_s15   ;;  %s4360_s14 = sphi %s4395_s14, %s4833_s14   ;;  %s4356_s13 = sphi %s4393_s13, %s4832_s13   ;;  %s4352_s12 = sphi %s4391_s12, %s4831_s12  }
   0x4   : > { %p26_p0 = scmp.ge.s32.totalorder %s25_s17, 4  ;;  %p49_p2 = scmp.eq.s32.totalorder %s4368_s16, 0 }
   0x5   : > { %s41_s19 = sadd.s32 1, %s4356_s13  ;;  %p3377_p5 = scmp.ge.s32.totalorder %s4368_s16, 4 }
   0x6   : > { %s4836_s17 = smov (%p26_p0, %s25_s17), 0  ;;  %p50_p3 = por %p49_p2, %p48_p1 }
   0x7   : > { %s37_s18 = ssub.s32 %s4364_s15, %s4836_s17  ;;  %162 = sbr.rel (%p3377_p5) target bundleno = 34 (0x22), region = 20 }
   0x8   : > { %p39_p4 = scmp.eq.s32.totalorder %s37_s18, 0 }
   0xa   : > { %s4426_s20 = scalar_select %p39_p4, %s4356_s13, %s41_s19  }
   0xe   : > { %165 = sbr.rel (!%p50_p3) target bundleno = 34 (0x22), region = 24  ;;  %s167_s21 = sand.u32 (%p50_p3), 1, %s4356_s13  }
   0xf   : > { %s3680_s22 = sshll.u32 (%p50_p3), %s4364_s15, 7  ;;  %s3378_s23 = sshll.u32 (%p50_p3), %s167_s21, 8 }
  0x10   : > { %s4434_s26 = scalar_lea.vmem (%p50_p3), %s4827_s0, %s3680_s22  ;;  %s4439_s27 = scalar_lea.vmem (%p50_p3), [#allocation3], %s3378_s23 }
  0x11   : > { %v188_v0 = vld [vmem:[%s4434_s26] sm:$0xff] (%p50_p3)  ;;  %v190_v1 = vld [vmem:[%s4434_s26 + $0x8] sm:$0xff] (%p50_p3)  ;;  %v192_v2 = vld [vmem:[%s4434_s26 + $0x10] sm:$0xff] (%p50_p3) }
  0x12   : > { %189 = vst [vmem:[%s4439_s27] sm:$0xff] (%p50_p3), %v188_v0  ;;  %191 = vst [vmem:[%s4439_s27 + $0x8] sm:$0xff] (%p50_p3), %v190_v1  ;;  %v194_v3 = vld [vmem:[%s4434_s26 + $0x18] sm:$0xff] (%p50_p3)  ;;  %v196_v4 = vld [vmem:[%s4434_s26 + $0x20] sm:$0xff] (%p50_p3) }
  0x13   : > { %193 = vst [vmem:[%s4439_s27 + $0x10] sm:$0xff] (%p50_p3), %v192_v2  ;;  %v198_v5 = vld [vmem:[%s4434_s26 + $0x28] sm:$0xff] (%p50_p3)  ;;  %195 = vst [vmem:[%s4439_s27 + $0x18] sm:$0xff] (%p50_p3), %v194_v3  ;;  %v200_v6 = vld [vmem:[%s4434_s26 + $0x30] sm:$0xff] (%p50_p3) }
  0x14   : > { %197 = vst [vmem:[%s4439_s27 + $0x20] sm:$0xff] (%p50_p3), %v196_v4  ;;  %199 = vst [vmem:[%s4439_s27 + $0x28] sm:$0xff] (%p50_p3), %v198_v5  ;;  %v202_v7 = vld [vmem:[%s4434_s26 + $0x38] sm:$0xff] (%p50_p3)  ;;  %v204_v8 = vld [vmem:[%s4434_s26 + $0x40] sm:$0xff] (%p50_p3) }
  0x15   : > { %201 = vst [vmem:[%s4439_s27 + $0x30] sm:$0xff] %v200_v6  ;;  %203 = vst [vmem:[%s4439_s27 + $0x38] sm:$0xff] %v202_v7  ;;  %v206_v9 = vld [vmem:[%s4434_s26 + $0x48] sm:$0xff]  ;;  %v208_v10 = vld [vmem:[%s4434_s26 + $0x50] sm:$0xff] }
  0x16   : > { %205 = vst [vmem:[%s4439_s27 + $0x40] sm:$0xff] %v204_v8  ;;  %v210_v11 = vld [vmem:[%s4434_s26 + $0x58] sm:$0xff]  ;;  %207 = vst [vmem:[%s4439_s27 + $0x48] sm:$0xff] %v206_v9  ;;  %v212_v12 = vld [vmem:[%s4434_s26 + $0x60] sm:$0xff] }
  0x17   : > { %209 = vst [vmem:[%s4439_s27 + $0x50] sm:$0xff] %v208_v10  ;;  %211 = vst [vmem:[%s4439_s27 + $0x58] sm:$0xff] %v210_v11  ;;  %v214_v13 = vld [vmem:[%s4434_s26 + $0x68] sm:$0xff]  ;;  %v216_v14 = vld [vmem:[%s4434_s26 + $0x70] sm:$0xff] }
  0x18   : > { %213 = vst [vmem:[%s4439_s27 + $0x60] sm:$0xff] %v212_v12  ;;  %215 = vst [vmem:[%s4439_s27 + $0x68] sm:$0xff] %v214_v13  ;;  %v218_v15 = vld [vmem:[%s4434_s26 + $0x78] sm:$0xff]  ;;  %v220_v16 = vld [vmem:[%s4434_s26 + $0x200] sm:$0xff] }
  0x19   : > { %217 = vst [vmem:[%s4439_s27 + $0x70] sm:$0xff] %v216_v14  ;;  %v222_v17 = vld [vmem:[%s4434_s26 + $0x208] sm:$0xff]  ;;  %219 = vst [vmem:[%s4439_s27 + $0x78] sm:$0xff] %v218_v15  ;;  %v224_v18 = vld [vmem:[%s4434_s26 + $0x210] sm:$0xff] }
  0x1a   : > { %221 = vst [vmem:[%s4439_s27 + $0x80] sm:$0xff] %v220_v16  ;;  %223 = vst [vmem:[%s4439_s27 + $0x88] sm:$0xff] %v222_v17  ;;  %v226_v19 = vld [vmem:[%s4434_s26 + $0x218] sm:$0xff]  ;;  %v228_v20 = vld [vmem:[%s4434_s26 + $0x220] sm:$0xff] }
  0x1b   : > { %225 = vst [vmem:[%s4439_s27 + $0x90] sm:$0xff] %v224_v18  ;;  %227 = vst [vmem:[%s4439_s27 + $0x98] sm:$0xff] %v226_v19  ;;  %v230_v21 = vld [vmem:[%s4434_s26 + $0x228] sm:$0xff]  ;;  %v232_v22 = vld [vmem:[%s4434_s26 + $0x230] sm:$0xff] }
  0x1c   : > { %229 = vst [vmem:[%s4439_s27 + $0xa0] sm:$0xff] %v228_v20  ;;  %v234_v23 = vld [vmem:[%s4434_s26 + $0x238] sm:$0xff]  ;;  %231 = vst [vmem:[%s4439_s27 + $0xa8] sm:$0xff] %v230_v21  ;;  %v236_v24 = vld [vmem:[%s4434_s26 + $0x240] sm:$0xff] }
  0x1d   : > { %233 = vst [vmem:[%s4439_s27 + $0xb0] sm:$0xff] %v232_v22  ;;  %235 = vst [vmem:[%s4439_s27 + $0xb8] sm:$0xff] %v234_v23  ;;  %v238_v25 = vld [vmem:[%s4434_s26 + $0x248] sm:$0xff]  ;;  %v240_v26 = vld [vmem:[%s4434_s26 + $0x250] sm:$0xff] }
  0x1e   : > { %237 = vst [vmem:[%s4439_s27 + $0xc0] sm:$0xff] %v236_v24  ;;  %239 = vst [vmem:[%s4439_s27 + $0xc8] sm:$0xff] %v238_v25  ;;  %v242_v27 = vld [vmem:[%s4434_s26 + $0x258] sm:$0xff]  ;;  %v244_v28 = vld [vmem:[%s4434_s26 + $0x260] sm:$0xff] }
  0x1f   : > { %241 = vst [vmem:[%s4439_s27 + $0xd0] sm:$0xff] %v240_v26  ;;  %v246_v29 = vld [vmem:[%s4434_s26 + $0x268] sm:$0xff]  ;;  %243 = vst [vmem:[%s4439_s27 + $0xd8] sm:$0xff] %v242_v27  ;;  %v248_v30 = vld [vmem:[%s4434_s26 + $0x270] sm:$0xff] }
  0x20   : > { %245 = vst [vmem:[%s4439_s27 + $0xe0] sm:$0xff] %v244_v28  ;;  %247 = vst [vmem:[%s4439_s27 + $0xe8] sm:$0xff] %v246_v29  ;;  %v250_v31 = vld [vmem:[%s4434_s26 + $0x278] sm:$0xff] }
  0x21   : > { %249 = vst [vmem:[%s4439_s27 + $0xf0] sm:$0xff] %v248_v30  ;;  %251 = vst [vmem:[%s4439_s27 + $0xf8] sm:$0xff] %v250_v31 }
  0x22 PF: > { %p3381_p6 = scmp.ge.s32.totalorder %s4368_s16, 1  ;;  %p268_p7 = scmp.lt.s32.totalorder %s4368_s16, 5 }
  0x24   : > { %p269_p8 = pnand %p3381_p6, %p268_p7 }
  0x25   : > { %s275_s28 = sand.u32 (!%p269_p8), 1, %s4352_s12   ;;  %s3383_s29 = sshll.u32 (!%p269_p8), %s4360_s14, 9 }
  0x26   : > { %272 = sbr.rel (%p269_p8) target bundleno = 546 (0x222), region = 51  ;;  %s3382_s30 = sshll.u32 (!%p269_p8), %s275_s28, 8 }
  0x27   : > { %p315_p9 = scmp.lt.s32.totalorder (!%p269_p8), %s3383_s29, 2047  ;;  %s4511_s8 = scalar_lea.vmem (!%p269_p8), [#allocation3], %s3382_s30 }
  0x28   : > { %p3385_p10 = scmp.ne.s32.totalorder (!%p269_p8), %s4360_s14, 0 }
  0x2d   : > { %s4838_s29 = smov (!%p315_p9, %s3383_s29), 2047  ;;  %339 = sbr.rel (%p3385_p10) target bundleno = 52 (0x34), region = 59 }
  0x2e   : > { %s3384_s4 = sshll.u32 %s4838_s29, 2  ;;  %v4370_v32 = vmov (!%p3385_p10), 0.0  }
  0x2f   : > { %s4509_s7 = scalar_lea.vmem %s4828_s1, %s3384_s4  ;;  %340 = vst [vmem:[#allocation2] sm:$0xff] (!%p3385_p10), %v4370_v32  ;;  %341 = vst [vmem:[#allocation2 + $0x8] sm:$0xff] (!%p3385_p10), %v4370_v32 }
  0x34 PF: > { %v4074_v33 = vld [vmem:[%s4509_s7 + $0x40] sm:$0xff]   ;;  %v4078_v37 = vld [vmem:[%s4509_s7 + $0x48] sm:$0xff]   ;;  %v4082_v41 = vld [vmem:[%s4509_s7 + $0x50] sm:$0xff]   ;;  %p3674_p11 = scmp.ne.s32.totalorder %s4360_s14, 3 }
  0x35   : > { %v4075_v34 = vld [vmem:[%s4509_s7 + $0xc0] sm:$0xff]   ;;  %3681 = vmatprep.subr.bf16.mxu0 %v4074_v33  ;;  %v4079_v38 = vld [vmem:[%s4509_s7 + $0xc8] sm:$0xff]   ;;  %v4083_v42 = vld [vmem:[%s4509_s7 + $0xd0] sm:$0xff]  }
  0x36   : > { %v4076_v35 = vld [vmem:[%s4509_s7] sm:$0xff]   ;;  %3703 = vmatprep.subr.bf16.mxu1 %v4075_v34  ;;  %v4080_v39 = vld [vmem:[%s4509_s7 + $0x8] sm:$0xff]   ;;  %v4084_v43 = vld [vmem:[%s4509_s7 + $0x10] sm:$0xff]  }
  0x37   : > { %v4077_v36 = vld [vmem:[%s4509_s7 + $0x80] sm:$0xff]   ;;  %3682 = vmatpush3.bf16.msra.mxu0 %v4076_v35  ;;  %v4081_v40 = vld [vmem:[%s4509_s7 + $0x88] sm:$0xff]   ;;  %v4085_v44 = vld [vmem:[%s4509_s7 + $0x90] sm:$0xff]  }
  0x38   : > { %3704 = vmatpush3.bf16.msra.mxu1 %v4077_v36  ;;  %3683 = vmatprep.subr.bf16.mxu0 %v4078_v37  ;;  %v4086_v45 = vld [vmem:[%s4509_s7 + $0x58] sm:$0xff]   ;;  %v4090_v49 = vld [vmem:[%s4509_s7 + $0x60] sm:$0xff]   ;;  %v4094_v53 = vld [vmem:[%s4509_s7 + $0x68] sm:$0xff]  }
  0x39   : > { %3705 = vmatprep.subr.bf16.mxu1 %v4079_v38  ;;  %v4087_v46 = vld [vmem:[%s4509_s7 + $0xd8] sm:$0xff]   ;;  %v4091_v50 = vld [vmem:[%s4509_s7 + $0xe0] sm:$0xff]   ;;  %v4095_v54 = vld [vmem:[%s4509_s7 + $0xe8] sm:$0xff]  }
  0x3a   : > { %v4088_v47 = vld [vmem:[%s4509_s7 + $0x18] sm:$0xff]   ;;  %v4092_v51 = vld [vmem:[%s4509_s7 + $0x20] sm:$0xff]   ;;  %v4096_v55 = vld [vmem:[%s4509_s7 + $0x28] sm:$0xff]  }
  0x3b   : > { %3684 = vmatpush3.bf16.msra.mxu0 %v4080_v39  ;;  %v4089_v48 = vld [vmem:[%s4509_s7 + $0x98] sm:$0xff]   ;;  %v4093_v52 = vld [vmem:[%s4509_s7 + $0xa0] sm:$0xff]   ;;  %v4097_v56 = vld [vmem:[%s4509_s7 + $0xa8] sm:$0xff]  }
  0x3c   : > { %3706 = vmatpush3.bf16.msra.mxu1 %v4081_v40  ;;  %3685 = vmatprep.subr.bf16.mxu0 %v4082_v41  ;;  %v4098_v57 = vld [vmem:[%s4509_s7 + $0x70] sm:$0xff]   ;;  %v4102_v61 = vld [vmem:[%s4509_s7 + $0x78] sm:$0xff]   ;;  %v345_v3 = vld [vmem:[%s4511_s8 + $0x8] sm:$0xff] }
  0x3d   : > { %3707 = vmatprep.subr.bf16.mxu1 %v4083_v42  ;;  %v4099_v58 = vld [vmem:[%s4509_s7 + $0xf0] sm:$0xff]   ;;  %v4103_v62 = vld [vmem:[%s4509_s7 + $0xf8] sm:$0xff]   ;;  %v361_v6 = vld [vmem:[%s4511_s8 + $0x88] sm:$0xff] }
  0x3e   : > { %v4100_v59 = vld [vmem:[%s4509_s7 + $0x30] sm:$0xff]   ;;  %v4104_v63 = vld [vmem:[%s4509_s7 + $0x38] sm:$0xff]   ;;  %v3388_v7 = vcombine.low %v345_v3, %v361_v6  ;;  %v3389_v8 = vcombine.high %v345_v3, %v361_v6  ;;  %v4106_v9 = vld [vmem:[%s4509_s7 + $0x140] sm:$0xff]  }
  0x3f   : > { %3686 = vmatpush3.bf16.msra.mxu0 %v4084_v43  ;;  %v4101_v60 = vld [vmem:[%s4509_s7 + $0xb0] sm:$0xff]   ;;  %v4105_v0 = vld [vmem:[%s4509_s7 + $0xb8] sm:$0xff]   ;;  %v4107_v10 = vld [vmem:[%s4509_s7 + $0x1c0] sm:$0xff]  }
  0x40   : > { %3708 = vmatpush3.bf16.msra.mxu1 %v4085_v44  ;;  %3687 = vmatprep.subr.bf16.mxu0 %v4086_v45  ;;  %v344_v1 = vld [vmem:[%s4511_s8] sm:$0xff]  ;;  %v4108_v11 = vld [vmem:[%s4509_s7 + $0x100] sm:$0xff]   ;;  %v4110_v13 = vld [vmem:[%s4509_s7 + $0x148] sm:$0xff]  }
  0x41   : > { %3709 = vmatprep.subr.bf16.mxu1 %v4087_v46  ;;  %v360_v2 = vld [vmem:[%s4511_s8 + $0x80] sm:$0xff]  ;;  %2657 = vmatprep.mubr.bf16.mxu1 %v3389_v8  ;;  %v4109_v12 = vld [vmem:[%s4509_s7 + $0x180] sm:$0xff]   ;;  %v4111_v14 = vld [vmem:[%s4509_s7 + $0x1c8] sm:$0xff]  }
  0x42   : > { %v3386_v4 = vcombine.low %v344_v1, %v360_v2  ;;  %v3387_v5 = vcombine.high %v344_v1, %v360_v2  ;;  %v4112_v15 = vld [vmem:[%s4509_s7 + $0x108] sm:$0xff]   ;;  %v4114_v17 = vld [vmem:[%s4509_s7 + $0x150] sm:$0xff]   ;;  %v4118_v21 = vld [vmem:[%s4509_s7 + $0x158] sm:$0xff]  }
  0x43   : > { %3688 = vmatpush3.bf16.msra.mxu0 %v4088_v47  ;;  %v4113_v16 = vld [vmem:[%s4509_s7 + $0x188] sm:$0xff]   ;;  %v4115_v18 = vld [vmem:[%s4509_s7 + $0x1d0] sm:$0xff]   ;;  %v4119_v22 = vld [vmem:[%s4509_s7 + $0x1d8] sm:$0xff]  }
  0x44   : > { %3710 = vmatpush3.bf16.msra.mxu1 %v4089_v48  ;;  %3689 = vmatprep.subr.bf16.mxu0 %v4090_v49  ;;  %v4116_v19 = vld [vmem:[%s4509_s7 + $0x110] sm:$0xff]   ;;  %v4120_v23 = vld [vmem:[%s4509_s7 + $0x118] sm:$0xff]   ;;  %v4122_v25 = vld [vmem:[%s4509_s7 + $0x160] sm:$0xff]  }
  0x45   : > { %3711 = vmatprep.subr.bf16.mxu1 %v4091_v50  ;;  %2616 = vmatprep.mubr.bf16.mxu0 %v3387_v5  ;;  %v4117_v20 = vld [vmem:[%s4509_s7 + $0x190] sm:$0xff]   ;;  %v4121_v24 = vld [vmem:[%s4509_s7 + $0x198] sm:$0xff]   ;;  %v4123_v26 = vld [vmem:[%s4509_s7 + $0x1e0] sm:$0xff]  }
  0x46   : > { %v4124_v27 = vld [vmem:[%s4509_s7 + $0x120] sm:$0xff]   ;;  %v4126_v29 = vld [vmem:[%s4509_s7 + $0x168] sm:$0xff]   ;;  %v4130_v33 = vld [vmem:[%s4509_s7 + $0x170] sm:$0xff]  }
  0x47   : > { %3690 = vmatpush3.bf16.msra.mxu0 %v4092_v51  ;;  %v4125_v28 = vld [vmem:[%s4509_s7 + $0x1a0] sm:$0xff]   ;;  %v4127_v30 = vld [vmem:[%s4509_s7 + $0x1e8] sm:$0xff]   ;;  %v4131_v34 = vld [vmem:[%s4509_s7 + $0x1f0] sm:$0xff]  }
  0x48   : > { %3712 = vmatpush3.bf16.msra.mxu1 %v4093_v52  ;;  %3691 = vmatprep.subr.bf16.mxu0 %v4094_v53  ;;  %v4128_v31 = vld [vmem:[%s4509_s7 + $0x128] sm:$0xff]   ;;  %v4132_v35 = vld [vmem:[%s4509_s7 + $0x130] sm:$0xff]   ;;  %v4134_v37 = vld [vmem:[%s4509_s7 + $0x178] sm:$0xff]  }
  0x49   : > { %3713 = vmatprep.subr.bf16.mxu1 %v4095_v54  ;;  %v4129_v32 = vld [vmem:[%s4509_s7 + $0x1a8] sm:$0xff]   ;;  %v4133_v36 = vld [vmem:[%s4509_s7 + $0x1b0] sm:$0xff]   ;;  %v4135_v38 = vld [vmem:[%s4509_s7 + $0x1f8] sm:$0xff]  }
  0x4a   : > { %v4136_v39 = vld [vmem:[%s4509_s7 + $0x138] sm:$0xff]   ;;  %v346_v41 = vld [vmem:[%s4511_s8 + $0x10] sm:$0xff]  ;;  %v347_v45 = vld [vmem:[%s4511_s8 + $0x18] sm:$0xff] }
  0x4b   : > { %3692 = vmatpush3.bf16.msra.mxu0 %v4096_v55  ;;  %v4137_v40 = vld [vmem:[%s4509_s7 + $0x1b8] sm:$0xff]   ;;  %v362_v42 = vld [vmem:[%s4511_s8 + $0x90] sm:$0xff]  ;;  %v363_v46 = vld [vmem:[%s4511_s8 + $0x98] sm:$0xff] }
  0x4c   : > { %3714 = vmatpush3.bf16.msra.mxu1 %v4097_v56  ;;  %3693 = vmatprep.subr.bf16.mxu0 %v4098_v57  ;;  %v3390_v43 = vcombine.low %v346_v41, %v362_v42  ;;  %v3391_v44 = vcombine.high %v346_v41, %v362_v42  ;;  %v3392_v47 = vcombine.low %v347_v45, %v363_v46  ;;  %v4138_v49 = vld [vmem:[%s4509_s7 + $0x240] sm:$0xff]   ;;  %v4142_v53 = vld [vmem:[%s4509_s7 + $0x248] sm:$0xff]   ;;  %v4146_v57 = vld [vmem:[%s4509_s7 + $0x250] sm:$0xff]  }
  0x4d   : > { %3715 = vmatprep.subr.bf16.mxu1 %v4099_v58  ;;  %v3393_v48 = vcombine.high %v347_v45, %v363_v46  ;;  %v4139_v50 = vld [vmem:[%s4509_s7 + $0x2c0] sm:$0xff]   ;;  %v4143_v54 = vld [vmem:[%s4509_s7 + $0x2c8] sm:$0xff]   ;;  %v4147_v58 = vld [vmem:[%s4509_s7 + $0x2d0] sm:$0xff]  }
  0x4e   : > { %v4140_v51 = vld [vmem:[%s4509_s7 + $0x200] sm:$0xff]   ;;  %v4144_v55 = vld [vmem:[%s4509_s7 + $0x208] sm:$0xff]  }
  0x4f   : > { %3694 = vmatpush3.bf16.msra.mxu0 %v4100_v59  ;;  %v4141_v52 = vld [vmem:[%s4509_s7 + $0x280] sm:$0xff]   ;;  %v4145_v56 = vld [vmem:[%s4509_s7 + $0x288] sm:$0xff]   ;;  %v4148_v59 = vld [vmem:[%s4509_s7 + $0x210] sm:$0xff]  }
  0x50   : > { %3716 = vmatpush3.bf16.msra.mxu1 %v4101_v60  ;;  %3695 = vmatprep.subr.bf16.mxu0 %v4102_v61  ;;  %v4149_v60 = vld [vmem:[%s4509_s7 + $0x290] sm:$0xff]   ;;  %v4150_v61 = vld [vmem:[%s4509_s7 + $0x258] sm:$0xff]   ;;  %v4154_v1 = vld [vmem:[%s4509_s7 + $0x260] sm:$0xff]  }
  0x51   : > { %3717 = vmatprep.subr.bf16.mxu1 %v4103_v62  ;;  %v4151_v62 = vld [vmem:[%s4509_s7 + $0x2d8] sm:$0xff]   ;;  %v4155_v2 = vld [vmem:[%s4509_s7 + $0x2e0] sm:$0xff]   ;;  %v4158_v5 = vld [vmem:[%s4509_s7 + $0x268] sm:$0xff]  }
  0x52   : > { %v4156_v3 = vld [vmem:[%s4509_s7 + $0x220] sm:$0xff]   ;;  %v4159_v6 = vld [vmem:[%s4509_s7 + $0x2e8] sm:$0xff]  }
  0x53   : > { %3696 = vmatpush3.bf16.msra.mxu0 %v4104_v63  ;;  %v4152_v63 = vld [vmem:[%s4509_s7 + $0x218] sm:$0xff]   ;;  %v4161_v8 = vld [vmem:[%s4509_s7 + $0x2a8] sm:$0xff]   ;;  %v4186_v41 = vld [vmem:[%s4509_s7 + $0x360] sm:$0xff]  }
  0x54   : > { %3718 = vmatpush3.bf16.msra.mxu1 %v4105_v0  ;;  %3725 = vmatprep.subr.bf16.mxu0 %v4106_v9  ;;  %v4153_v0 = vld [vmem:[%s4509_s7 + $0x298] sm:$0xff]   ;;  %v4162_v9 = vld [vmem:[%s4509_s7 + $0x270] sm:$0xff]   ;;  %v4187_v42 = vld [vmem:[%s4509_s7 + $0x3e0] sm:$0xff]  }
  0x55   : > { %3747 = vmatprep.subr.bf16.mxu1 %v4107_v10  ;;  %v4163_v10 = vld [vmem:[%s4509_s7 + $0x2f0] sm:$0xff]   ;;  %v4190_v45 = vld [vmem:[%s4509_s7 + $0x368] sm:$0xff]  }
  0x56   : > { %2617 = vmatmul.mubr.bf16.vlgmr.msra.gmra.mrb[0].mxu0 %v3386_v4  ;;  %v4157_v4 = vld [vmem:[%s4509_s7 + $0x2a0] sm:$0xff]   ;;  %v4191_v46 = vld [vmem:[%s4509_s7 + $0x3e8] sm:$0xff]  }
  0x57   : > { %2658 = vmatmul.mubr.bf16.vlgmr.msra.gmra.mrb[0].mxu1 %v3388_v7  ;;  %3726 = vmatpush3.bf16.msra.mxu0 %v4108_v11  ;;  %v4160_v7 = vld [vmem:[%s4509_s7 + $0x228] sm:$0xff]   ;;  %v4164_v11 = vld [vmem:[%s4509_s7 + $0x230] sm:$0xff]  }
  0x58   : > { %3748 = vmatpush3.bf16.msra.mxu1 %v4109_v12  ;;  %3727 = vmatprep.subr.bf16.mxu0 %v4110_v13  ;;  %v4165_v12 = vld [vmem:[%s4509_s7 + $0x2b0] sm:$0xff]   ;;  %v4166_v13 = vld [vmem:[%s4509_s7 + $0x278] sm:$0xff]  }
  0x59   : > { %3749 = vmatprep.subr.bf16.mxu1 %v4111_v14  ;;  %2698 = vmatprep.mubr.bf16.mxu0 %v3391_v44  ;;  %v4167_v14 = vld [vmem:[%s4509_s7 + $0x2f8] sm:$0xff]   ;;  %v4189_v44 = vld [vmem:[%s4509_s7 + $0x3a0] sm:$0xff]  }
  0x5a   : > { %2739 = vmatprep.mubr.bf16.mxu1 %v3393_v48  ;;  %v4193_v48 = vld [vmem:[%s4509_s7 + $0x3a8] sm:$0xff]  }
  0x5b   : > { %3728 = vmatpush3.bf16.msra.mxu0 %v4112_v15  ;;  %v4168_v15 = vld [vmem:[%s4509_s7 + $0x238] sm:$0xff]  }
  0x5c   : > { %3750 = vmatpush3.bf16.msra.mxu1 %v4113_v16  ;;  %3729 = vmatprep.subr.bf16.mxu0 %v4114_v17  ;;  %v4169_v16 = vld [vmem:[%s4509_s7 + $0x2b8] sm:$0xff]  }
  0x5d   : > { %3751 = vmatprep.subr.bf16.mxu1 %v4115_v18  ;;  %v348_v17 = vld [vmem:[%s4511_s8 + $0x20] sm:$0xff] }
  0x5e   : > { %v364_v18 = vld [vmem:[%s4511_s8 + $0xa0] sm:$0xff] }
  0x5f   : > { %3730 = vmatpush3.bf16.msra.mxu0 %v4116_v19  ;;  %v349_v19 = vld [vmem:[%s4511_s8 + $0x28] sm:$0xff] }
  0x60   : > { %3752 = vmatpush3.bf16.msra.mxu1 %v4117_v20  ;;  %3731 = vmatprep.subr.bf16.mxu0 %v4118_v21  ;;  %v365_v20 = vld [vmem:[%s4511_s8 + $0xa8] sm:$0xff]  ;;  %v3394_v21 = vcombine.low %v348_v17, %v364_v18 }
  0x61   : > { %3753 = vmatprep.subr.bf16.mxu1 %v4119_v22  ;;  %v3395_v22 = vcombine.high %v348_v17, %v364_v18  ;;  %v4218_v17 = vld [vmem:[%s4509_s7 + $0x460] sm:$0xff]  }
  0x62   : > { %v4219_v18 = vld [vmem:[%s4509_s7 + $0x4e0] sm:$0xff]  }
  0x63   : > { %3732 = vmatpush3.bf16.msra.mxu0 %v4120_v23  ;;  %v3396_v23 = vcombine.low %v349_v19, %v365_v20 }
  0x64   : > { %3754 = vmatpush3.bf16.msra.mxu1 %v4121_v24  ;;  %3733 = vmatprep.subr.bf16.mxu0 %v4122_v25  ;;  %v3397_v24 = vcombine.high %v349_v19, %v365_v20  ;;  %v4170_v25 = vld [vmem:[%s4509_s7 + $0x340] sm:$0xff]  }
  0x65   : > { %3755 = vmatprep.subr.bf16.mxu1 %v4123_v26  ;;  %v4171_v26 = vld [vmem:[%s4509_s7 + $0x3c0] sm:$0xff]  }
  0x66   : > { %v4220_v19 = vld [vmem:[%s4509_s7 + $0x420] sm:$0xff]  }
  0x67   : > { %3734 = vmatpush3.bf16.msra.mxu0 %v4124_v27  ;;  %v4172_v27 = vld [vmem:[%s4509_s7 + $0x300] sm:$0xff]  }
  0x68   : > { %3756 = vmatpush3.bf16.msra.mxu1 %v4125_v28  ;;  %3735 = vmatprep.subr.bf16.mxu0 %v4126_v29  ;;  %v4173_v28 = vld [vmem:[%s4509_s7 + $0x380] sm:$0xff]   ;;  %v4174_v29 = vld [vmem:[%s4509_s7 + $0x348] sm:$0xff]  }
  0x69   : > { %3757 = vmatprep.subr.bf16.mxu1 %v4127_v30  ;;  %v4175_v30 = vld [vmem:[%s4509_s7 + $0x3c8] sm:$0xff]   ;;  %v4221_v20 = vld [vmem:[%s4509_s7 + $0x4a0] sm:$0xff]  }
  0x6b   : > { %3736 = vmatpush3.bf16.msra.mxu0 %v4128_v31  ;;  %v4176_v31 = vld [vmem:[%s4509_s7 + $0x308] sm:$0xff]  }
  0x6c   : > { %3758 = vmatpush3.bf16.msra.mxu1 %v4129_v32  ;;  %3737 = vmatprep.subr.bf16.mxu0 %v4130_v33  ;;  %v4177_v32 = vld [vmem:[%s4509_s7 + $0x388] sm:$0xff]   ;;  %v4178_v33 = vld [vmem:[%s4509_s7 + $0x350] sm:$0xff]  }
  0x6d   : > { %3759 = vmatprep.subr.bf16.mxu1 %v4131_v34  ;;  %v4179_v34 = vld [vmem:[%s4509_s7 + $0x3d0] sm:$0xff]  }
  0x6f   : > { %3738 = vmatpush3.bf16.msra.mxu0 %v4132_v35  ;;  %v4180_v35 = vld [vmem:[%s4509_s7 + $0x310] sm:$0xff]  }
  0x70   : > { %3760 = vmatpush3.bf16.msra.mxu1 %v4133_v36  ;;  %3739 = vmatprep.subr.bf16.mxu0 %v4134_v37  ;;  %v4181_v36 = vld [vmem:[%s4509_s7 + $0x390] sm:$0xff]   ;;  %v4182_v37 = vld [vmem:[%s4509_s7 + $0x358] sm:$0xff]  }
  0x71   : > { %3761 = vmatprep.subr.bf16.mxu1 %v4135_v38  ;;  %v4183_v38 = vld [vmem:[%s4509_s7 + $0x3d8] sm:$0xff]  }
  0x73   : > { %3740 = vmatpush3.bf16.msra.mxu0 %v4136_v39  ;;  %v4184_v39 = vld [vmem:[%s4509_s7 + $0x318] sm:$0xff]  }
  0x74   : > { %3762 = vmatpush3.bf16.msra.mxu1 %v4137_v40  ;;  %3769 = vmatprep.subr.bf16.mxu0 %v4138_v49  ;;  %v4185_v40 = vld [vmem:[%s4509_s7 + $0x398] sm:$0xff]   ;;  %v4194_v49 = vld [vmem:[%s4509_s7 + $0x370] sm:$0xff]  }
  0x75   : > { %3791 = vmatprep.subr.bf16.mxu1 %v4139_v50  ;;  %v4195_v50 = vld [vmem:[%s4509_s7 + $0x3f0] sm:$0xff]  }
  0x76   : > { %2699 = vmatmul.mubr.bf16.vlgmr.msra.gmra.mrb[4].mxu0 %v3390_v43  ;;  %v4188_v43 = vld [vmem:[%s4509_s7 + $0x320] sm:$0xff]  }
  0x77   : > { %2740 = vmatmul.mubr.bf16.vlgmr.msra.gmra.mrb[4].mxu1 %v3392_v47  ;;  %3770 = vmatpush3.bf16.msra.mxu0 %v4140_v51  ;;  %v4192_v47 = vld [vmem:[%s4509_s7 + $0x328] sm:$0xff]   ;;  %v4196_v51 = vld [vmem:[%s4509_s7 + $0x330] sm:$0xff]  }
  0x78   : > { %3792 = vmatpush3.bf16.msra.mxu1 %v4141_v52  ;;  %3771 = vmatprep.subr.bf16.mxu0 %v4142_v53  ;;  %v4197_v52 = vld [vmem:[%s4509_s7 + $0x3b0] sm:$0xff]   ;;  %v4198_v53 = vld [vmem:[%s4509_s7 + $0x378] sm:$0xff]  }
  0x79   : > { %3793 = vmatprep.subr.bf16.mxu1 %v4143_v54  ;;  %2780 = vmatprep.mubr.bf16.mxu0 %v3395_v22  ;;  %v4199_v54 = vld [vmem:[%s4509_s7 + $0x3f8] sm:$0xff]   ;;  %v4223_v22 = vld [vmem:[%s4509_s7 + $0x4e8] sm:$0xff]  }
  0x7a   : > { %2821 = vmatprep.mubr.bf16.mxu1 %v3397_v24  ;;  %v4225_v24 = vld [vmem:[%s4509_s7 + $0x4a8] sm:$0xff]  }
  0x7b   : > { %3772 = vmatpush3.bf16.msra.mxu0 %v4144_v55  ;;  %v4200_v55 = vld [vmem:[%s4509_s7 + $0x338] sm:$0xff]  }
  0x7c   : > { %3794 = vmatpush3.bf16.msra.mxu1 %v4145_v56  ;;  %3773 = vmatprep.subr.bf16.mxu0 %v4146_v57  ;;  %v4201_v56 = vld [vmem:[%s4509_s7 + $0x3b8] sm:$0xff]   ;;  %v350_v57 = vld [vmem:[%s4511_s8 + $0x30] sm:$0xff] }
  0x7d   : > { %3795 = vmatprep.subr.bf16.mxu1 %v4147_v58  ;;  %v366_v58 = vld [vmem:[%s4511_s8 + $0xb0] sm:$0xff] }
  0x7f   : > { %3774 = vmatpush3.bf16.msra.mxu0 %v4148_v59  ;;  %v351_v59 = vld [vmem:[%s4511_s8 + $0x38] sm:$0xff] }
  0x80   : > { %3796 = vmatpush3.bf16.msra.mxu1 %v4149_v60  ;;  %3775 = vmatprep.subr.bf16.mxu0 %v4150_v61  ;;  %v3398_v60 = vcombine.low %v350_v57, %v366_v58  ;;  %v3399_v61 = vcombine.high %v350_v57, %v366_v58  ;;  %v4250_v57 = vld [vmem:[%s4509_s7 + $0x560] sm:$0xff]  }
  0x81   : > { %3797 = vmatprep.subr.bf16.mxu1 %v4151_v62  ;;  %v367_v62 = vld [vmem:[%s4511_s8 + $0xb8] sm:$0xff]  ;;  %v4251_v58 = vld [vmem:[%s4509_s7 + $0x5e0] sm:$0xff]  }
  0x83   : > { %3776 = vmatpush3.bf16.msra.mxu0 %v4152_v63  ;;  %v3400_v63 = vcombine.low %v351_v59, %v367_v62 }
  0x84   : > { %3798 = vmatpush3.bf16.msra.mxu1 %v4153_v0  ;;  %3777 = vmatprep.subr.bf16.mxu0 %v4154_v1  ;;  %v3401_v0 = vcombine.high %v351_v59, %v367_v62  ;;  %v4202_v1 = vld [vmem:[%s4509_s7 + $0x440] sm:$0xff]   ;;  %v4255_v62 = vld [vmem:[%s4509_s7 + $0x5e8] sm:$0xff]  }
  0x85   : > { %3799 = vmatprep.subr.bf16.mxu1 %v4155_v2  ;;  %v4203_v2 = vld [vmem:[%s4509_s7 + $0x4c0] sm:$0xff]  }
  0x86   : > { %v4252_v59 = vld [vmem:[%s4509_s7 + $0x520] sm:$0xff]  }
  0x87   : > { %3778 = vmatpush3.bf16.msra.mxu0 %v4156_v3  ;;  %v4204_v3 = vld [vmem:[%s4509_s7 + $0x400] sm:$0xff]  }
  0x88   : > { %3800 = vmatpush3.bf16.msra.mxu1 %v4157_v4  ;;  %3779 = vmatprep.subr.bf16.mxu0 %v4158_v5  ;;  %v4205_v4 = vld [vmem:[%s4509_s7 + $0x480] sm:$0xff]   ;;  %v4206_v5 = vld [vmem:[%s4509_s7 + $0x448] sm:$0xff]  }
  0x89   : > { %3801 = vmatprep.subr.bf16.mxu1 %v4159_v6  ;;  %v4207_v6 = vld [vmem:[%s4509_s7 + $0x4c8] sm:$0xff]  }
  0x8b   : > { %3780 = vmatpush3.bf16.msra.mxu0 %v4160_v7  ;;  %v4208_v7 = vld [vmem:[%s4509_s7 + $0x408] sm:$0xff]  }
  0x8c   : > { %3802 = vmatpush3.bf16.msra.mxu1 %v4161_v8  ;;  %3781 = vmatprep.subr.bf16.mxu0 %v4162_v9  ;;  %v4209_v8 = vld [vmem:[%s4509_s7 + $0x488] sm:$0xff]   ;;  %v4210_v9 = vld [vmem:[%s4509_s7 + $0x450] sm:$0xff]  }
  0x8d   : > { %3803 = vmatprep.subr.bf16.mxu1 %v4163_v10  ;;  %v4211_v10 = vld [vmem:[%s4509_s7 + $0x4d0] sm:$0xff]  }
  0x8f   : > { %3782 = vmatpush3.bf16.msra.mxu0 %v4164_v11  ;;  %v4212_v11 = vld [vmem:[%s4509_s7 + $0x410] sm:$0xff]  }
  0x90   : > { %3804 = vmatpush3.bf16.msra.mxu1 %v4165_v12  ;;  %3783 = vmatprep.subr.bf16.mxu0 %v4166_v13  ;;  %v4213_v12 = vld [vmem:[%s4509_s7 + $0x490] sm:$0xff]   ;;  %v4214_v13 = vld [vmem:[%s4509_s7 + $0x458] sm:$0xff]  }
  0x91   : > { %3805 = vmatprep.subr.bf16.mxu1 %v4167_v14  ;;  %v4215_v14 = vld [vmem:[%s4509_s7 + $0x4d8] sm:$0xff]  }
  0x93   : > { %3784 = vmatpush3.bf16.msra.mxu0 %v4168_v15  ;;  %v4216_v15 = vld [vmem:[%s4509_s7 + $0x418] sm:$0xff]  }
  0x94   : > { %3806 = vmatpush3.bf16.msra.mxu1 %v4169_v16  ;;  %3813 = vmatprep.subr.bf16.mxu0 %v4170_v25  ;;  %v4217_v16 = vld [vmem:[%s4509_s7 + $0x498] sm:$0xff]   ;;  %v4226_v25 = vld [vmem:[%s4509_s7 + $0x470] sm:$0xff]  }
  0x95   : > { %3835 = vmatprep.subr.bf16.mxu1 %v4171_v26  ;;  %v4227_v26 = vld [vmem:[%s4509_s7 + $0x4f0] sm:$0xff]  }
  0x96   : > { %2781 = vmatmul.mubr.bf16.vlgmr.msra.gmra.mrb[8].mxu0 %v3394_v21  ;;  %v4222_v21 = vld [vmem:[%s4509_s7 + $0x468] sm:$0xff]  }
  0x97   : > { %2822 = vmatmul.mubr.bf16.vlgmr.msra.gmra.mrb[8].mxu1 %v3396_v23  ;;  %3814 = vmatpush3.bf16.msra.mxu0 %v4172_v27  ;;  %v4224_v23 = vld [vmem:[%s4509_s7 + $0x428] sm:$0xff]   ;;  %v4228_v27 = vld [vmem:[%s4509_s7 + $0x430] sm:$0xff]  }
  0x98   : > { %3836 = vmatpush3.bf16.msra.mxu1 %v4173_v28  ;;  %3815 = vmatprep.subr.bf16.mxu0 %v4174_v29  ;;  %v4229_v28 = vld [vmem:[%s4509_s7 + $0x4b0] sm:$0xff]   ;;  %v4230_v29 = vld [vmem:[%s4509_s7 + $0x478] sm:$0xff]  }
  0x99   : > { %3837 = vmatprep.subr.bf16.mxu1 %v4175_v30  ;;  %2862 = vmatprep.mubr.bf16.mxu0 %v3399_v61  ;;  %v4231_v30 = vld [vmem:[%s4509_s7 + $0x4f8] sm:$0xff]   ;;  %v4254_v61 = vld [vmem:[%s4509_s7 + $0x568] sm:$0xff]  }
  0x9a   : > { %2903 = vmatprep.mubr.bf16.mxu1 %v3401_v0  ;;  %v4257_v0 = vld [vmem:[%s4509_s7 + $0x5a8] sm:$0xff]  }
  0x9b   : > { %3816 = vmatpush3.bf16.msra.mxu0 %v4176_v31  ;;  %v4232_v31 = vld [vmem:[%s4509_s7 + $0x438] sm:$0xff]  }
  0x9c   : > { %3838 = vmatpush3.bf16.msra.mxu1 %v4177_v32  ;;  %3817 = vmatprep.subr.bf16.mxu0 %v4178_v33  ;;  %v4233_v32 = vld [vmem:[%s4509_s7 + $0x4b8] sm:$0xff]  }
  0x9d   : > { %3839 = vmatprep.subr.bf16.mxu1 %v4179_v34  ;;  %v352_v33 = vld [vmem:[%s4511_s8 + $0x40] sm:$0xff] }
  0x9e   : > { %v368_v34 = vld [vmem:[%s4511_s8 + $0xc0] sm:$0xff] }
  0x9f   : > { %3818 = vmatpush3.bf16.msra.mxu0 %v4180_v35  ;;  %v3402_v35 = vcombine.low %v352_v33, %v368_v34 }
  0xa0   : > { %3840 = vmatpush3.bf16.msra.mxu1 %v4181_v36  ;;  %3819 = vmatprep.subr.bf16.mxu0 %v4182_v37  ;;  %v3403_v36 = vcombine.high %v352_v33, %v368_v34  ;;  %v353_v37 = vld [vmem:[%s4511_s8 + $0x48] sm:$0xff] }
  0xa1   : > { %3841 = vmatprep.subr.bf16.mxu1 %v4183_v38  ;;  %v369_v38 = vld [vmem:[%s4511_s8 + $0xc8] sm:$0xff] }
  0xa2   : > { %v4282_v33 = vld [vmem:[%s4509_s7 + $0x660] sm:$0xff]  }
  0xa3   : > { %3820 = vmatpush3.bf16.msra.mxu0 %v4184_v39  ;;  %v3404_v39 = vcombine.low %v353_v37, %v369_v38  ;;  %v4283_v34 = vld [vmem:[%s4509_s7 + $0x6e0] sm:$0xff]  }
  0xa4   : > { %3842 = vmatpush3.bf16.msra.mxu1 %v4185_v40  ;;  %3821 = vmatprep.subr.bf16.mxu0 %v4186_v41  ;;  %v3405_v40 = vcombine.high %v353_v37, %v369_v38  ;;  %v4234_v41 = vld [vmem:[%s4509_s7 + $0x540] sm:$0xff]   ;;  %v4286_v37 = vld [vmem:[%s4509_s7 + $0x668] sm:$0xff]  }
  0xa5   : > { %3843 = vmatprep.subr.bf16.mxu1 %v4187_v42  ;;  %v4235_v42 = vld [vmem:[%s4509_s7 + $0x5c0] sm:$0xff]   ;;  %v4287_v38 = vld [vmem:[%s4509_s7 + $0x6e8] sm:$0xff]  }
  0xa7   : > { %3822 = vmatpush3.bf16.msra.mxu0 %v4188_v43  ;;  %v4236_v43 = vld [vmem:[%s4509_s7 + $0x500] sm:$0xff]  }
  0xa8   : > { %3844 = vmatpush3.bf16.msra.mxu1 %v4189_v44  ;;  %3823 = vmatprep.subr.bf16.mxu0 %v4190_v45  ;;  %v4237_v44 = vld [vmem:[%s4509_s7 + $0x580] sm:$0xff]   ;;  %v4238_v45 = vld [vmem:[%s4509_s7 + $0x548] sm:$0xff]  }
  0xa9   : > { %3845 = vmatprep.subr.bf16.mxu1 %v4191_v46  ;;  %v4239_v46 = vld [vmem:[%s4509_s7 + $0x5c8] sm:$0xff]  }
  0xab   : > { %3824 = vmatpush3.bf16.msra.mxu0 %v4192_v47  ;;  %v4240_v47 = vld [vmem:[%s4509_s7 + $0x508] sm:$0xff]  }
  0xac   : > { %3846 = vmatpush3.bf16.msra.mxu1 %v4193_v48  ;;  %3825 = vmatprep.subr.bf16.mxu0 %v4194_v49  ;;  %v4241_v48 = vld [vmem:[%s4509_s7 + $0x588] sm:$0xff]   ;;  %v4242_v49 = vld [vmem:[%s4509_s7 + $0x550] sm:$0xff]  }
  0xad   : > { %3847 = vmatprep.subr.bf16.mxu1 %v4195_v50  ;;  %v4243_v50 = vld [vmem:[%s4509_s7 + $0x5d0] sm:$0xff]  }
  0xaf   : > { %3826 = vmatpush3.bf16.msra.mxu0 %v4196_v51  ;;  %v4244_v51 = vld [vmem:[%s4509_s7 + $0x510] sm:$0xff]  }
  0xb0   : > { %3848 = vmatpush3.bf16.msra.mxu1 %v4197_v52  ;;  %3827 = vmatprep.subr.bf16.mxu0 %v4198_v53  ;;  %v4245_v52 = vld [vmem:[%s4509_s7 + $0x590] sm:$0xff]   ;;  %v4246_v53 = vld [vmem:[%s4509_s7 + $0x558] sm:$0xff]  }
  0xb1   : > { %3849 = vmatprep.subr.bf16.mxu1 %v4199_v54  ;;  %v4247_v54 = vld [vmem:[%s4509_s7 + $0x5d8] sm:$0xff]  }
  0xb3   : > { %3828 = vmatpush3.bf16.msra.mxu0 %v4200_v55  ;;  %v4248_v55 = vld [vmem:[%s4509_s7 + $0x518] sm:$0xff]  }
  0xb4   : > { %3850 = vmatpush3.bf16.msra.mxu1 %v4201_v56  ;;  %3857 = vmatprep.subr.bf16.mxu0 %v4202_v1  ;;  %v4249_v56 = vld [vmem:[%s4509_s7 + $0x598] sm:$0xff]   ;;  %v4258_v1 = vld [vmem:[%s4509_s7 + $0x570] sm:$0xff]  }
  0xb5   : > { %3879 = vmatprep.subr.bf16.mxu1 %v4203_v2  ;;  %v4259_v2 = vld [vmem:[%s4509_s7 + $0x5f0] sm:$0xff]  }
  0xb6   : > { %2863 = vmatmul.mubr.bf16.vlgmr.msra.gmra.mrb[12].mxu0 %v3398_v60  ;;  %v4253_v60 = vld [vmem:[%s4509_s7 + $0x5a0] sm:$0xff]  }
  0xb7   : > { %2904 = vmatmul.mubr.bf16.vlgmr.msra.gmra.mrb[12].mxu1 %v3400_v63  ;;  %3858 = vmatpush3.bf16.msra.mxu0 %v4204_v3  ;;  %v4256_v63 = vld [vmem:[%s4509_s7 + $0x528] sm:$0xff]   ;;  %v4260_v3 = vld [vmem:[%s4509_s7 + $0x530] sm:$0xff]  }
  0xb8   : > { %3880 = vmatpush3.bf16.msra.mxu1 %v4205_v4  ;;  %3859 = vmatprep.subr.bf16.mxu0 %v4206_v5  ;;  %v4261_v4 = vld [vmem:[%s4509_s7 + $0x5b0] sm:$0xff]   ;;  %v4262_v5 = vld [vmem:[%s4509_s7 + $0x578] sm:$0xff]  }
  0xb9   : > { %3881 = vmatprep.subr.bf16.mxu1 %v4207_v6  ;;  %2944 = vmatprep.mubr.bf16.mxu0 %v3403_v36  ;;  %v4263_v6 = vld [vmem:[%s4509_s7 + $0x5f8] sm:$0xff]   ;;  %v4285_v36 = vld [vmem:[%s4509_s7 + $0x6a0] sm:$0xff]  }
  0xba   : > { %2985 = vmatprep.mubr.bf16.mxu1 %v3405_v40  ;;  %v4289_v40 = vld [vmem:[%s4509_s7 + $0x6a8] sm:$0xff]  }
  0xbb   : > { %3860 = vmatpush3.bf16.msra.mxu0 %v4208_v7  ;;  %v4264_v7 = vld [vmem:[%s4509_s7 + $0x538] sm:$0xff]  }
  0xbc   : > { %3882 = vmatpush3.bf16.msra.mxu1 %v4209_v8  ;;  %3861 = vmatprep.subr.bf16.mxu0 %v4210_v9  ;;  %v4265_v8 = vld [vmem:[%s4509_s7 + $0x5b8] sm:$0xff]   ;;  %v354_v9 = vld [vmem:[%s4511_s8 + $0x50] sm:$0xff] }
  0xbd   : > { %3883 = vmatprep.subr.bf16.mxu1 %v4211_v10  ;;  %v370_v10 = vld [vmem:[%s4511_s8 + $0xd0] sm:$0xff] }
  0xbf   : > { %3862 = vmatpush3.bf16.msra.mxu0 %v4212_v11  ;;  %v355_v11 = vld [vmem:[%s4511_s8 + $0x58] sm:$0xff] }
  0xc0   : > { %3884 = vmatpush3.bf16.msra.mxu1 %v4213_v12  ;;  %3863 = vmatprep.subr.bf16.mxu0 %v4214_v13  ;;  %v371_v12 = vld [vmem:[%s4511_s8 + $0xd8] sm:$0xff]  ;;  %v3406_v13 = vcombine.low %v354_v9, %v370_v10 }
  0xc1   : > { %3885 = vmatprep.subr.bf16.mxu1 %v4215_v14  ;;  %v3407_v14 = vcombine.high %v354_v9, %v370_v10  ;;  %v4313_v10 = vld [vmem:[%s4509_s7 + $0x798] sm:$0xff]  }
  0xc3   : > { %3864 = vmatpush3.bf16.msra.mxu0 %v4216_v15  ;;  %v3408_v15 = vcombine.low %v355_v11, %v371_v12 }
  0xc4   : > { %3886 = vmatpush3.bf16.msra.mxu1 %v4217_v16  ;;  %3865 = vmatprep.subr.bf16.mxu0 %v4218_v17  ;;  %v3409_v16 = vcombine.high %v355_v11, %v371_v12  ;;  %v4266_v17 = vld [vmem:[%s4509_s7 + $0x640] sm:$0xff]  }
  0xc5   : > { %3887 = vmatprep.subr.bf16.mxu1 %v4219_v18  ;;  %v4267_v18 = vld [vmem:[%s4509_s7 + $0x6c0] sm:$0xff]  }
  0xc6   : > { %v4314_v12 = vld [vmem:[%s4509_s7 + $0x760] sm:$0xff]  }
  0xc7   : > { %3866 = vmatpush3.bf16.msra.mxu0 %v4220_v19  ;;  %v4268_v19 = vld [vmem:[%s4509_s7 + $0x600] sm:$0xff]  }
  0xc8   : > { %3888 = vmatpush3.bf16.msra.mxu1 %v4221_v20  ;;  %3867 = vmatprep.subr.bf16.mxu0 %v4222_v21  ;;  %v4269_v20 = vld [vmem:[%s4509_s7 + $0x680] sm:$0xff]   ;;  %v4270_v21 = vld [vmem:[%s4509_s7 + $0x648] sm:$0xff]  }
  0xc9   : > { %3889 = vmatprep.subr.bf16.mxu1 %v4223_v22  ;;  %v4271_v22 = vld [vmem:[%s4509_s7 + $0x6c8] sm:$0xff]  }
  0xcb   : > { %3868 = vmatpush3.bf16.msra.mxu0 %v4224_v23  ;;  %v4272_v23 = vld [vmem:[%s4509_s7 + $0x608] sm:$0xff]  }
  0xcc   : > { %3890 = vmatpush3.bf16.msra.mxu1 %v4225_v24  ;;  %3869 = vmatprep.subr.bf16.mxu0 %v4226_v25  ;;  %v4273_v24 = vld [vmem:[%s4509_s7 + $0x688] sm:$0xff]   ;;  %v4274_v25 = vld [vmem:[%s4509_s7 + $0x650] sm:$0xff]  }
  0xcd   : > { %3891 = vmatprep.subr.bf16.mxu1 %v4227_v26  ;;  %v4275_v26 = vld [vmem:[%s4509_s7 + $0x6d0] sm:$0xff]  }
  0xcf   : > { %3870 = vmatpush3.bf16.msra.mxu0 %v4228_v27  ;;  %v4276_v27 = vld [vmem:[%s4509_s7 + $0x610] sm:$0xff]  }
  0xd0   : > { %3892 = vmatpush3.bf16.msra.mxu1 %v4229_v28  ;;  %3871 = vmatprep.subr.bf16.mxu0 %v4230_v29  ;;  %v4277_v28 = vld [vmem:[%s4509_s7 + $0x690] sm:$0xff]   ;;  %v4278_v29 = vld [vmem:[%s4509_s7 + $0x658] sm:$0xff]  }
  0xd1   : > { %3893 = vmatprep.subr.bf16.mxu1 %v4231_v30  ;;  %v4279_v30 = vld [vmem:[%s4509_s7 + $0x6d8] sm:$0xff]  }
  0xd3   : > { %3872 = vmatpush3.bf16.msra.mxu0 %v4232_v31  ;;  %v4280_v31 = vld [vmem:[%s4509_s7 + $0x618] sm:$0xff]  }
  0xd4   : > { %3894 = vmatpush3.bf16.msra.mxu1 %v4233_v32  ;;  %3901 = vmatprep.subr.bf16.mxu0 %v4234_v41  ;;  %v4281_v32 = vld [vmem:[%s4509_s7 + $0x698] sm:$0xff]   ;;  %v4290_v41 = vld [vmem:[%s4509_s7 + $0x670] sm:$0xff]  }
  0xd5   : > { %3923 = vmatprep.subr.bf16.mxu1 %v4235_v42  ;;  %v4291_v42 = vld [vmem:[%s4509_s7 + $0x6f0] sm:$0xff]  }
  0xd6   : > { %2945 = vmatmul.mubr.bf16.vlgmr.msra.gmra.mrb[16].mxu0 %v3402_v35  ;;  %v4284_v35 = vld [vmem:[%s4509_s7 + $0x620] sm:$0xff]  }
  0xd7   : > { %2986 = vmatmul.mubr.bf16.vlgmr.msra.gmra.mrb[16].mxu1 %v3404_v39  ;;  %3902 = vmatpush3.bf16.msra.mxu0 %v4236_v43  ;;  %v4288_v39 = vld [vmem:[%s4509_s7 + $0x628] sm:$0xff]   ;;  %v4292_v43 = vld [vmem:[%s4509_s7 + $0x630] sm:$0xff]  }
  0xd8   : > { %3924 = vmatpush3.bf16.msra.mxu1 %v4237_v44  ;;  %3903 = vmatprep.subr.bf16.mxu0 %v4238_v45  ;;  %v4293_v44 = vld [vmem:[%s4509_s7 + $0x6b0] sm:$0xff]   ;;  %v4294_v45 = vld [vmem:[%s4509_s7 + $0x678] sm:$0xff]  }
  0xd9   : > { %3925 = vmatprep.subr.bf16.mxu1 %v4239_v46  ;;  %3026 = vmatprep.mubr.bf16.mxu0 %v3407_v14  ;;  %v4295_v46 = vld [vmem:[%s4509_s7 + $0x6f8] sm:$0xff]  }
  0xda   : > { %3067 = vmatprep.mubr.bf16.mxu1 %v3409_v16 }
  0xdb   : > { %3904 = vmatpush3.bf16.msra.mxu0 %v4240_v47  ;;  %v4296_v47 = vld [vmem:[%s4509_s7 + $0x638] sm:$0xff]  }
  0xdc   : > { %3926 = vmatpush3.bf16.msra.mxu1 %v4241_v48  ;;  %3905 = vmatprep.subr.bf16.mxu0 %v4242_v49  ;;  %v4297_v48 = vld [vmem:[%s4509_s7 + $0x6b8] sm:$0xff]  }
  0xdd   : > { %3927 = vmatprep.subr.bf16.mxu1 %v4243_v50  ;;  %v356_v49 = vld [vmem:[%s4511_s8 + $0x60] sm:$0xff] }
  0xde   : > { %v372_v50 = vld [vmem:[%s4511_s8 + $0xe0] sm:$0xff] }
  0xdf   : > { %3906 = vmatpush3.bf16.msra.mxu0 %v4244_v51  ;;  %v357_v51 = vld [vmem:[%s4511_s8 + $0x68] sm:$0xff] }
  0xe0   : > { %3928 = vmatpush3.bf16.msra.mxu1 %v4245_v52  ;;  %3907 = vmatprep.subr.bf16.mxu0 %v4246_v53  ;;  %v3410_v52 = vcombine.low %v356_v49, %v372_v50  ;;  %v3411_v53 = vcombine.high %v356_v49, %v372_v50 }
  0xe1   : > { %3929 = vmatprep.subr.bf16.mxu1 %v4247_v54  ;;  %v373_v54 = vld [vmem:[%s4511_s8 + $0xe8] sm:$0xff] }
  0xe3   : > { %3908 = vmatpush3.bf16.msra.mxu0 %v4248_v55  ;;  %v3412_v55 = vcombine.low %v357_v51, %v373_v54 }
  0xe4   : > { %3930 = vmatpush3.bf16.msra.mxu1 %v4249_v56  ;;  %3909 = vmatprep.subr.bf16.mxu0 %v4250_v57  ;;  %v3413_v56 = vcombine.high %v357_v51, %v373_v54  ;;  %v4298_v57 = vld [vmem:[%s4509_s7 + $0x740] sm:$0xff]  }
  0xe5   : > { %3931 = vmatprep.subr.bf16.mxu1 %v4251_v58  ;;  %v4299_v58 = vld [vmem:[%s4509_s7 + $0x7c0] sm:$0xff]  }
  0xe7   : > { %3910 = vmatpush3.bf16.msra.mxu0 %v4252_v59  ;;  %v4300_v59 = vld [vmem:[%s4509_s7 + $0x700] sm:$0xff]  }
  0xe8   : > { %3932 = vmatpush3.bf16.msra.mxu1 %v4253_v60  ;;  %3911 = vmatprep.subr.bf16.mxu0 %v4254_v61  ;;  %v4301_v60 = vld [vmem:[%s4509_s7 + $0x780] sm:$0xff]   ;;  %v4302_v61 = vld [vmem:[%s4509_s7 + $0x748] sm:$0xff]  }
  0xe9   : > { %3933 = vmatprep.subr.bf16.mxu1 %v4255_v62  ;;  %v4303_v62 = vld [vmem:[%s4509_s7 + $0x7c8] sm:$0xff]  }
  0xeb   : > { %3912 = vmatpush3.bf16.msra.mxu0 %v4256_v63  ;;  %v4304_v63 = vld [vmem:[%s4509_s7 + $0x708] sm:$0xff]  }
  0xec   : > { %3934 = vmatpush3.bf16.msra.mxu1 %v4257_v0  ;;  %3913 = vmatprep.subr.bf16.mxu0 %v4258_v1  ;;  %v4305_v0 = vld [vmem:[%s4509_s7 + $0x788] sm:$0xff]   ;;  %v4306_v1 = vld [vmem:[%s4509_s7 + $0x750] sm:$0xff]  }
  0xed   : > { %3935 = vmatprep.subr.bf16.mxu1 %v4259_v2  ;;  %v4307_v2 = vld [vmem:[%s4509_s7 + $0x7d0] sm:$0xff]  }
  0xef   : > { %3914 = vmatpush3.bf16.msra.mxu0 %v4260_v3  ;;  %v4308_v3 = vld [vmem:[%s4509_s7 + $0x710] sm:$0xff]  }
  0xf0   : > { %3936 = vmatpush3.bf16.msra.mxu1 %v4261_v4  ;;  %3915 = vmatprep.subr.bf16.mxu0 %v4262_v5  ;;  %v4309_v4 = vld [vmem:[%s4509_s7 + $0x790] sm:$0xff]   ;;  %v4310_v5 = vld [vmem:[%s4509_s7 + $0x758] sm:$0xff]  }
  0xf1   : > { %3937 = vmatprep.subr.bf16.mxu1 %v4263_v6  ;;  %v4311_v6 = vld [vmem:[%s4509_s7 + $0x7d8] sm:$0xff]  }
  0xf3   : > { %3916 = vmatpush3.bf16.msra.mxu0 %v4264_v7 }
  0xf4   : > { %3938 = vmatpush3.bf16.msra.mxu1 %v4265_v8  ;;  %3945 = vmatprep.subr.bf16.mxu0 %v4266_v17  ;;  %v4312_v8 = vld [vmem:[%s4509_s7 + $0x718] sm:$0xff]  }
  0xf5   : > { %3967 = vmatprep.subr.bf16.mxu1 %v4267_v18  ;;  %v4316_v18 = vld [vmem:[%s4509_s7 + $0x720] sm:$0xff]  }
  0xf6   : > { %3027 = vmatmul.mubr.bf16.vlgmr.msra.gmra.mrb[20].mxu0 %v3406_v13 }
  0xf7   : > { %3068 = vmatmul.mubr.bf16.vlgmr.msra.gmra.mrb[20].mxu1 %v3408_v15  ;;  %3946 = vmatpush3.bf16.msra.mxu0 %v4268_v19  ;;  %v4315_v15 = vld [vmem:[%s4509_s7 + $0x7e0] sm:$0xff]  }
  0xf8   : > { %3968 = vmatpush3.bf16.msra.mxu1 %v4269_v20  ;;  %3947 = vmatprep.subr.bf16.mxu0 %v4270_v21  ;;  %v4317_v20 = vld [vmem:[%s4509_s7 + $0x7a0] sm:$0xff]  }
  0xf9   : > { %3969 = vmatprep.subr.bf16.mxu1 %v4271_v22  ;;  %3108 = vmatprep.mubr.bf16.mxu0 %v3411_v53 }
  0xfa   : > { %3149 = vmatprep.mubr.bf16.mxu1 %v3413_v56 }
  0xfb   : > { %3948 = vmatpush3.bf16.msra.mxu0 %v4272_v23  ;;  %v4318_v23 = vld [vmem:[%s4509_s7 + $0x768] sm:$0xff]  }
  0xfc   : > { %3970 = vmatpush3.bf16.msra.mxu1 %v4273_v24  ;;  %3949 = vmatprep.subr.bf16.mxu0 %v4274_v25 }
  0xfd   : > { %3971 = vmatprep.subr.bf16.mxu1 %v4275_v26  ;;  %v4319_v26 = vld [vmem:[%s4509_s7 + $0x7e8] sm:$0xff]  }
  0xff   : > { %3950 = vmatpush3.bf16.msra.mxu0 %v4276_v27 }
 0x100   : > { %3972 = vmatpush3.bf16.msra.mxu1 %v4277_v28  ;;  %3951 = vmatprep.subr.bf16.mxu0 %v4278_v29  ;;  %v4320_v28 = vld [vmem:[%s4509_s7 + $0x728] sm:$0xff]  }
 0x101   : > { %3973 = vmatprep.subr.bf16.mxu1 %v4279_v30  ;;  %v4321_v29 = vld [vmem:[%s4509_s7 + $0x7a8] sm:$0xff]  }
 0x103   : > { %3952 = vmatpush3.bf16.msra.mxu0 %v4280_v31  ;;  %v4322_v31 = vld [vmem:[%s4509_s7 + $0x770] sm:$0xff]  }
 0x104   : > { %3974 = vmatpush3.bf16.msra.mxu1 %v4281_v32  ;;  %3953 = vmatprep.subr.bf16.mxu0 %v4282_v33  ;;  %v4323_v32 = vld [vmem:[%s4509_s7 + $0x7f0] sm:$0xff]  }
 0x105   : > { %3975 = vmatprep.subr.bf16.mxu1 %v4283_v34  ;;  %v4324_v33 = vld [vmem:[%s4509_s7 + $0x730] sm:$0xff]  }
 0x106   : > { %v4325_v34 = vld [vmem:[%s4509_s7 + $0x7b0] sm:$0xff]  }
 0x107   : > { %3954 = vmatpush3.bf16.msra.mxu0 %v4284_v35  ;;  %v4326_v35 = vld [vmem:[%s4509_s7 + $0x778] sm:$0xff]  }
 0x108   : > { %3976 = vmatpush3.bf16.msra.mxu1 %v4285_v36  ;;  %3955 = vmatprep.subr.bf16.mxu0 %v4286_v37  ;;  %v4327_v36 = vld [vmem:[%s4509_s7 + $0x7f8] sm:$0xff]  }
 0x109   : > { %3977 = vmatprep.subr.bf16.mxu1 %v4287_v38  ;;  %v4328_v37 = vld [vmem:[%s4509_s7 + $0x738] sm:$0xff]  }
 0x10a   : > { %v4329_v38 = vld [vmem:[%s4509_s7 + $0x7b8] sm:$0xff]  }
 0x10b   : > { %3956 = vmatpush3.bf16.msra.mxu0 %v4288_v39  ;;  %v358_v39 = vld [vmem:[%s4511_s8 + $0x70] sm:$0xff] }
 0x10c   : > { %3978 = vmatpush3.bf16.msra.mxu1 %v4289_v40  ;;  %3957 = vmatprep.subr.bf16.mxu0 %v4290_v41  ;;  %v374_v40 = vld [vmem:[%s4511_s8 + $0xf0] sm:$0xff] }
 0x10d   : > { %3979 = vmatprep.subr.bf16.mxu1 %v4291_v42  ;;  %v3414_v41 = vcombine.low %v358_v39, %v374_v40  ;;  %v3415_v42 = vcombine.high %v358_v39, %v374_v40 }
 0x10f   : > { %3958 = vmatpush3.bf16.msra.mxu0 %v4292_v43  ;;  %v359_v43 = vld [vmem:[%s4511_s8 + $0x78] sm:$0xff] }
 0x110   : > { %3980 = vmatpush3.bf16.msra.mxu1 %v4293_v44  ;;  %3959 = vmatprep.subr.bf16.mxu0 %v4294_v45  ;;  %v375_v44 = vld [vmem:[%s4511_s8 + $0xf8] sm:$0xff] }
 0x111   : > { %3981 = vmatprep.subr.bf16.mxu1 %v4295_v46  ;;  %v3416_v45 = vcombine.low %v359_v43, %v375_v44  ;;  %v3417_v46 = vcombine.high %v359_v43, %v375_v44 }
 0x113   : > { %3960 = vmatpush3.bf16.msra.mxu0 %v4296_v47 }
 0x114   : > { %3982 = vmatpush3.bf16.msra.mxu1 %v4297_v48  ;;  %3989 = vmatprep.subr.bf16.mxu0 %v4298_v57 }
 0x115   : > { %4011 = vmatprep.subr.bf16.mxu1 %v4299_v58 }
 0x116   : > { %3109 = vmatmul.mubr.bf16.vlgmr.msra.gmra.mrb[24].mxu0 %v3410_v52 }
 0x117   : > { %3150 = vmatmul.mubr.bf16.vlgmr.msra.gmra.mrb[24].mxu1 %v3412_v55  ;;  %3990 = vmatpush3.bf16.msra.mxu0 %v4300_v59 }
 0x118   : > { %4012 = vmatpush3.bf16.msra.mxu1 %v4301_v60  ;;  %3991 = vmatprep.subr.bf16.mxu0 %v4302_v61 }
 0x119   : > { %4013 = vmatprep.subr.bf16.mxu1 %v4303_v62  ;;  %3190 = vmatprep.mubr.bf16.mxu0 %v3415_v42 }
 0x11a   : > { %3231 = vmatprep.mubr.bf16.mxu1 %v3417_v46 }
 0x11b   : > { %3992 = vmatpush3.bf16.msra.mxu0 %v4304_v63 }
 0x11c   : > { %4014 = vmatpush3.bf16.msra.mxu1 %v4305_v0  ;;  %3993 = vmatprep.subr.bf16.mxu0 %v4306_v1 }
 0x11d   : > { %4015 = vmatprep.subr.bf16.mxu1 %v4307_v2 }
 0x11f   : > { %3994 = vmatpush3.bf16.msra.mxu0 %v4308_v3 }
 0x120   : > { %4016 = vmatpush3.bf16.msra.mxu1 %v4309_v4  ;;  %3995 = vmatprep.subr.bf16.mxu0 %v4310_v5 }
 0x121   : > { %4017 = vmatprep.subr.bf16.mxu1 %v4311_v6 }
 0x123   : > { %3996 = vmatpush3.bf16.msra.mxu0 %v4312_v8 }
 0x124   : > { %4018 = vmatpush3.bf16.msra.mxu1 %v4313_v10  ;;  %3997 = vmatprep.subr.bf16.mxu0 %v4314_v12 }
 0x125   : > { %4019 = vmatprep.subr.bf16.mxu1 %v4315_v15 }
 0x127   : > { %3998 = vmatpush3.bf16.msra.mxu0 %v4316_v18 }
 0x128   : > { %4020 = vmatpush3.bf16.msra.mxu1 %v4317_v20  ;;  %3999 = vmatprep.subr.bf16.mxu0 %v4318_v23 }
 0x129   : > { %v3697_v7 = vpop.f32.mrb[0].mxu0  ;;  %4021 = vmatprep.subr.bf16.mxu1 %v4319_v26 }
 0x12a   : > { %v3719_v9 = vpop.f32.mrb[0].mxu1  ;;  %v3698_v11 = vpop.f32.mrb[1].mxu0 }
 0x12b   : > { %v3699_v13 = vadd.f32 %v3698_v11, %v3697_v7  ;;  %v3720_v14 = vpop.f32.mrb[1].mxu1  ;;  %v3700_v17 = vpop.f32.mrb[2].mxu0  ;;  %4000 = vmatpush3.bf16.msra.mxu0 %v4320_v28 }
 0x12c   : > { %v3721_v16 = vadd.f32 %v3720_v14, %v3719_v9  ;;  %v3722_v19 = vpop.f32.mrb[2].mxu1  ;;  %v3701_v22 = vpop.f32.mrb[3].mxu0  ;;  %4022 = vmatpush3.bf16.msra.mxu1 %v4321_v29  ;;  %4001 = vmatprep.subr.bf16.mxu0 %v4322_v31 }
 0x12d   : > { %v3702_v24 = vadd.f32 %v3701_v22, %v3700_v17  ;;  %v3723_v25 = vpop.f32.mrb[3].mxu1  ;;  %4023 = vmatprep.subr.bf16.mxu1 %v4323_v32 }
 0x12e   : > { %v2660_v21 = vadd.f32 %v3721_v16, %v3699_v13  ;;  %v3724_v27 = vadd.f32 %v3723_v25, %v3722_v19 }
 0x12f   : > { %4002 = vmatpush3.bf16.msra.mxu0 %v4324_v33 }
 0x130   : > { %v2663_v30 = vadd.f32 %v3724_v27, %v3702_v24  ;;  %4024 = vmatpush3.bf16.msra.mxu1 %v4325_v34  ;;  %4003 = vmatprep.subr.bf16.mxu0 %v4326_v35 }
 0x131   : > { %4025 = vmatprep.subr.bf16.mxu1 %v4327_v36 }
 0x133   : > { %4004 = vmatpush3.bf16.msra.mxu0 %v4328_v37 }
 0x134   : > { %4026 = vmatpush3.bf16.msra.mxu1 %v4329_v38 }
 0x136   : > { %3191 = vmatmul.mubr.bf16.vlgmr.msra.gmra.mrb[28].mxu0 %v3414_v41 }
 0x137   : > { %3232 = vmatmul.mubr.bf16.vlgmr.msra.gmra.mrb[28].mxu1 %v3416_v45 }
 0x149   : > { %v3741_v47 = vpop.f32.mrb[4].mxu0 }
 0x14a   : > { %v3763_v48 = vpop.f32.mrb[4].mxu1  ;;  %v3742_v49 = vpop.f32.mrb[5].mxu0 }
 0x14b   : > { %v3743_v50 = vadd.f32 %v3742_v49, %v3741_v47  ;;  %v3764_v51 = vpop.f32.mrb[5].mxu1  ;;  %v3744_v52 = vpop.f32.mrb[6].mxu0 }
 0x14c   : > { %v3765_v53 = vadd.f32 %v3764_v51, %v3763_v48  ;;  %v3766_v54 = vpop.f32.mrb[6].mxu1  ;;  %v3745_v55 = vpop.f32.mrb[7].mxu0 }
 0x14d   : > { %v2701_v56 = vadd.f32 %v3743_v50, %v2660_v21  ;;  %v3746_v57 = vadd.f32 %v3745_v55, %v3744_v52  ;;  %v3767_v58 = vpop.f32.mrb[7].mxu1 }
 0x14e   : > { %v3768_v59 = vadd.f32 %v3767_v58, %v3766_v54 }
 0x14f   : > { %v2742_v60 = vadd.f32 %v3765_v53, %v2701_v56  ;;  %v2704_v61 = vadd.f32 %v3746_v57, %v2663_v30 }
 0x151   : > { %v2745_v62 = vadd.f32 %v3768_v59, %v2704_v61 }
 0x169   : > { %v3785_v63 = vpop.f32.mrb[8].mxu0 }
 0x16a   : > { %v3807_v0 = vpop.f32.mrb[8].mxu1  ;;  %v3786_v1 = vpop.f32.mrb[9].mxu0 }
 0x16b   : > { %v3808_v2 = vpop.f32.mrb[9].mxu1  ;;  %v3787_v3 = vadd.f32 %v3786_v1, %v3785_v63  ;;  %v3788_v5 = vpop.f32.mrb[10].mxu0 }
 0x16c   : > { %v3809_v4 = vadd.f32 %v3808_v2, %v3807_v0  ;;  %v3810_v6 = vpop.f32.mrb[10].mxu1  ;;  %v3789_v7 = vpop.f32.mrb[11].mxu0 }
 0x16d   : > { %v3811_v8 = vpop.f32.mrb[11].mxu1  ;;  %v2783_v9 = vadd.f32 %v3787_v3, %v2742_v60  ;;  %v3790_v10 = vadd.f32 %v3789_v7, %v3788_v5 }
 0x16e   : > { %v3812_v11 = vadd.f32 %v3811_v8, %v3810_v6 }
 0x16f   : > { %v2824_v12 = vadd.f32 %v3809_v4, %v2783_v9  ;;  %v2786_v13 = vadd.f32 %v3790_v10, %v2745_v62 }
 0x171   : > { %v2827_v14 = vadd.f32 %v3812_v11, %v2786_v13 }
 0x189   : > { %v3829_v15 = vpop.f32.mrb[12].mxu0 }
 0x18a   : > { %v3851_v16 = vpop.f32.mrb[12].mxu1  ;;  %v3830_v17 = vpop.f32.mrb[13].mxu0 }
 0x18b   : > { %v3831_v18 = vadd.f32 %v3830_v17, %v3829_v15  ;;  %v3852_v19 = vpop.f32.mrb[13].mxu1  ;;  %v3832_v20 = vpop.f32.mrb[14].mxu0 }
 0x18c   : > { %v3853_v21 = vadd.f32 %v3852_v19, %v3851_v16  ;;  %v3854_v22 = vpop.f32.mrb[14].mxu1  ;;  %v3833_v23 = vpop.f32.mrb[15].mxu0 }
 0x18d   : > { %v2865_v24 = vadd.f32 %v3831_v18, %v2824_v12  ;;  %v3834_v25 = vadd.f32 %v3833_v23, %v3832_v20  ;;  %v3855_v26 = vpop.f32.mrb[15].mxu1 }
 0x18e   : > { %v3856_v27 = vadd.f32 %v3855_v26, %v3854_v22 }
 0x18f   : > { %v2906_v28 = vadd.f32 %v3853_v21, %v2865_v24  ;;  %v2868_v29 = vadd.f32 %v3834_v25, %v2827_v14 }
 0x191   : > { %v2909_v30 = vadd.f32 %v3856_v27, %v2868_v29  ;;  %v342_v27 = vld [vmem:[#allocation2] sm:$0xff] }
 0x1a9   : > { %v3873_v31 = vpop.f32.mrb[16].mxu0 }
 0x1aa   : > { %v3895_v32 = vpop.f32.mrb[16].mxu1  ;;  %v3874_v33 = vpop.f32.mrb[17].mxu0 }
 0x1ab   : > { %v3875_v34 = vadd.f32 %v3874_v33, %v3873_v31  ;;  %v3896_v35 = vpop.f32.mrb[17].mxu1  ;;  %v3876_v36 = vpop.f32.mrb[18].mxu0  ;;  %v343_v31 = vld [vmem:[#allocation2 + $0x8] sm:$0xff] }
 0x1ac   : > { %v3897_v37 = vadd.f32 %v3896_v35, %v3895_v32  ;;  %v3898_v38 = vpop.f32.mrb[18].mxu1  ;;  %v3877_v39 = vpop.f32.mrb[19].mxu0 }
 0x1ad   : > { %v2947_v40 = vadd.f32 %v3875_v34, %v2906_v28  ;;  %v3878_v41 = vadd.f32 %v3877_v39, %v3876_v36  ;;  %v3899_v42 = vpop.f32.mrb[19].mxu1  ;;  %v3675_v36 = vld [vmem:[%s4829_s2] ss:$0 sm:$0xff] (!%p3674_p11) }
 0x1ae   : > { %v3900_v43 = vadd.f32 %v3899_v42, %v3898_v38 }
 0x1af   : > { %v2988_v44 = vadd.f32 %v3897_v37, %v2947_v40  ;;  %v2950_v45 = vadd.f32 %v3878_v41, %v2909_v30 }
 0x1b1   : > { %v2991_v46 = vadd.f32 %v3900_v43, %v2950_v45 }
 0x1c9   : > { %v3917_v47 = vpop.f32.mrb[20].mxu0 }
 0x1ca   : > { %v3939_v48 = vpop.f32.mrb[20].mxu1  ;;  %v3918_v49 = vpop.f32.mrb[21].mxu0 }
 0x1cb   : > { %v3940_v50 = vpop.f32.mrb[21].mxu1  ;;  %v3919_v51 = vadd.f32 %v3918_v49, %v3917_v47  ;;  %v3920_v53 = vpop.f32.mrb[22].mxu0 }
 0x1cc   : > { %v3941_v52 = vadd.f32 %v3940_v50, %v3939_v48  ;;  %v3942_v54 = vpop.f32.mrb[22].mxu1  ;;  %v3921_v55 = vpop.f32.mrb[23].mxu0 }
 0x1cd   : > { %v3943_v56 = vpop.f32.mrb[23].mxu1  ;;  %v3029_v57 = vadd.f32 %v3919_v51, %v2988_v44  ;;  %v3922_v58 = vadd.f32 %v3921_v55, %v3920_v53 }
 0x1ce   : > { %v3944_v59 = vadd.f32 %v3943_v56, %v3942_v54 }
 0x1cf   : > { %v3070_v60 = vadd.f32 %v3941_v52, %v3029_v57  ;;  %v3032_v61 = vadd.f32 %v3922_v58, %v2991_v46 }
 0x1d1   : > { %v3073_v62 = vadd.f32 %v3944_v59, %v3032_v61 }
 0x1e9   : > { %v3961_v63 = vpop.f32.mrb[24].mxu0 }
 0x1ea   : > { %v3983_v0 = vpop.f32.mrb[24].mxu1  ;;  %v3962_v1 = vpop.f32.mrb[25].mxu0 }
 0x1eb   : > { %v3963_v2 = vadd.f32 %v3962_v1, %v3961_v63  ;;  %v3984_v3 = vpop.f32.mrb[25].mxu1  ;;  %v3964_v4 = vpop.f32.mrb[26].mxu0 }
 0x1ec   : > { %v3985_v5 = vadd.f32 %v3984_v3, %v3983_v0  ;;  %v3986_v6 = vpop.f32.mrb[26].mxu1  ;;  %v3965_v7 = vpop.f32.mrb[27].mxu0 }
 0x1ed   : > { %v3111_v8 = vadd.f32 %v3963_v2, %v3070_v60  ;;  %v3966_v9 = vadd.f32 %v3965_v7, %v3964_v4  ;;  %v3987_v10 = vpop.f32.mrb[27].mxu1 }
 0x1ee   : > { %v3988_v11 = vadd.f32 %v3987_v10, %v3986_v6 }
 0x1ef   : > { %v3152_v12 = vadd.f32 %v3985_v5, %v3111_v8  ;;  %v3114_v13 = vadd.f32 %v3966_v9, %v3073_v62 }
 0x1f1   : > { %v3155_v14 = vadd.f32 %v3988_v11, %v3114_v13 }
 0x209   : > { %v4005_v15 = vpop.f32.mrb[28].mxu0 }
 0x20a   : > { %v4027_v16 = vpop.f32.mrb[28].mxu1  ;;  %v4006_v17 = vpop.f32.mrb[29].mxu0 }
 0x20b   : > { %v4007_v18 = vadd.f32 %v4006_v17, %v4005_v15  ;;  %v4028_v19 = vpop.f32.mrb[29].mxu1  ;;  %v4008_v20 = vpop.f32.mrb[30].mxu0 }
 0x20c   : > { %v4029_v21 = vadd.f32 %v4028_v19, %v4027_v16  ;;  %v4030_v22 = vpop.f32.mrb[30].mxu1  ;;  %v4009_v23 = vpop.f32.mrb[31].mxu0 }
 0x20d   : > { %v3193_v24 = vadd.f32 %v4007_v18, %v3152_v12  ;;  %v4010_v25 = vadd.f32 %v4009_v23, %v4008_v20  ;;  %v4031_v26 = vpop.f32.mrb[31].mxu1 }
 0x20e   : > { %v4032_v28 = vadd.f32 %v4031_v26, %v4030_v22 }
 0x20f   : > { %v3234_v29 = vadd.f32 %v4029_v21, %v3193_v24  ;;  %v3196_v30 = vadd.f32 %v4010_v25, %v3155_v14  ;;  %3247 = sbr.rel (%p3674_p11) target bundleno = 546 (0x222), region = 63 }
 0x211   : > { %v3240_v32 = vadd.f32 %v3234_v29, %v342_v27  ;;  %v3237_v33 = vadd.f32 %v4032_v28, %v3196_v30 }
 0x213   : > { %3242 = vst [vmem:[#allocation2] sm:$0xff] %v3240_v32  ;;  %v3241_v34 = vadd.f32 %v3237_v33, %v343_v31 }
 0x215   : > { %3243 = vst [vmem:[#allocation2 + $0x8] sm:$0xff] %v3241_v34 }
 0x21a   : > { %v3248_v35 = vld [vmem:[#allocation2] sm:$0xff] }
 0x21b   : > { %v3257_v38 = vadd.f32 %v3675_v36, %v3248_v35 }
 0x21c   : > { %v3249_v37 = vld [vmem:[#allocation2 + $0x8] sm:$0xff] }
 0x21d   : > { %v3258_v39 = vadd.f32 %v3675_v36, %v3249_v37  ;;  %v3259_v40 = vmax.f32 %v3257_v38, 0.0 }
 0x21f   : > { %v3260_v41 = vmax.f32 %v3258_v39, 0.0  ;;  %3261 = vst [vmem:[%s4830_s3] sm:$0xff] %v3259_v40 }
 0x221   : > { %3262 = vst [vmem:[%s4830_s3 + $0x8] sm:$0xff] %v3260_v41 }
 0x222 PF: > { %s13_s16 = sadd.s32 1, %s4368_s16   ;;  %s4831_s12 = smov %s4356_s13 }
 0x223   : > { %p10_p12 = scmp.ge.s32.totalorder %s13_s16, 6   ;;  %s4832_s13 = smov %s4426_s20 }
 0x224   : > { %s4833_s14 = smov %s4364_s15  ;;  %s4834_s15 = smov %s4836_s17 }
 0x225   :  { %12 = sbr.rel (!%p10_p12) target bundleno = 3 (0x3), region = 104 }

</bundles_post_ra>
